<compile_context>
chip_gen: v5e
topology: v5e:2x2
jax: 0.10.0
libtpu: 0.0.40
codegen_flags: <defaults>
</compile_context>

<pallas_src>
import functools

import jax
import jax.numpy as jnp
import numpy as np
from jax.experimental import pallas as pl
from jax.experimental.pallas import tpu as pltpu


# ----------------------------------------------------------------------------
# In-kernel helpers
# ----------------------------------------------------------------------------
def _gn_relu(acc, gmask, gmask_t, rsel, rsel_t, rvalid, gamma_row, beta_row,
             inv_cnt, eps):
    """GroupNorm (two-pass variance) + ReLU with all reductions on the MXU.

    acc:      (M, Ncol) f32 pre-activation; rows hold Bt stacked samples (Ho
              valid rows each) plus "garbage" rows at the sample seams.
    gmask:    (G, Ncol)  1.0 where the lane belongs to group g (0 at pad lanes)
    gmask_t:  (Ncol, G)  transpose of gmask
    rsel:     (Bt, M)    1.0 at the valid rows of sample b
    rsel_t:   (M, Bt)    transpose of rsel
    rvalid:   (M, 1)     1.0 at valid rows, 0.0 at garbage rows
    inv_cnt:  python float, 1 / (Ho*Wo*(C//G))
    Garbage rows (and pad lanes) come out exactly 0, so the result can be
    written straight over the next conv's zero halo rows.
    """
    f32 = jnp.float32
    sums_rg = jnp.dot(acc, gmask_t, preferred_element_type=f32)            # (M, G)
    mean_bg = jnp.dot(rsel, sums_rg, preferred_element_type=f32) * inv_cnt  # (Bt, G)
    mean_lane = jnp.dot(jnp.dot(rsel_t, mean_bg, preferred_element_type=f32),
                        gmask, preferred_element_type=f32)                 # (M, Ncol)
    diff = acc - mean_lane
    sq_rg = jnp.dot(diff * diff, gmask_t, preferred_element_type=f32)      # (M, G)
    var_bg = jnp.dot(rsel, sq_rg, preferred_element_type=f32) * inv_cnt    # (Bt, G)
    inv_bg = jax.lax.rsqrt(var_bg + eps)
    inv_lane = jnp.dot(jnp.dot(rsel_t, inv_bg, preferred_element_type=f32),
                       gmask, preferred_element_type=f32)                  # (M, Ncol)
    # mean_lane / inv_lane are 0 at garbage rows and pad lanes; gating beta
    # with rvalid makes those rows exactly 0 after the affine + ReLU.
    y = diff * inv_lane * gamma_row + beta_row * rvalid
    return jnp.maximum(y, 0.0)


# ----------------------------------------------------------------------------
# Fused Down kernel (Bt batch items per grid step)
# ----------------------------------------------------------------------------
def down_kernel(x_ref, m1_ref, m2_ref, aux1_ref, gm1_ref, gm1t_ref,
                aux2_ref, gm2_ref, gm2t_ref, rsel_ref, rselt_ref,
                o_ref, xp1_ref, xp2_ref,
                *, Bt, Cin, Cmid, Cout, Ho, Wo, W, inv_cnt1, inv_cnt2, eps):
    f32 = jnp.float32
    Wp = Wo + 2
    Hfull = Bt * (Ho + 2)          # Bt stacked per-sample strips, 2 halo rows each
    M = Hfull - 2                  # matmul M dimension (valid + seam-garbage rows)

    # ---- zero ONLY the halo rows (interior rows are fully rewritten below;
    #      GN1's garbage rows are exact zeros and land on xp2's inner halos).
    zero1 = jnp.zeros((1, Cin * W), xp1_ref.dtype)
    for b in range(Bt):
        r0 = b * (Ho + 2)
        xp1_ref[r0:r0 + 1, :] = zero1
        xp1_ref[r0 + Ho + 1:r0 + Ho + 2, :] = zero1
    zero2 = jnp.zeros((1, Cmid * Wp), xp2_ref.dtype)
    xp2_ref[0:1, :] = zero2
    xp2_ref[Hfull - 1:Hfull, :] = zero2

    # ---- fused 2x2 max-pool, vectorized over the whole (Bt, Cin, Ho, 2W) block:
    #      vertical max of aligned halves, then one shifted horizontal max.
    #      Only even output lanes carry real pool results; odd / last lanes hit
    #      all-zero rows of the band matrix (they only need to be finite).
    x = x_ref[...]                                                   # f32
    vm = jnp.maximum(x[..., :W], x[..., W:])                         # (Bt,Cin,Ho,W)
    vs = jnp.concatenate([vm[..., 1:], vm[..., W - 1:]], axis=-1)    # shift left 1
    hm = jnp.maximum(vm, vs).astype(xp1_ref.dtype)                   # bf16 for MXU
    for b in range(Bt):
        r0 = b * (Ho + 2) + 1
        for c in range(Cin):
            xp1_ref[r0:r0 + Ho, c * W:(c + 1) * W] = hm[b, c]

    rvalid = jnp.sum(rselt_ref[...], axis=1, keepdims=True)          # (M, 1)

    # ---- conv1: 3 banded bf16 MXU matmuls (one per dy tap), f32 accumulation
    acc1 = jnp.zeros((M, Cmid * Wp), f32)
    for dy in range(3):
        acc1 = acc1 + jnp.dot(xp1_ref[dy:dy + M, :], m1_ref[dy],
                              preferred_element_type=f32)
    acc1 = acc1 + aux1_ref[0:1, :]

    # ---- GroupNorm1 + ReLU; result lands directly in conv2's padded input (bf16)
    y1 = _gn_relu(acc1, gm1_ref[...], gm1t_ref[...], rsel_ref[...],
                  rselt_ref[...], rvalid, aux1_ref[1:2, :], aux1_ref[2:3, :],
                  inv_cnt1, eps)
    xp2_ref[1:Hfull - 1, :] = y1.astype(xp2_ref.dtype)

    # ---- conv2: 3 banded bf16 matmuls + bias
    acc2 = jnp.zeros((M, Cout * Wo), f32)
    for dy in range(3):
        acc2 = acc2 + jnp.dot(xp2_ref[dy:dy + M, :], m2_ref[dy],
                              preferred_element_type=f32)
    acc2 = acc2 + aux2_ref[0:1, :]

    # ---- GroupNorm2 + ReLU -> lane-dense (Ho, Bt*Cout*Wo) output slab
    y2 = _gn_relu(acc2, gm2_ref[...], gm2t_ref[...], rsel_ref[...],
                  rselt_ref[...], rvalid, aux2_ref[1:2, :], aux2_ref[2:3, :],
                  inv_cnt2, eps)
    parts = [y2[b * (Ho + 2):b * (Ho + 2) + Ho, :] for b in range(Bt)]
    o_ref[0, :, :] = jnp.concatenate(parts, axis=1) if Bt > 1 else parts[0]


# ----------------------------------------------------------------------------
# Wrapper-side precomputation (weights only; done once per call, all tiny)
# ----------------------------------------------------------------------------
def _conv1_band_matrices(w1, W, Wo):
    """Banded RHS for conv1: folds dx taps, stride-2 pooled-lane selection and
    zero padding of both input and output.  w1: (3,3,Cin,Cmid) HWIO.
    Returns (3, Cin*W, Cmid*(Wo+2))."""
    Cin, Cmid = int(w1.shape[2]), int(w1.shape[3])
    sel_in = np.zeros((3, W, Wo), np.float32)
    for dx in range(3):
        for wo in range(Wo):
            wi = wo + dx - 1
            if 0 <= wi < Wo:
                sel_in[dx, 2 * wi, wo] = 1.0
    sel_out = np.zeros((Wo, Wo + 2), np.float32)
    sel_out[np.arange(Wo), np.arange(Wo) + 1] = 1.0
    t = jnp.einsum("yxio,xfw,wp->yifop", w1,
                   jnp.asarray(sel_in), jnp.asarray(sel_out))
    return t.reshape(3, Cin * W, Cmid * (Wo + 2))


def _conv2_band_matrices(w2, Wo):
    """Banded RHS for conv2.  w2: (3,3,Cmid,Cout).
    Returns (3, Cmid*(Wo+2), Cout*Wo)."""
    Cmid, Cout = int(w2.shape[2]), int(w2.shape[3])
    sel_in = np.zeros((3, Wo + 2, Wo), np.float32)
    for dx in range(3):
        for wo in range(Wo):
            sel_in[dx, wo + dx, wo] = 1.0
    t = jnp.einsum("yxmo,xqw->ymqow", w2, jnp.asarray(sel_in))
    return t.reshape(3, Cmid * (Wo + 2), Cout * Wo)


def _lane_vectors_padded(bias, gamma, beta, groups, Wo):
    """Per-lane vectors for the padded layout col = c*(Wo+2) + j (zeros at pads)."""
    C = int(bias.shape[0])
    Cg = C // groups
    valid = np.concatenate([[0.0], np.ones(Wo, np.float32), [0.0]]).astype(np.float32)
    valid_j = jnp.asarray(valid)[None, :]                       # (1, Wo+2)

    def expand(v):
        return (v[:, None] * valid_j).reshape(1, C * (Wo + 2))

    aux = jnp.concatenate([expand(bias), expand(gamma), expand(beta)], axis=0)
    gh = (np.arange(C)[None, :] // Cg == np.arange(groups)[:, None]).astype(np.float32)
    gmask = jnp.asarray((gh[:, :, None] * valid[None, None, :])
                        .reshape(groups, C * (Wo + 2)))
    return aux, gmask


def _lane_vectors_dense(bias, gamma, beta, groups, Wo):
    """Per-lane vectors for the dense output layout col = c*Wo + w."""
    C = int(bias.shape[0])
    Cg = C // groups
    aux = jnp.stack([jnp.repeat(bias, Wo), jnp.repeat(gamma, Wo),
                     jnp.repeat(beta, Wo)], axis=0)
    gh = (np.arange(C)[None, :] // Cg == np.arange(groups)[:, None]).astype(np.float32)
    gmask = jnp.asarray(np.repeat(gh, Wo, axis=1))
    return aux, gmask


def _pick_batch_tile(B, Ho, target_rows=128):
    """Largest divisor of B with Bt*Ho not far above ~128 (fills MXU rows)."""
    cap = max(1, (target_rows + Ho - 1) // Ho)
    bt = 1
    for d in range(1, B + 1):
        if B % d == 0 and d <= cap:
            bt = d
    return bt


def down_forward(x_nchw, params, eps=1e-5):
    """Down module forward: NCHW in, NCHW out (matches PyTorch)."""
    B, Cin, H, W = x_nchw.shape
    assert H % 2 == 0 and W % 2 == 0
    Ho, Wo = H // 2, W // 2
    Wp = Wo + 2
    w1, w2 = params["w1"], params["w2"]
    Cmid, Cout = int(w1.shape[3]), int(w2.shape[3])
    G1, G2 = int(params["G1"]), int(params["G2"])

    Bt = _pick_batch_tile(B, Ho)
    S = B // Bt
    Hfull = Bt * (Ho + 2)
    M = Hfull - 2

    # FREE contiguous reshape: row pairs (2h, 2h+1) side-by-side on the lane axis.
    x4 = x_nchw.reshape(B, Cin, Ho, 2 * W)

    # bf16 conv operands (MXU-native); GN / accumulation stay f32.
    m1 = _conv1_band_matrices(w1, W, Wo).astype(jnp.bfloat16)
    m2 = _conv2_band_matrices(w2, Wo).astype(jnp.bfloat16)
    aux1, gm1 = _lane_vectors_padded(params["b1"], params["g1"], params["be1"], G1, Wo)
    aux2, gm2 = _lane_vectors_dense(params["b2"], params["g2"], params["be2"], G2, Wo)
    gm1t, gm2t = gm1.T, gm2.T

    # Row-selection matrix: 1.0 at the Ho valid rows of each stacked sample.
    rsel_np = np.zeros((Bt, M), np.float32)
    for b in range(Bt):
        rsel_np[b, b * (Ho + 2):b * (Ho + 2) + Ho] = 1.0
    rsel = jnp.asarray(rsel_np)
    rselt = jnp.asarray(rsel_np.T)

    kernel = functools.partial(
        down_kernel, Bt=Bt, Cin=Cin, Cmid=Cmid, Cout=Cout, Ho=Ho, Wo=Wo, W=W,
        inv_cnt1=1.0 / float(Ho * Wo * (Cmid // G1)),
        inv_cnt2=1.0 / float(Ho * Wo * (Cout // G2)),
        eps=eps)

    const_shapes = [
        (3, Cin * W, Cmid * Wp), (3, Cmid * Wp, Cout * Wo),
        (3, Cmid * Wp), (G1, Cmid * Wp), (Cmid * Wp, G1),
        (3, Cout * Wo), (G2, Cout * Wo), (Cout * Wo, G2),
        (Bt, M), (M, Bt),
    ]

    def call(single_buffer_consts):
        def const_spec(shape):
            idx = lambda s: (0,) * len(shape)               # noqa: E731
            if single_buffer_consts:
                # grid-invariant operands: never re-DMA'd, so single-buffer them
                return pl.BlockSpec(shape, idx, pipeline_mode=pl.Buffered(1))
            return pl.BlockSpec(shape, idx)

        return pl.pallas_call(
            kernel,
            out_shape=jax.ShapeDtypeStruct((S, Ho, Bt * Cout * Wo), jnp.float32),
            grid=(S,),
            in_specs=[pl.BlockSpec((Bt, Cin, Ho, 2 * W), lambda s: (s, 0, 0, 0))]
                     + [const_spec(sh) for sh in const_shapes],
            out_specs=pl.BlockSpec((1, Ho, Bt * Cout * Wo), lambda s: (s, 0, 0)),
            scratch_shapes=[
                pltpu.VMEM((Hfull, Cin * W), jnp.bfloat16),     # pooled conv1 LHS
                pltpu.VMEM((Hfull, Cmid * Wp), jnp.bfloat16),   # padded conv2 LHS
            ],
            compiler_params=pltpu.CompilerParams(
                dimension_semantics=("parallel",)),
        )(x4, m1, m2, aux1, gm1, gm1t, aux2, gm2, gm2t, rsel, rselt)

    try:
        out = call(True)
    except Exception:
        # pl.Buffered / BlockSpec(pipeline_mode=...) unavailable in this JAX:
        # fall back to default double-buffering for the tiny constant operands.
        out = call(False)

    # (S, Ho, Bt*Cout*Wo) -> NCHW; only touches the (8x smaller) final output.
    out = out.reshape(S, Ho, Bt, Cout, Wo).transpose(0, 2, 3, 1, 4)
    return out.reshape(B, Cout, Ho, Wo)


# ----------------------------------------------------------------------------
# Pure-JAX reference (for correctness check)
# ----------------------------------------------------------------------------
def ref_down(x_nchw, params, eps=1e-5):
    x = jax.lax.reduce_window(x_nchw, -jnp.inf, jax.lax.max,
                              (1, 1, 2, 2), (1, 1, 2, 2), "VALID")

    def block(x, w_hwio, bias, gamma, beta, G):
        w_oihw = jnp.transpose(w_hwio, (3, 2, 0, 1))
        y = jax.lax.conv_general_dilated(
            x, w_oihw, (1, 1), ((1, 1), (1, 1)),
            dimension_numbers=("NCHW", "OIHW", "NCHW"))
        y = y + bias[None, :, None, None]
        B, C, H, W = y.shape
        yg = y.reshape(B, G, C // G, H, W)
        mean = yg.mean(axis=(2, 3, 4), keepdims=True)
        var = ((yg - mean) ** 2).mean(axis=(2, 3, 4), keepdims=True)
        yn = ((yg - mean) / jnp.sqrt(var + eps)).reshape(B, C, H, W)
        yn = yn * gamma[None, :, None, None] + beta[None, :, None, None]
        return jnp.maximum(yn, 0.0)

    x = block(x, params["w1"], params["b1"], params["g1"], params["be1"], params["G1"])
    x = block(x, params["w2"], params["b2"], params["g2"], params["be2"], params["G2"])
    return x


# ----------------------------------------------------------------------------
if __name__ == "__main__":
    B, Cin, H, W = 2, 4, 16, 16
    Cout = 8
    Cmid = Cout                         # DoubleConv default: mid = out
    G1 = int(np.minimum(Cmid, 4))
    G2 = int(np.minimum(Cout, 4))

    key = jax.random.PRNGKey(0)
    ks = jax.random.split(key, 9)
    x = jax.random.normal(ks[0], (B, Cin, H, W), jnp.float32)

    params = {
        "w1": 0.2 * jax.random.normal(ks[1], (3, 3, Cin, Cmid), jnp.float32),
        "b1": 0.1 * jax.random.normal(ks[2], (Cmid,), jnp.float32),
        "g1": 1.0 + 0.1 * jax.random.normal(ks[3], (Cmid,), jnp.float32),
        "be1": 0.1 * jax.random.normal(ks[4], (Cmid,), jnp.float32),
        "w2": 0.2 * jax.random.normal(ks[5], (3, 3, Cmid, Cout), jnp.float32),
        "b2": 0.1 * jax.random.normal(ks[6], (Cout,), jnp.float32),
        "g2": 1.0 + 0.1 * jax.random.normal(ks[7], (Cout,), jnp.float32),
        "be2": 0.1 * jax.random.normal(ks[8], (Cout,), jnp.float32),
        "G1": G1,
        "G2": G2,
    }

    out = jax.block_until_ready(down_forward(x, params))
    assert out.shape == (B, Cout, H // 2, W // 2), out.shape

    ref = jax.block_until_ready(ref_down(x, params))
    err = float(jnp.max(jnp.abs(out - ref)))
    # bf16 conv operands (f32 accumulation / GroupNorm) vs. an all-f32 reference:
    # expected max deviation is ~1e-2 after two conv+GN layers.
    assert err < 1e-1, f"max abs err {err}"

    print("KERNEL_OK")
</pallas_src>

<mosaic_0001>
module attributes {stable_mosaic.version = 11 : i64} {
  func.func @down_kernel(%arg0: i32, %arg1: memref<2x4x8x32xf32, #tpu.memory_space<vmem>>, %arg2: memref<3x64x80xbf16, #tpu.memory_space<vmem>>, %arg3: memref<3x80x64xbf16, #tpu.memory_space<vmem>>, %arg4: memref<3x80xf32, #tpu.memory_space<vmem>>, %arg5: memref<4x80xf32, #tpu.memory_space<vmem>>, %arg6: memref<80x4xf32, #tpu.memory_space<vmem>>, %arg7: memref<3x64xf32, #tpu.memory_space<vmem>>, %arg8: memref<4x64xf32, #tpu.memory_space<vmem>>, %arg9: memref<64x4xf32, #tpu.memory_space<vmem>>, %arg10: memref<2x18xf32, #tpu.memory_space<vmem>>, %arg11: memref<18x2xf32, #tpu.memory_space<vmem>>, %arg12: memref<1x8x128xf32, #tpu.memory_space<vmem>>, %arg13: memref<20x64xbf16, #tpu.memory_space<vmem>>, %arg14: memref<20x80xbf16, #tpu.memory_space<vmem>>) attributes {dimension_semantics = [#tpu.dimension_semantics<parallel>], iteration_bounds = array<i64: 1>, scalar_prefetch = 0 : i64, scratch_operands = 2 : i64, tpu.core_type = #tpu.core_type<tc>, window_params = [{transform_indices = @transform_0, window_bounds = array<i64: 2, 4, 8, 32>}, {pipeline_mode = #tpu.pipeline_mode<synchronous>, transform_indices = @transform_1, window_bounds = array<i64: 3, 64, 80>}, {pipeline_mode = #tpu.pipeline_mode<synchronous>, transform_indices = @transform_2, window_bounds = array<i64: 3, 80, 64>}, {pipeline_mode = #tpu.pipeline_mode<synchronous>, transform_indices = @transform_3, window_bounds = array<i64: 3, 80>}, {pipeline_mode = #tpu.pipeline_mode<synchronous>, transform_indices = @transform_4, window_bounds = array<i64: 4, 80>}, {pipeline_mode = #tpu.pipeline_mode<synchronous>, transform_indices = @transform_5, window_bounds = array<i64: 80, 4>}, {pipeline_mode = #tpu.pipeline_mode<synchronous>, transform_indices = @transform_6, window_bounds = array<i64: 3, 64>}, {pipeline_mode = #tpu.pipeline_mode<synchronous>, transform_indices = @transform_7, window_bounds = array<i64: 4, 64>}, {pipeline_mode = #tpu.pipeline_mode<synchronous>, transform_indices = @transform_8, window_bounds = array<i64: 64, 4>}, {pipeline_mode = #tpu.pipeline_mode<synchronous>, transform_indices = @transform_9, window_bounds = array<i64: 2, 18>}, {pipeline_mode = #tpu.pipeline_mode<synchronous>, transform_indices = @transform_10, window_bounds = array<i64: 18, 2>}, {transform_indices = @transform_11, window_bounds = array<i64: 1, 8, 128>}]} {
    %cst = arith.constant 0.000000e+00 : bf16
    %0 = vector.broadcast %cst : bf16 to vector<1x64xbf16>
    %c0 = arith.constant 0 : index
    %c0_0 = arith.constant 0 : index
    %1 = vector.load %arg13[%c0, %c0_0] : memref<20x64xbf16, #tpu.memory_space<vmem>>, vector<1x64xbf16>
    tpu.vector_store %arg13[%c0, %c0_0], %0 {strides = array<i32>} : memref<20x64xbf16, #tpu.memory_space<vmem>>, vector<1x64xbf16>,
    %c9 = arith.constant 9 : index
    %c0_1 = arith.constant 0 : index
    %2 = vector.load %arg13[%c9, %c0_1] : memref<20x64xbf16, #tpu.memory_space<vmem>>, vector<1x64xbf16>
    tpu.vector_store %arg13[%c9, %c0_1], %0 {strides = array<i32>} : memref<20x64xbf16, #tpu.memory_space<vmem>>, vector<1x64xbf16>,
    %c10 = arith.constant 10 : index
    %c0_2 = arith.constant 0 : index
    %3 = vector.load %arg13[%c10, %c0_2] : memref<20x64xbf16, #tpu.memory_space<vmem>>, vector<1x64xbf16>
    tpu.vector_store %arg13[%c10, %c0_2], %0 {strides = array<i32>} : memref<20x64xbf16, #tpu.memory_space<vmem>>, vector<1x64xbf16>,
    %c19 = arith.constant 19 : index
    %c0_3 = arith.constant 0 : index
    %4 = vector.load %arg13[%c19, %c0_3] : memref<20x64xbf16, #tpu.memory_space<vmem>>, vector<1x64xbf16>
    tpu.vector_store %arg13[%c19, %c0_3], %0 {strides = array<i32>} : memref<20x64xbf16, #tpu.memory_space<vmem>>, vector<1x64xbf16>,
    %cst_4 = arith.constant 0.000000e+00 : bf16
    %5 = vector.broadcast %cst_4 : bf16 to vector<1x80xbf16>
    %c0_5 = arith.constant 0 : index
    %c0_6 = arith.constant 0 : index
    %6 = vector.load %arg14[%c0_5, %c0_6] : memref<20x80xbf16, #tpu.memory_space<vmem>>, vector<1x80xbf16>
    tpu.vector_store %arg14[%c0_5, %c0_6], %5 {strides = array<i32>} : memref<20x80xbf16, #tpu.memory_space<vmem>>, vector<1x80xbf16>,
    %c19_7 = arith.constant 19 : index
    %c0_8 = arith.constant 0 : index
    %7 = vector.load %arg14[%c19_7, %c0_8] : memref<20x80xbf16, #tpu.memory_space<vmem>>, vector<1x80xbf16>
    tpu.vector_store %arg14[%c19_7, %c0_8], %5 {strides = array<i32>} : memref<20x80xbf16, #tpu.memory_space<vmem>>, vector<1x80xbf16>,
    %c0_9 = arith.constant 0 : index
    %c0_10 = arith.constant 0 : index
    %c0_11 = arith.constant 0 : index
    %c0_12 = arith.constant 0 : index
    %8 = vector.load %arg1[%c0_9, %c0_10, %c0_11, %c0_12] : memref<2x4x8x32xf32, #tpu.memory_space<vmem>>, vector<2x4x8x32xf32>
    %9 = vector.extract_strided_slice %8 {offsets = [0, 0, 0, 0], sizes = [2, 4, 8, 16], strides = [1, 1, 1, 1]} : vector<2x4x8x32xf32> to vector<2x4x8x16xf32>
    %10 = vector.extract_strided_slice %8 {offsets = [0, 0, 0, 16], sizes = [2, 4, 8, 16], strides = [1, 1, 1, 1]} : vector<2x4x8x32xf32> to vector<2x4x8x16xf32>
    %11 = arith.maximumf %9, %10 : vector<2x4x8x16xf32>
    %12 = vector.extract_strided_slice %11 {offsets = [0, 0, 0, 1], sizes = [2, 4, 8, 15], strides = [1, 1, 1, 1]} : vector<2x4x8x16xf32> to vector<2x4x8x15xf32>
    %13 = vector.extract_strided_slice %11 {offsets = [0, 0, 0, 15], sizes = [2, 4, 8, 1], strides = [1, 1, 1, 1]} : vector<2x4x8x16xf32> to vector<2x4x8x1xf32>
    %14 = tpu.concatenate %12, %13 in 3 : vector<2x4x8x15xf32>, vector<2x4x8x1xf32> -> vector<2x4x8x16xf32>
    %15 = arith.maximumf %11, %14 : vector<2x4x8x16xf32>
    %16 = arith.truncf %15 : vector<2x4x8x16xf32> to vector<2x4x8x16xbf16>
    %17 = vector.extract_strided_slice %16 {offsets = [0, 0, 0, 0], sizes = [1, 1, 8, 16], strides = [1, 1, 1, 1]} : vector<2x4x8x16xbf16> to vector<1x1x8x16xbf16>
    %18 = vector.shape_cast %17 : vector<1x1x8x16xbf16> to vector<8x16xbf16>
    %c1 = arith.constant 1 : index
    %c0_13 = arith.constant 0 : index
    %19 = vector.load %arg13[%c1, %c0_13] : memref<20x64xbf16, #tpu.memory_space<vmem>>, vector<8x16xbf16>
    tpu.vector_store %arg13[%c1, %c0_13], %18 {strides = array<i32>} : memref<20x64xbf16, #tpu.memory_space<vmem>>, vector<8x16xbf16>,
    %20 = vector.extract_strided_slice %16 {offsets = [0, 1, 0, 0], sizes = [1, 1, 8, 16], strides = [1, 1, 1, 1]} : vector<2x4x8x16xbf16> to vector<1x1x8x16xbf16>
    %21 = vector.shape_cast %20 : vector<1x1x8x16xbf16> to vector<8x16xbf16>
    %c1_14 = arith.constant 1 : index
    %c16 = arith.constant 16 : index
    %22 = vector.load %arg13[%c1_14, %c16] : memref<20x64xbf16, #tpu.memory_space<vmem>>, vector<8x16xbf16>
    tpu.vector_store %arg13[%c1_14, %c16], %21 {strides = array<i32>} : memref<20x64xbf16, #tpu.memory_space<vmem>>, vector<8x16xbf16>,
    %23 = vector.extract_strided_slice %16 {offsets = [0, 2, 0, 0], sizes = [1, 1, 8, 16], strides = [1, 1, 1, 1]} : vector<2x4x8x16xbf16> to vector<1x1x8x16xbf16>
    %24 = vector.shape_cast %23 : vector<1x1x8x16xbf16> to vector<8x16xbf16>
    %c1_15 = arith.constant 1 : index
    %c32 = arith.constant 32 : index
    %25 = vector.load %arg13[%c1_15, %c32] : memref<20x64xbf16, #tpu.memory_space<vmem>>, vector<8x16xbf16>
    tpu.vector_store %arg13[%c1_15, %c32], %24 {strides = array<i32>} : memref<20x64xbf16, #tpu.memory_space<vmem>>, vector<8x16xbf16>,
    %26 = vector.extract_strided_slice %16 {offsets = [0, 3, 0, 0], sizes = [1, 1, 8, 16], strides = [1, 1, 1, 1]} : vector<2x4x8x16xbf16> to vector<1x1x8x16xbf16>
    %27 = vector.shape_cast %26 : vector<1x1x8x16xbf16> to vector<8x16xbf16>
    %c1_16 = arith.constant 1 : index
    %c48 = arith.constant 48 : index
    %28 = vector.load %arg13[%c1_16, %c48] : memref<20x64xbf16, #tpu.memory_space<vmem>>, vector<8x16xbf16>
    tpu.vector_store %arg13[%c1_16, %c48], %27 {strides = array<i32>} : memref<20x64xbf16, #tpu.memory_space<vmem>>, vector<8x16xbf16>,
    %29 = vector.extract_strided_slice %16 {offsets = [1, 0, 0, 0], sizes = [1, 1, 8, 16], strides = [1, 1, 1, 1]} : vector<2x4x8x16xbf16> to vector<1x1x8x16xbf16>
    %30 = vector.shape_cast %29 : vector<1x1x8x16xbf16> to vector<8x16xbf16>
    %c11 = arith.constant 11 : index
    %c0_17 = arith.constant 0 : index
    %31 = vector.load %arg13[%c11, %c0_17] : memref<20x64xbf16, #tpu.memory_space<vmem>>, vector<8x16xbf16>
    tpu.vector_store %arg13[%c11, %c0_17], %30 {strides = array<i32>} : memref<20x64xbf16, #tpu.memory_space<vmem>>, vector<8x16xbf16>,
    %32 = vector.extract_strided_slice %16 {offsets = [1, 1, 0, 0], sizes = [1, 1, 8, 16], strides = [1, 1, 1, 1]} : vector<2x4x8x16xbf16> to vector<1x1x8x16xbf16>
    %33 = vector.shape_cast %32 : vector<1x1x8x16xbf16> to vector<8x16xbf16>
    %c11_18 = arith.constant 11 : index
    %c16_19 = arith.constant 16 : index
    %34 = vector.load %arg13[%c11_18, %c16_19] : memref<20x64xbf16, #tpu.memory_space<vmem>>, vector<8x16xbf16>
    tpu.vector_store %arg13[%c11_18, %c16_19], %33 {strides = array<i32>} : memref<20x64xbf16, #tpu.memory_space<vmem>>, vector<8x16xbf16>,
    %35 = vector.extract_strided_slice %16 {offsets = [1, 2, 0, 0], sizes = [1, 1, 8, 16], strides = [1, 1, 1, 1]} : vector<2x4x8x16xbf16> to vector<1x1x8x16xbf16>
    %36 = vector.shape_cast %35 : vector<1x1x8x16xbf16> to vector<8x16xbf16>
    %c11_20 = arith.constant 11 : index
    %c32_21 = arith.constant 32 : index
    %37 = vector.load %arg13[%c11_20, %c32_21] : memref<20x64xbf16, #tpu.memory_space<vmem>>, vector<8x16xbf16>
    tpu.vector_store %arg13[%c11_20, %c32_21], %36 {strides = array<i32>} : memref<20x64xbf16, #tpu.memory_space<vmem>>, vector<8x16xbf16>,
    %38 = vector.extract_strided_slice %16 {offsets = [1, 3, 0, 0], sizes = [1, 1, 8, 16], strides = [1, 1, 1, 1]} : vector<2x4x8x16xbf16> to vector<1x1x8x16xbf16>
    %39 = vector.shape_cast %38 : vector<1x1x8x16xbf16> to vector<8x16xbf16>
    %c11_22 = arith.constant 11 : index
    %c48_23 = arith.constant 48 : index
    %40 = vector.load %arg13[%c11_22, %c48_23] : memref<20x64xbf16, #tpu.memory_space<vmem>>, vector<8x16xbf16>
    tpu.vector_store %arg13[%c11_22, %c48_23], %39 {strides = array<i32>} : memref<20x64xbf16, #tpu.memory_space<vmem>>, vector<8x16xbf16>,
    %c0_24 = arith.constant 0 : index
    %c0_25 = arith.constant 0 : index
    %41 = vector.load %arg11[%c0_24, %c0_25] : memref<18x2xf32, #tpu.memory_space<vmem>>, vector<18x2xf32>
    %cst_26 = arith.constant dense<0.000000e+00> : vector<18xf32>
    %42 = vector.multi_reduction <add>, %41, %cst_26 [1] : vector<18x2xf32> to vector<18xf32>
    %43 = vector.shape_cast %42 : vector<18xf32> to vector<18x1xf32>
    %cst_27 = arith.constant 0.000000e+00 : f32
    %44 = vector.broadcast %cst_27 : f32 to vector<18x80xf32>
    %c0_28 = arith.constant 0 : index
    %c0_29 = arith.constant 0 : index
    %45 = vector.load %arg13[%c0_28, %c0_29] : memref<20x64xbf16, #tpu.memory_space<vmem>>, vector<18x64xbf16>
    %c0_30 = arith.constant 0 : index
    %c0_31 = arith.constant 0 : index
    %c0_32 = arith.constant 0 : index
    %46 = vector.load %arg2[%c0_30, %c0_31, %c0_32] : memref<3x64x80xbf16, #tpu.memory_space<vmem>>, vector<1x64x80xbf16>
    %47 = vector.shape_cast %46 : vector<1x64x80xbf16> to vector<64x80xbf16>
    %cst_33 = arith.constant dense<0.000000e+00> : vector<18x80xf32>
    %48 = tpu.matmul %45, %47, %cst_33 {dimension_numbers = #tpu.dot_dimension_numbers<[1], [0], [0], [1], [0, 0, 1, 1], [], []>} : vector<18x64xbf16>, vector<64x80xbf16>, vector<18x80xf32> -> vector<18x80xf32>
    %49 = arith.addf %44, %48 : vector<18x80xf32>
    %c1_34 = arith.constant 1 : index
    %c0_35 = arith.constant 0 : index
    %50 = vector.load %arg13[%c1_34, %c0_35] : memref<20x64xbf16, #tpu.memory_space<vmem>>, vector<18x64xbf16>
    %c1_36 = arith.constant 1 : index
    %c0_37 = arith.constant 0 : index
    %c0_38 = arith.constant 0 : index
    %51 = vector.load %arg2[%c1_36, %c0_37, %c0_38] : memref<3x64x80xbf16, #tpu.memory_space<vmem>>, vector<1x64x80xbf16>
    %52 = vector.shape_cast %51 : vector<1x64x80xbf16> to vector<64x80xbf16>
    %cst_39 = arith.constant dense<0.000000e+00> : vector<18x80xf32>
    %53 = tpu.matmul %50, %52, %cst_39 {dimension_numbers = #tpu.dot_dimension_numbers<[1], [0], [0], [1], [0, 0, 1, 1], [], []>} : vector<18x64xbf16>, vector<64x80xbf16>, vector<18x80xf32> -> vector<18x80xf32>
    %54 = arith.addf %49, %53 : vector<18x80xf32>
    %c2 = arith.constant 2 : index
    %c0_40 = arith.constant 0 : index
    %55 = vector.load %arg13[%c2, %c0_40] : memref<20x64xbf16, #tpu.memory_space<vmem>>, vector<18x64xbf16>
    %c2_41 = arith.constant 2 : index
    %c0_42 = arith.constant 0 : index
    %c0_43 = arith.constant 0 : index
    %56 = vector.load %arg2[%c2_41, %c0_42, %c0_43] : memref<3x64x80xbf16, #tpu.memory_space<vmem>>, vector<1x64x80xbf16>
    %57 = vector.shape_cast %56 : vector<1x64x80xbf16> to vector<64x80xbf16>
    %cst_44 = arith.constant dense<0.000000e+00> : vector<18x80xf32>
    %58 = tpu.matmul %55, %57, %cst_44 {dimension_numbers = #tpu.dot_dimension_numbers<[1], [0], [0], [1], [0, 0, 1, 1], [], []>} : vector<18x64xbf16>, vector<64x80xbf16>, vector<18x80xf32> -> vector<18x80xf32>
    %59 = arith.addf %54, %58 : vector<18x80xf32>
    %c0_45 = arith.constant 0 : index
    %c0_46 = arith.constant 0 : index
    %60 = vector.load %arg4[%c0_45, %c0_46] : memref<3x80xf32, #tpu.memory_space<vmem>>, vector<1x80xf32>
    %61 = vector.broadcast %60 : vector<1x80xf32> to vector<18x80xf32>
    %62 = arith.addf %59, %61 : vector<18x80xf32>
    %c0_47 = arith.constant 0 : index
    %c0_48 = arith.constant 0 : index
    %63 = vector.load %arg5[%c0_47, %c0_48] : memref<4x80xf32, #tpu.memory_space<vmem>>, vector<4x80xf32>
    %c0_49 = arith.constant 0 : index
    %c0_50 = arith.constant 0 : index
    %64 = vector.load %arg6[%c0_49, %c0_50] : memref<80x4xf32, #tpu.memory_space<vmem>>, vector<80x4xf32>
    %c0_51 = arith.constant 0 : index
    %c0_52 = arith.constant 0 : index
    %65 = vector.load %arg10[%c0_51, %c0_52] : memref<2x18xf32, #tpu.memory_space<vmem>>, vector<2x18xf32>
    %c0_53 = arith.constant 0 : index
    %c0_54 = arith.constant 0 : index
    %66 = vector.load %arg11[%c0_53, %c0_54] : memref<18x2xf32, #tpu.memory_space<vmem>>, vector<18x2xf32>
    %c1_55 = arith.constant 1 : index
    %c0_56 = arith.constant 0 : index
    %67 = vector.load %arg4[%c1_55, %c0_56] : memref<3x80xf32, #tpu.memory_space<vmem>>, vector<1x80xf32>
    %c2_57 = arith.constant 2 : index
    %c0_58 = arith.constant 0 : index
    %68 = vector.load %arg4[%c2_57, %c0_58] : memref<3x80xf32, #tpu.memory_space<vmem>>, vector<1x80xf32>
    %cst_59 = arith.constant dense<0.000000e+00> : vector<18x4xf32>
    %69 = tpu.matmul %62, %64, %cst_59 {dimension_numbers = #tpu.dot_dimension_numbers<[1], [0], [0], [1], [0, 0, 1, 1], [], []>} : vector<18x80xf32>, vector<80x4xf32>, vector<18x4xf32> -> vector<18x4xf32>
    %cst_60 = arith.constant dense<0.000000e+00> : vector<2x4xf32>
    %70 = tpu.matmul %65, %69, %cst_60 {dimension_numbers = #tpu.dot_dimension_numbers<[1], [0], [0], [1], [0, 0, 1, 1], [], []>} : vector<2x18xf32>, vector<18x4xf32>, vector<2x4xf32> -> vector<2x4xf32>
    %cst_61 = arith.constant 7.812500e-03 : f32
    %71 = vector.broadcast %cst_61 : f32 to vector<2x4xf32>
    %72 = arith.mulf %70, %71 : vector<2x4xf32>
    %cst_62 = arith.constant dense<0.000000e+00> : vector<18x4xf32>
    %73 = tpu.matmul %66, %72, %cst_62 {dimension_numbers = #tpu.dot_dimension_numbers<[1], [0], [0], [1], [0, 0, 1, 1], [], []>} : vector<18x2xf32>, vector<2x4xf32>, vector<18x4xf32> -> vector<18x4xf32>
    %cst_63 = arith.constant dense<0.000000e+00> : vector<18x80xf32>
    %74 = tpu.matmul %73, %63, %cst_63 {dimension_numbers = #tpu.dot_dimension_numbers<[1], [0], [0], [1], [0, 0, 1, 1], [], []>} : vector<18x4xf32>, vector<4x80xf32>, vector<18x80xf32> -> vector<18x80xf32>
    %75 = arith.subf %62, %74 : vector<18x80xf32>
    %76 = arith.mulf %75, %75 : vector<18x80xf32>
    %cst_64 = arith.constant dense<0.000000e+00> : vector<18x4xf32>
    %77 = tpu.matmul %76, %64, %cst_64 {dimension_numbers = #tpu.dot_dimension_numbers<[1], [0], [0], [1], [0, 0, 1, 1], [], []>} : vector<18x80xf32>, vector<80x4xf32>, vector<18x4xf32> -> vector<18x4xf32>
    %cst_65 = arith.constant dense<0.000000e+00> : vector<2x4xf32>
    %78 = tpu.matmul %65, %77, %cst_65 {dimension_numbers = #tpu.dot_dimension_numbers<[1], [0], [0], [1], [0, 0, 1, 1], [], []>} : vector<2x18xf32>, vector<18x4xf32>, vector<2x4xf32> -> vector<2x4xf32>
    %cst_66 = arith.constant 7.812500e-03 : f32
    %79 = vector.broadcast %cst_66 : f32 to vector<2x4xf32>
    %80 = arith.mulf %78, %79 : vector<2x4xf32>
    %cst_67 = arith.constant 9.99999974E-6 : f32
    %81 = vector.broadcast %cst_67 : f32 to vector<2x4xf32>
    %82 = arith.addf %80, %81 : vector<2x4xf32>
    %83 = math.rsqrt %82 : vector<2x4xf32>
    %cst_68 = arith.constant dense<0.000000e+00> : vector<18x4xf32>
    %84 = tpu.matmul %66, %83, %cst_68 {dimension_numbers = #tpu.dot_dimension_numbers<[1], [0], [0], [1], [0, 0, 1, 1], [], []>} : vector<18x2xf32>, vector<2x4xf32>, vector<18x4xf32> -> vector<18x4xf32>
    %cst_69 = arith.constant dense<0.000000e+00> : vector<18x80xf32>
    %85 = tpu.matmul %84, %63, %cst_69 {dimension_numbers = #tpu.dot_dimension_numbers<[1], [0], [0], [1], [0, 0, 1, 1], [], []>} : vector<18x4xf32>, vector<4x80xf32>, vector<18x80xf32> -> vector<18x80xf32>
    %86 = arith.mulf %75, %85 : vector<18x80xf32>
    %87 = vector.broadcast %67 : vector<1x80xf32> to vector<18x80xf32>
    %88 = arith.mulf %86, %87 : vector<18x80xf32>
    %89 = vector.broadcast %68 : vector<1x80xf32> to vector<18x80xf32>
    %90 = vector.broadcast %43 : vector<18x1xf32> to vector<18x80xf32>
    %91 = arith.mulf %89, %90 : vector<18x80xf32>
    %92 = arith.addf %88, %91 : vector<18x80xf32>
    %cst_70 = arith.constant 0.000000e+00 : f32
    %93 = vector.broadcast %cst_70 : f32 to vector<18x80xf32>
    %94 = arith.maximumf %92, %93 : vector<18x80xf32>
    %95 = arith.truncf %94 : vector<18x80xf32> to vector<18x80xbf16>
    %c1_71 = arith.constant 1 : index
    %c0_72 = arith.constant 0 : index
    %96 = vector.load %arg14[%c1_71, %c0_72] : memref<20x80xbf16, #tpu.memory_space<vmem>>, vector<18x80xbf16>
    tpu.vector_store %arg14[%c1_71, %c0_72], %95 {strides = array<i32>} : memref<20x80xbf16, #tpu.memory_space<vmem>>, vector<18x80xbf16>,
    %cst_73 = arith.constant 0.000000e+00 : f32
    %97 = vector.broadcast %cst_73 : f32 to vector<18x64xf32>
    %c0_74 = arith.constant 0 : index
    %c0_75 = arith.constant 0 : index
    %98 = vector.load %arg14[%c0_74, %c0_75] : memref<20x80xbf16, #tpu.memory_space<vmem>>, vector<18x80xbf16>
    %c0_76 = arith.constant 0 : index
    %c0_77 = arith.constant 0 : index
    %c0_78 = arith.constant 0 : index
    %99 = vector.load %arg3[%c0_76, %c0_77, %c0_78] : memref<3x80x64xbf16, #tpu.memory_space<vmem>>, vector<1x80x64xbf16>
    %100 = vector.shape_cast %99 : vector<1x80x64xbf16> to vector<80x64xbf16>
    %cst_79 = arith.constant dense<0.000000e+00> : vector<18x64xf32>
    %101 = tpu.matmul %98, %100, %cst_79 {dimension_numbers = #tpu.dot_dimension_numbers<[1], [0], [0], [1], [0, 0, 1, 1], [], []>} : vector<18x80xbf16>, vector<80x64xbf16>, vector<18x64xf32> -> vector<18x64xf32>
    %102 = arith.addf %97, %101 : vector<18x64xf32>
    %c1_80 = arith.constant 1 : index
    %c0_81 = arith.constant 0 : index
    %103 = vector.load %arg14[%c1_80, %c0_81] : memref<20x80xbf16, #tpu.memory_space<vmem>>, vector<18x80xbf16>
    %c1_82 = arith.constant 1 : index
    %c0_83 = arith.constant 0 : index
    %c0_84 = arith.constant 0 : index
    %104 = vector.load %arg3[%c1_82, %c0_83, %c0_84] : memref<3x80x64xbf16, #tpu.memory_space<vmem>>, vector<1x80x64xbf16>
    %105 = vector.shape_cast %104 : vector<1x80x64xbf16> to vector<80x64xbf16>
    %cst_85 = arith.constant dense<0.000000e+00> : vector<18x64xf32>
    %106 = tpu.matmul %103, %105, %cst_85 {dimension_numbers = #tpu.dot_dimension_numbers<[1], [0], [0], [1], [0, 0, 1, 1], [], []>} : vector<18x80xbf16>, vector<80x64xbf16>, vector<18x64xf32> -> vector<18x64xf32>
    %107 = arith.addf %102, %106 : vector<18x64xf32>
    %c2_86 = arith.constant 2 : index
    %c0_87 = arith.constant 0 : index
    %108 = vector.load %arg14[%c2_86, %c0_87] : memref<20x80xbf16, #tpu.memory_space<vmem>>, vector<18x80xbf16>
    %c2_88 = arith.constant 2 : index
    %c0_89 = arith.constant 0 : index
    %c0_90 = arith.constant 0 : index
    %109 = vector.load %arg3[%c2_88, %c0_89, %c0_90] : memref<3x80x64xbf16, #tpu.memory_space<vmem>>, vector<1x80x64xbf16>
    %110 = vector.shape_cast %109 : vector<1x80x64xbf16> to vector<80x64xbf16>
    %cst_91 = arith.constant dense<0.000000e+00> : vector<18x64xf32>
    %111 = tpu.matmul %108, %110, %cst_91 {dimension_numbers = #tpu.dot_dimension_numbers<[1], [0], [0], [1], [0, 0, 1, 1], [], []>} : vector<18x80xbf16>, vector<80x64xbf16>, vector<18x64xf32> -> vector<18x64xf32>
    %112 = arith.addf %107, %111 : vector<18x64xf32>
    %c0_92 = arith.constant 0 : index
    %c0_93 = arith.constant 0 : index
    %113 = vector.load %arg7[%c0_92, %c0_93] : memref<3x64xf32, #tpu.memory_space<vmem>>, vector<1x64xf32>
    %114 = vector.broadcast %113 : vector<1x64xf32> to vector<18x64xf32>
    %115 = arith.addf %112, %114 : vector<18x64xf32>
    %c0_94 = arith.constant 0 : index
    %c0_95 = arith.constant 0 : index
    %116 = vector.load %arg8[%c0_94, %c0_95] : memref<4x64xf32, #tpu.memory_space<vmem>>, vector<4x64xf32>
    %c0_96 = arith.constant 0 : index
    %c0_97 = arith.constant 0 : index
    %117 = vector.load %arg9[%c0_96, %c0_97] : memref<64x4xf32, #tpu.memory_space<vmem>>, vector<64x4xf32>
    %c0_98 = arith.constant 0 : index
    %c0_99 = arith.constant 0 : index
    %118 = vector.load %arg10[%c0_98, %c0_99] : memref<2x18xf32, #tpu.memory_space<vmem>>, vector<2x18xf32>
    %c0_100 = arith.constant 0 : index
    %c0_101 = arith.constant 0 : index
    %119 = vector.load %arg11[%c0_100, %c0_101] : memref<18x2xf32, #tpu.memory_space<vmem>>, vector<18x2xf32>
    %c1_102 = arith.constant 1 : index
    %c0_103 = arith.constant 0 : index
    %120 = vector.load %arg7[%c1_102, %c0_103] : memref<3x64xf32, #tpu.memory_space<vmem>>, vector<1x64xf32>
    %c2_104 = arith.constant 2 : index
    %c0_105 = arith.constant 0 : index
    %121 = vector.load %arg7[%c2_104, %c0_105] : memref<3x64xf32, #tpu.memory_space<vmem>>, vector<1x64xf32>
    %cst_106 = arith.constant dense<0.000000e+00> : vector<18x4xf32>
    %122 = tpu.matmul %115, %117, %cst_106 {dimension_numbers = #tpu.dot_dimension_numbers<[1], [0], [0], [1], [0, 0, 1, 1], [], []>} : vector<18x64xf32>, vector<64x4xf32>, vector<18x4xf32> -> vector<18x4xf32>
    %cst_107 = arith.constant dense<0.000000e+00> : vector<2x4xf32>
    %123 = tpu.matmul %118, %122, %cst_107 {dimension_numbers = #tpu.dot_dimension_numbers<[1], [0], [0], [1], [0, 0, 1, 1], [], []>} : vector<2x18xf32>, vector<18x4xf32>, vector<2x4xf32> -> vector<2x4xf32>
    %cst_108 = arith.constant 7.812500e-03 : f32
    %124 = vector.broadcast %cst_108 : f32 to vector<2x4xf32>
    %125 = arith.mulf %123, %124 : vector<2x4xf32>
    %cst_109 = arith.constant dense<0.000000e+00> : vector<18x4xf32>
    %126 = tpu.matmul %119, %125, %cst_109 {dimension_numbers = #tpu.dot_dimension_numbers<[1], [0], [0], [1], [0, 0, 1, 1], [], []>} : vector<18x2xf32>, vector<2x4xf32>, vector<18x4xf32> -> vector<18x4xf32>
    %cst_110 = arith.constant dense<0.000000e+00> : vector<18x64xf32>
    %127 = tpu.matmul %126, %116, %cst_110 {dimension_numbers = #tpu.dot_dimension_numbers<[1], [0], [0], [1], [0, 0, 1, 1], [], []>} : vector<18x4xf32>, vector<4x64xf32>, vector<18x64xf32> -> vector<18x64xf32>
    %128 = arith.subf %115, %127 : vector<18x64xf32>
    %129 = arith.mulf %128, %128 : vector<18x64xf32>
    %cst_111 = arith.constant dense<0.000000e+00> : vector<18x4xf32>
    %130 = tpu.matmul %129, %117, %cst_111 {dimension_numbers = #tpu.dot_dimension_numbers<[1], [0], [0], [1], [0, 0, 1, 1], [], []>} : vector<18x64xf32>, vector<64x4xf32>, vector<18x4xf32> -> vector<18x4xf32>
    %cst_112 = arith.constant dense<0.000000e+00> : vector<2x4xf32>
    %131 = tpu.matmul %118, %130, %cst_112 {dimension_numbers = #tpu.dot_dimension_numbers<[1], [0], [0], [1], [0, 0, 1, 1], [], []>} : vector<2x18xf32>, vector<18x4xf32>, vector<2x4xf32> -> vector<2x4xf32>
    %cst_113 = arith.constant 7.812500e-03 : f32
    %132 = vector.broadcast %cst_113 : f32 to vector<2x4xf32>
    %133 = arith.mulf %131, %132 : vector<2x4xf32>
    %cst_114 = arith.constant 9.99999974E-6 : f32
    %134 = vector.broadcast %cst_114 : f32 to vector<2x4xf32>
    %135 = arith.addf %133, %134 : vector<2x4xf32>
    %136 = math.rsqrt %135 : vector<2x4xf32>
    %cst_115 = arith.constant dense<0.000000e+00> : vector<18x4xf32>
    %137 = tpu.matmul %119, %136, %cst_115 {dimension_numbers = #tpu.dot_dimension_numbers<[1], [0], [0], [1], [0, 0, 1, 1], [], []>} : vector<18x2xf32>, vector<2x4xf32>, vector<18x4xf32> -> vector<18x4xf32>
    %cst_116 = arith.constant dense<0.000000e+00> : vector<18x64xf32>
    %138 = tpu.matmul %137, %116, %cst_116 {dimension_numbers = #tpu.dot_dimension_numbers<[1], [0], [0], [1], [0, 0, 1, 1], [], []>} : vector<18x4xf32>, vector<4x64xf32>, vector<18x64xf32> -> vector<18x64xf32>
    %139 = arith.mulf %128, %138 : vector<18x64xf32>
    %140 = vector.broadcast %120 : vector<1x64xf32> to vector<18x64xf32>
    %141 = arith.mulf %139, %140 : vector<18x64xf32>
    %142 = vector.broadcast %121 : vector<1x64xf32> to vector<18x64xf32>
    %143 = vector.broadcast %43 : vector<18x1xf32> to vector<18x64xf32>
    %144 = arith.mulf %142, %143 : vector<18x64xf32>
    %145 = arith.addf %141, %144 : vector<18x64xf32>
    %cst_117 = arith.constant 0.000000e+00 : f32
    %146 = vector.broadcast %cst_117 : f32 to vector<18x64xf32>
    %147 = arith.maximumf %145, %146 : vector<18x64xf32>
    %148 = vector.extract_strided_slice %147 {offsets = [0, 0], sizes = [8, 64], strides = [1, 1]} : vector<18x64xf32> to vector<8x64xf32>
    %149 = vector.extract_strided_slice %147 {offsets = [10, 0], sizes = [8, 64], strides = [1, 1]} : vector<18x64xf32> to vector<8x64xf32>
    %150 = tpu.concatenate %148, %149 in 1 : vector<8x64xf32>, vector<8x64xf32> -> vector<8x128xf32>
    %c0_118 = arith.constant 0 : index
    %c0_119 = arith.constant 0 : index
    %c0_120 = arith.constant 0 : index
    %151 = vector.load %arg12[%c0_118, %c0_119, %c0_120] : memref<1x8x128xf32, #tpu.memory_space<vmem>>, vector<1x8x128xf32>
    %152 = vector.shape_cast %151 : vector<1x8x128xf32> to vector<8x128xf32>
    %153 = vector.shape_cast %150 : vector<8x128xf32> to vector<1x8x128xf32>
    tpu.vector_store %arg12[%c0_118, %c0_119, %c0_120], %153 {strides = array<i32>} : memref<1x8x128xf32, #tpu.memory_space<vmem>>, vector<1x8x128xf32>,
    return
  }
  func.func @transform_0(%arg0: i32) -> (i32, i32, i32, i32) {
    %c0_i32 = arith.constant 0 : i32
    %c0_i32_0 = arith.constant 0 : i32
    %c0_i32_1 = arith.constant 0 : i32
    %c0_i32_2 = arith.constant 0 : i32
    return %arg0, %c0_i32, %c0_i32_0, %c0_i32_1 : i32, i32, i32, i32
  }
  func.func @transform_1(%arg0: i32) -> (i32, i32, i32) {
    %c0_i32 = arith.constant 0 : i32
    %c0_i32_0 = arith.constant 0 : i32
    %c0_i32_1 = arith.constant 0 : i32
    %c0_i32_2 = arith.constant 0 : i32
    return %c0_i32, %c0_i32_0, %c0_i32_1 : i32, i32, i32
  }
  func.func @transform_2(%arg0: i32) -> (i32, i32, i32) {
    %c0_i32 = arith.constant 0 : i32
    %c0_i32_0 = arith.constant 0 : i32
    %c0_i32_1 = arith.constant 0 : i32
    %c0_i32_2 = arith.constant 0 : i32
    return %c0_i32, %c0_i32_0, %c0_i32_1 : i32, i32, i32
  }
  func.func @transform_3(%arg0: i32) -> (i32, i32) {
    %c0_i32 = arith.constant 0 : i32
    %c0_i32_0 = arith.constant 0 : i32
    %c0_i32_1 = arith.constant 0 : i32
    return %c0_i32, %c0_i32_0 : i32, i32
  }
  func.func @transform_4(%arg0: i32) -> (i32, i32) {
    %c0_i32 = arith.constant 0 : i32
    %c0_i32_0 = arith.constant 0 : i32
    %c0_i32_1 = arith.constant 0 : i32
    return %c0_i32, %c0_i32_0 : i32, i32
  }
  func.func @transform_5(%arg0: i32) -> (i32, i32) {
    %c0_i32 = arith.constant 0 : i32
    %c0_i32_0 = arith.constant 0 : i32
    %c0_i32_1 = arith.constant 0 : i32
    return %c0_i32, %c0_i32_0 : i32, i32
  }
  func.func @transform_6(%arg0: i32) -> (i32, i32) {
    %c0_i32 = arith.constant 0 : i32
    %c0_i32_0 = arith.constant 0 : i32
    %c0_i32_1 = arith.constant 0 : i32
    return %c0_i32, %c0_i32_0 : i32, i32
  }
  func.func @transform_7(%arg0: i32) -> (i32, i32) {
    %c0_i32 = arith.constant 0 : i32
    %c0_i32_0 = arith.constant 0 : i32
    %c0_i32_1 = arith.constant 0 : i32
    return %c0_i32, %c0_i32_0 : i32, i32
  }
  func.func @transform_8(%arg0: i32) -> (i32, i32) {
    %c0_i32 = arith.constant 0 : i32
    %c0_i32_0 = arith.constant 0 : i32
    %c0_i32_1 = arith.constant 0 : i32
    return %c0_i32, %c0_i32_0 : i32, i32
  }
  func.func @transform_9(%arg0: i32) -> (i32, i32) {
    %c0_i32 = arith.constant 0 : i32
    %c0_i32_0 = arith.constant 0 : i32
    %c0_i32_1 = arith.constant 0 : i32
    return %c0_i32, %c0_i32_0 : i32, i32
  }
  func.func @transform_10(%arg0: i32) -> (i32, i32) {
    %c0_i32 = arith.constant 0 : i32
    %c0_i32_0 = arith.constant 0 : i32
    %c0_i32_1 = arith.constant 0 : i32
    return %c0_i32, %c0_i32_0 : i32, i32
  }
  func.func @transform_11(%arg0: i32) -> (i32, i32, i32) {
    %c0_i32 = arith.constant 0 : i32
    %c0_i32_0 = arith.constant 0 : i32
    %c0_i32_1 = arith.constant 0 : i32
    return %arg0, %c0_i32, %c0_i32_0 : i32, i32, i32
  }
}

module attributes {stable_mosaic.version = 11 : i64} {
  func.func @down_kernel(%arg0: i32, %arg1: memref<2x4x8x32xf32, #tpu.memory_space<vmem>>, %arg2: memref<3x64x80xbf16, #tpu.memory_space<vmem>>, %arg3: memref<3x80x64xbf16, #tpu.memory_space<vmem>>, %arg4: memref<3x80xf32, #tpu.memory_space<vmem>>, %arg5: memref<4x80xf32, #tpu.memory_space<vmem>>, %arg6: memref<80x4xf32, #tpu.memory_space<vmem>>, %arg7: memref<3x64xf32, #tpu.memory_space<vmem>>, %arg8: memref<4x64xf32, #tpu.memory_space<vmem>>, %arg9: memref<64x4xf32, #tpu.memory_space<vmem>>, %arg10: memref<2x18xf32, #tpu.memory_space<vmem>>, %arg11: memref<18x2xf32, #tpu.memory_space<vmem>>, %arg12: memref<1x8x128xf32, #tpu.memory_space<vmem>>, %arg13: memref<20x64xbf16, #tpu.memory_space<vmem>>, %arg14: memref<20x80xbf16, #tpu.memory_space<vmem>>) attributes {dimension_semantics = [#tpu.dimension_semantics<parallel>], iteration_bounds = array<i64: 1>, scalar_prefetch = 0 : i64, scratch_operands = 2 : i64, tpu.core_type = #tpu.core_type<tc>, window_params = [{transform_indices = @transform_0, window_bounds = array<i64: 2, 4, 8, 32>}, {pipeline_mode = #tpu.pipeline_mode<synchronous>, transform_indices = @transform_1, window_bounds = array<i64: 3, 64, 80>}, {pipeline_mode = #tpu.pipeline_mode<synchronous>, transform_indices = @transform_2, window_bounds = array<i64: 3, 80, 64>}, {pipeline_mode = #tpu.pipeline_mode<synchronous>, transform_indices = @transform_3, window_bounds = array<i64: 3, 80>}, {pipeline_mode = #tpu.pipeline_mode<synchronous>, transform_indices = @transform_4, window_bounds = array<i64: 4, 80>}, {pipeline_mode = #tpu.pipeline_mode<synchronous>, transform_indices = @transform_5, window_bounds = array<i64: 80, 4>}, {pipeline_mode = #tpu.pipeline_mode<synchronous>, transform_indices = @transform_6, window_bounds = array<i64: 3, 64>}, {pipeline_mode = #tpu.pipeline_mode<synchronous>, transform_indices = @transform_7, window_bounds = array<i64: 4, 64>}, {pipeline_mode = #tpu.pipeline_mode<synchronous>, transform_indices = @transform_8, window_bounds = array<i64: 64, 4>}, {pipeline_mode = #tpu.pipeline_mode<synchronous>, transform_indices = @transform_9, window_bounds = array<i64: 2, 18>}, {pipeline_mode = #tpu.pipeline_mode<synchronous>, transform_indices = @transform_10, window_bounds = array<i64: 18, 2>}, {transform_indices = @transform_11, window_bounds = array<i64: 1, 8, 128>}]} {
    %cst = arith.constant 0.000000e+00 : bf16
    %0 = vector.broadcast %cst : bf16 to vector<1x64xbf16>
    %c0 = arith.constant 0 : index
    %c0_0 = arith.constant 0 : index
    %1 = vector.load %arg13[%c0, %c0_0] : memref<20x64xbf16, #tpu.memory_space<vmem>>, vector<1x64xbf16>
    tpu.vector_store %arg13[%c0, %c0_0], %0 {strides = array<i32>} : memref<20x64xbf16, #tpu.memory_space<vmem>>, vector<1x64xbf16>,
    %c9 = arith.constant 9 : index
    %c0_1 = arith.constant 0 : index
    %2 = vector.load %arg13[%c9, %c0_1] : memref<20x64xbf16, #tpu.memory_space<vmem>>, vector<1x64xbf16>
    tpu.vector_store %arg13[%c9, %c0_1], %0 {strides = array<i32>} : memref<20x64xbf16, #tpu.memory_space<vmem>>, vector<1x64xbf16>,
    %c10 = arith.constant 10 : index
    %c0_2 = arith.constant 0 : index
    %3 = vector.load %arg13[%c10, %c0_2] : memref<20x64xbf16, #tpu.memory_space<vmem>>, vector<1x64xbf16>
    tpu.vector_store %arg13[%c10, %c0_2], %0 {strides = array<i32>} : memref<20x64xbf16, #tpu.memory_space<vmem>>, vector<1x64xbf16>,
    %c19 = arith.constant 19 : index
    %c0_3 = arith.constant 0 : index
    %4 = vector.load %arg13[%c19, %c0_3] : memref<20x64xbf16, #tpu.memory_space<vmem>>, vector<1x64xbf16>
    tpu.vector_store %arg13[%c19, %c0_3], %0 {strides = array<i32>} : memref<20x64xbf16, #tpu.memory_space<vmem>>, vector<1x64xbf16>,
    %cst_4 = arith.constant 0.000000e+00 : bf16
    %5 = vector.broadcast %cst_4 : bf16 to vector<1x80xbf16>
    %c0_5 = arith.constant 0 : index
    %c0_6 = arith.constant 0 : index
    %6 = vector.load %arg14[%c0_5, %c0_6] : memref<20x80xbf16, #tpu.memory_space<vmem>>, vector<1x80xbf16>
    tpu.vector_store %arg14[%c0_5, %c0_6], %5 {strides = array<i32>} : memref<20x80xbf16, #tpu.memory_space<vmem>>, vector<1x80xbf16>,
    %c19_7 = arith.constant 19 : index
    %c0_8 = arith.constant 0 : index
    %7 = vector.load %arg14[%c19_7, %c0_8] : memref<20x80xbf16, #tpu.memory_space<vmem>>, vector<1x80xbf16>
    tpu.vector_store %arg14[%c19_7, %c0_8], %5 {strides = array<i32>} : memref<20x80xbf16, #tpu.memory_space<vmem>>, vector<1x80xbf16>,
    %c0_9 = arith.constant 0 : index
    %c0_10 = arith.constant 0 : index
    %c0_11 = arith.constant 0 : index
    %c0_12 = arith.constant 0 : index
    %8 = vector.load %arg1[%c0_9, %c0_10, %c0_11, %c0_12] : memref<2x4x8x32xf32, #tpu.memory_space<vmem>>, vector<2x4x8x32xf32>
    %9 = vector.extract_strided_slice %8 {offsets = [0, 0, 0, 0], sizes = [2, 4, 8, 16], strides = [1, 1, 1, 1]} : vector<2x4x8x32xf32> to vector<2x4x8x16xf32>
    %10 = vector.extract_strided_slice %8 {offsets = [0, 0, 0, 16], sizes = [2, 4, 8, 16], strides = [1, 1, 1, 1]} : vector<2x4x8x32xf32> to vector<2x4x8x16xf32>
    %11 = arith.maximumf %9, %10 : vector<2x4x8x16xf32>
    %12 = vector.extract_strided_slice %11 {offsets = [0, 0, 0, 1], sizes = [2, 4, 8, 15], strides = [1, 1, 1, 1]} : vector<2x4x8x16xf32> to vector<2x4x8x15xf32>
    %13 = vector.extract_strided_slice %11 {offsets = [0, 0, 0, 15], sizes = [2, 4, 8, 1], strides = [1, 1, 1, 1]} : vector<2x4x8x16xf32> to vector<2x4x8x1xf32>
    %14 = tpu.concatenate %12, %13 in 3 : vector<2x4x8x15xf32>, vector<2x4x8x1xf32> -> vector<2x4x8x16xf32>
    %15 = arith.maximumf %11, %14 : vector<2x4x8x16xf32>
    %16 = arith.truncf %15 : vector<2x4x8x16xf32> to vector<2x4x8x16xbf16>
    %17 = vector.extract_strided_slice %16 {offsets = [0, 0, 0, 0], sizes = [1, 1, 8, 16], strides = [1, 1, 1, 1]} : vector<2x4x8x16xbf16> to vector<1x1x8x16xbf16>
    %18 = vector.shape_cast %17 : vector<1x1x8x16xbf16> to vector<8x16xbf16>
    %c1 = arith.constant 1 : index
    %c0_13 = arith.constant 0 : index
    %19 = vector.load %arg13[%c1, %c0_13] : memref<20x64xbf16, #tpu.memory_space<vmem>>, vector<8x16xbf16>
    tpu.vector_store %arg13[%c1, %c0_13], %18 {strides = array<i32>} : memref<20x64xbf16, #tpu.memory_space<vmem>>, vector<8x16xbf16>,
    %20 = vector.extract_strided_slice %16 {offsets = [0, 1, 0, 0], sizes = [1, 1, 8, 16], strides = [1, 1, 1, 1]} : vector<2x4x8x16xbf16> to vector<1x1x8x16xbf16>
    %21 = vector.shape_cast %20 : vector<1x1x8x16xbf16> to vector<8x16xbf16>
    %c1_14 = arith.constant 1 : index
    %c16 = arith.constant 16 : index
    %22 = vector.load %arg13[%c1_14, %c16] : memref<20x64xbf16, #tpu.memory_space<vmem>>, vector<8x16xbf16>
    tpu.vector_store %arg13[%c1_14, %c16], %21 {strides = array<i32>} : memref<20x64xbf16, #tpu.memory_space<vmem>>, vector<8x16xbf16>,
    %23 = vector.extract_strided_slice %16 {offsets = [0, 2, 0, 0], sizes = [1, 1, 8, 16], strides = [1, 1, 1, 1]} : vector<2x4x8x16xbf16> to vector<1x1x8x16xbf16>
    %24 = vector.shape_cast %23 : vector<1x1x8x16xbf16> to vector<8x16xbf16>
    %c1_15 = arith.constant 1 : index
    %c32 = arith.constant 32 : index
    %25 = vector.load %arg13[%c1_15, %c32] : memref<20x64xbf16, #tpu.memory_space<vmem>>, vector<8x16xbf16>
    tpu.vector_store %arg13[%c1_15, %c32], %24 {strides = array<i32>} : memref<20x64xbf16, #tpu.memory_space<vmem>>, vector<8x16xbf16>,
    %26 = vector.extract_strided_slice %16 {offsets = [0, 3, 0, 0], sizes = [1, 1, 8, 16], strides = [1, 1, 1, 1]} : vector<2x4x8x16xbf16> to vector<1x1x8x16xbf16>
    %27 = vector.shape_cast %26 : vector<1x1x8x16xbf16> to vector<8x16xbf16>
    %c1_16 = arith.constant 1 : index
    %c48 = arith.constant 48 : index
    %28 = vector.load %arg13[%c1_16, %c48] : memref<20x64xbf16, #tpu.memory_space<vmem>>, vector<8x16xbf16>
    tpu.vector_store %arg13[%c1_16, %c48], %27 {strides = array<i32>} : memref<20x64xbf16, #tpu.memory_space<vmem>>, vector<8x16xbf16>,
    %29 = vector.extract_strided_slice %16 {offsets = [1, 0, 0, 0], sizes = [1, 1, 8, 16], strides = [1, 1, 1, 1]} : vector<2x4x8x16xbf16> to vector<1x1x8x16xbf16>
    %30 = vector.shape_cast %29 : vector<1x1x8x16xbf16> to vector<8x16xbf16>
    %c11 = arith.constant 11 : index
    %c0_17 = arith.constant 0 : index
    %31 = vector.load %arg13[%c11, %c0_17] : memref<20x64xbf16, #tpu.memory_space<vmem>>, vector<8x16xbf16>
    tpu.vector_store %arg13[%c11, %c0_17], %30 {strides = array<i32>} : memref<20x64xbf16, #tpu.memory_space<vmem>>, vector<8x16xbf16>,
    %32 = vector.extract_strided_slice %16 {offsets = [1, 1, 0, 0], sizes = [1, 1, 8, 16], strides = [1, 1, 1, 1]} : vector<2x4x8x16xbf16> to vector<1x1x8x16xbf16>
    %33 = vector.shape_cast %32 : vector<1x1x8x16xbf16> to vector<8x16xbf16>
    %c11_18 = arith.constant 11 : index
    %c16_19 = arith.constant 16 : index
    %34 = vector.load %arg13[%c11_18, %c16_19] : memref<20x64xbf16, #tpu.memory_space<vmem>>, vector<8x16xbf16>
    tpu.vector_store %arg13[%c11_18, %c16_19], %33 {strides = array<i32>} : memref<20x64xbf16, #tpu.memory_space<vmem>>, vector<8x16xbf16>,
    %35 = vector.extract_strided_slice %16 {offsets = [1, 2, 0, 0], sizes = [1, 1, 8, 16], strides = [1, 1, 1, 1]} : vector<2x4x8x16xbf16> to vector<1x1x8x16xbf16>
    %36 = vector.shape_cast %35 : vector<1x1x8x16xbf16> to vector<8x16xbf16>
    %c11_20 = arith.constant 11 : index
    %c32_21 = arith.constant 32 : index
    %37 = vector.load %arg13[%c11_20, %c32_21] : memref<20x64xbf16, #tpu.memory_space<vmem>>, vector<8x16xbf16>
    tpu.vector_store %arg13[%c11_20, %c32_21], %36 {strides = array<i32>} : memref<20x64xbf16, #tpu.memory_space<vmem>>, vector<8x16xbf16>,
    %38 = vector.extract_strided_slice %16 {offsets = [1, 3, 0, 0], sizes = [1, 1, 8, 16], strides = [1, 1, 1, 1]} : vector<2x4x8x16xbf16> to vector<1x1x8x16xbf16>
    %39 = vector.shape_cast %38 : vector<1x1x8x16xbf16> to vector<8x16xbf16>
    %c11_22 = arith.constant 11 : index
    %c48_23 = arith.constant 48 : index
    %40 = vector.load %arg13[%c11_22, %c48_23] : memref<20x64xbf16, #tpu.memory_space<vmem>>, vector<8x16xbf16>
    tpu.vector_store %arg13[%c11_22, %c48_23], %39 {strides = array<i32>} : memref<20x64xbf16, #tpu.memory_space<vmem>>, vector<8x16xbf16>,
    %c0_24 = arith.constant 0 : index
    %c0_25 = arith.constant 0 : index
    %41 = vector.load %arg11[%c0_24, %c0_25] : memref<18x2xf32, #tpu.memory_space<vmem>>, vector<18x2xf32>
    %cst_26 = arith.constant dense<0.000000e+00> : vector<18xf32>
    %42 = vector.multi_reduction <add>, %41, %cst_26 [1] : vector<18x2xf32> to vector<18xf32>
    %43 = vector.shape_cast %42 : vector<18xf32> to vector<18x1xf32>
    %cst_27 = arith.constant 0.000000e+00 : f32
    %44 = vector.broadcast %cst_27 : f32 to vector<18x80xf32>
    %c0_28 = arith.constant 0 : index
    %c0_29 = arith.constant 0 : index
    %45 = vector.load %arg13[%c0_28, %c0_29] : memref<20x64xbf16, #tpu.memory_space<vmem>>, vector<18x64xbf16>
    %c0_30 = arith.constant 0 : index
    %c0_31 = arith.constant 0 : index
    %c0_32 = arith.constant 0 : index
    %46 = vector.load %arg2[%c0_30, %c0_31, %c0_32] : memref<3x64x80xbf16, #tpu.memory_space<vmem>>, vector<1x64x80xbf16>
    %47 = vector.shape_cast %46 : vector<1x64x80xbf16> to vector<64x80xbf16>
    %cst_33 = arith.constant dense<0.000000e+00> : vector<18x80xf32>
    %48 = tpu.matmul %45, %47, %cst_33 {dimension_numbers = #tpu.dot_dimension_numbers<[1], [0], [0], [1], [0, 0, 1, 1], [], []>} : vector<18x64xbf16>, vector<64x80xbf16>, vector<18x80xf32> -> vector<18x80xf32>
    %49 = arith.addf %44, %48 : vector<18x80xf32>
    %c1_34 = arith.constant 1 : index
    %c0_35 = arith.constant 0 : index
    %50 = vector.load %arg13[%c1_34, %c0_35] : memref<20x64xbf16, #tpu.memory_space<vmem>>, vector<18x64xbf16>
    %c1_36 = arith.constant 1 : index
    %c0_37 = arith.constant 0 : index
    %c0_38 = arith.constant 0 : index
    %51 = vector.load %arg2[%c1_36, %c0_37, %c0_38] : memref<3x64x80xbf16, #tpu.memory_space<vmem>>, vector<1x64x80xbf16>
    %52 = vector.shape_cast %51 : vector<1x64x80xbf16> to vector<64x80xbf16>
    %cst_39 = arith.constant dense<0.000000e+00> : vector<18x80xf32>
    %53 = tpu.matmul %50, %52, %cst_39 {dimension_numbers = #tpu.dot_dimension_numbers<[1], [0], [0], [1], [0, 0, 1, 1], [], []>} : vector<18x64xbf16>, vector<64x80xbf16>, vector<18x80xf32> -> vector<18x80xf32>
    %54 = arith.addf %49, %53 : vector<18x80xf32>
    %c2 = arith.constant 2 : index
    %c0_40 = arith.constant 0 : index
    %55 = vector.load %arg13[%c2, %c0_40] : memref<20x64xbf16, #tpu.memory_space<vmem>>, vector<18x64xbf16>
    %c2_41 = arith.constant 2 : index
    %c0_42 = arith.constant 0 : index
    %c0_43 = arith.constant 0 : index
    %56 = vector.load %arg2[%c2_41, %c0_42, %c0_43] : memref<3x64x80xbf16, #tpu.memory_space<vmem>>, vector<1x64x80xbf16>
    %57 = vector.shape_cast %56 : vector<1x64x80xbf16> to vector<64x80xbf16>
    %cst_44 = arith.constant dense<0.000000e+00> : vector<18x80xf32>
    %58 = tpu.matmul %55, %57, %cst_44 {dimension_numbers = #tpu.dot_dimension_numbers<[1], [0], [0], [1], [0, 0, 1, 1], [], []>} : vector<18x64xbf16>, vector<64x80xbf16>, vector<18x80xf32> -> vector<18x80xf32>
    %59 = arith.addf %54, %58 : vector<18x80xf32>
    %c0_45 = arith.constant 0 : index
    %c0_46 = arith.constant 0 : index
    %60 = vector.load %arg4[%c0_45, %c0_46] : memref<3x80xf32, #tpu.memory_space<vmem>>, vector<1x80xf32>
    %61 = vector.broadcast %60 : vector<1x80xf32> to vector<18x80xf32>
    %62 = arith.addf %59, %61 : vector<18x80xf32>
    %c0_47 = arith.constant 0 : index
    %c0_48 = arith.constant 0 : index
    %63 = vector.load %arg5[%c0_47, %c0_48] : memref<4x80xf32, #tpu.memory_space<vmem>>, vector<4x80xf32>
    %c0_49 = arith.constant 0 : index
    %c0_50 = arith.constant 0 : index
    %64 = vector.load %arg6[%c0_49, %c0_50] : memref<80x4xf32, #tpu.memory_space<vmem>>, vector<80x4xf32>
    %c0_51 = arith.constant 0 : index
    %c0_52 = arith.constant 0 : index
    %65 = vector.load %arg10[%c0_51, %c0_52] : memref<2x18xf32, #tpu.memory_space<vmem>>, vector<2x18xf32>
    %c0_53 = arith.constant 0 : index
    %c0_54 = arith.constant 0 : index
    %66 = vector.load %arg11[%c0_53, %c0_54] : memref<18x2xf32, #tpu.memory_space<vmem>>, vector<18x2xf32>
    %c1_55 = arith.constant 1 : index
    %c0_56 = arith.constant 0 : index
    %67 = vector.load %arg4[%c1_55, %c0_56] : memref<3x80xf32, #tpu.memory_space<vmem>>, vector<1x80xf32>
    %c2_57 = arith.constant 2 : index
    %c0_58 = arith.constant 0 : index
    %68 = vector.load %arg4[%c2_57, %c0_58] : memref<3x80xf32, #tpu.memory_space<vmem>>, vector<1x80xf32>
    %cst_59 = arith.constant dense<0.000000e+00> : vector<18x4xf32>
    %69 = tpu.matmul %62, %64, %cst_59 {dimension_numbers = #tpu.dot_dimension_numbers<[1], [0], [0], [1], [0, 0, 1, 1], [], []>} : vector<18x80xf32>, vector<80x4xf32>, vector<18x4xf32> -> vector<18x4xf32>
    %cst_60 = arith.constant dense<0.000000e+00> : vector<2x4xf32>
    %70 = tpu.matmul %65, %69, %cst_60 {dimension_numbers = #tpu.dot_dimension_numbers<[1], [0], [0], [1], [0, 0, 1, 1], [], []>} : vector<2x18xf32>, vector<18x4xf32>, vector<2x4xf32> -> vector<2x4xf32>
    %cst_61 = arith.constant 7.812500e-03 : f32
    %71 = vector.broadcast %cst_61 : f32 to vector<2x4xf32>
    %72 = arith.mulf %70, %71 : vector<2x4xf32>
    %cst_62 = arith.constant dense<0.000000e+00> : vector<18x4xf32>
    %73 = tpu.matmul %66, %72, %cst_62 {dimension_numbers = #tpu.dot_dimension_numbers<[1], [0], [0], [1], [0, 0, 1, 1], [], []>} : vector<18x2xf32>, vector<2x4xf32>, vector<18x4xf32> -> vector<18x4xf32>
    %cst_63 = arith.constant dense<0.000000e+00> : vector<18x80xf32>
    %74 = tpu.matmul %73, %63, %cst_63 {dimension_numbers = #tpu.dot_dimension_numbers<[1], [0], [0], [1], [0, 0, 1, 1], [], []>} : vector<18x4xf32>, vector<4x80xf32>, vector<18x80xf32> -> vector<18x80xf32>
    %75 = arith.subf %62, %74 : vector<18x80xf32>
    %76 = arith.mulf %75, %75 : vector<18x80xf32>
    %cst_64 = arith.constant dense<0.000000e+00> : vector<18x4xf32>
    %77 = tpu.matmul %76, %64, %cst_64 {dimension_numbers = #tpu.dot_dimension_numbers<[1], [0], [0], [1], [0, 0, 1, 1], [], []>} : vector<18x80xf32>, vector<80x4xf32>, vector<18x4xf32> -> vector<18x4xf32>
    %cst_65 = arith.constant dense<0.000000e+00> : vector<2x4xf32>
    %78 = tpu.matmul %65, %77, %cst_65 {dimension_numbers = #tpu.dot_dimension_numbers<[1], [0], [0], [1], [0, 0, 1, 1], [], []>} : vector<2x18xf32>, vector<18x4xf32>, vector<2x4xf32> -> vector<2x4xf32>
    %cst_66 = arith.constant 7.812500e-03 : f32
    %79 = vector.broadcast %cst_66 : f32 to vector<2x4xf32>
    %80 = arith.mulf %78, %79 : vector<2x4xf32>
    %cst_67 = arith.constant 9.99999974E-6 : f32
    %81 = vector.broadcast %cst_67 : f32 to vector<2x4xf32>
    %82 = arith.addf %80, %81 : vector<2x4xf32>
    %83 = math.rsqrt %82 : vector<2x4xf32>
    %cst_68 = arith.constant dense<0.000000e+00> : vector<18x4xf32>
    %84 = tpu.matmul %66, %83, %cst_68 {dimension_numbers = #tpu.dot_dimension_numbers<[1], [0], [0], [1], [0, 0, 1, 1], [], []>} : vector<18x2xf32>, vector<2x4xf32>, vector<18x4xf32> -> vector<18x4xf32>
    %cst_69 = arith.constant dense<0.000000e+00> : vector<18x80xf32>
    %85 = tpu.matmul %84, %63, %cst_69 {dimension_numbers = #tpu.dot_dimension_numbers<[1], [0], [0], [1], [0, 0, 1, 1], [], []>} : vector<18x4xf32>, vector<4x80xf32>, vector<18x80xf32> -> vector<18x80xf32>
    %86 = arith.mulf %75, %85 : vector<18x80xf32>
    %87 = vector.broadcast %67 : vector<1x80xf32> to vector<18x80xf32>
    %88 = arith.mulf %86, %87 : vector<18x80xf32>
    %89 = vector.broadcast %68 : vector<1x80xf32> to vector<18x80xf32>
    %90 = vector.broadcast %43 : vector<18x1xf32> to vector<18x80xf32>
    %91 = arith.mulf %89, %90 : vector<18x80xf32>
    %92 = arith.addf %88, %91 : vector<18x80xf32>
    %cst_70 = arith.constant 0.000000e+00 : f32
    %93 = vector.broadcast %cst_70 : f32 to vector<18x80xf32>
    %94 = arith.maximumf %92, %93 : vector<18x80xf32>
    %95 = arith.truncf %94 : vector<18x80xf32> to vector<18x80xbf16>
    %c1_71 = arith.constant 1 : index
    %c0_72 = arith.constant 0 : index
    %96 = vector.load %arg14[%c1_71, %c0_72] : memref<20x80xbf16, #tpu.memory_space<vmem>>, vector<18x80xbf16>
    tpu.vector_store %arg14[%c1_71, %c0_72], %95 {strides = array<i32>} : memref<20x80xbf16, #tpu.memory_space<vmem>>, vector<18x80xbf16>,
    %cst_73 = arith.constant 0.000000e+00 : f32
    %97 = vector.broadcast %cst_73 : f32 to vector<18x64xf32>
    %c0_74 = arith.constant 0 : index
    %c0_75 = arith.constant 0 : index
    %98 = vector.load %arg14[%c0_74, %c0_75] : memref<20x80xbf16, #tpu.memory_space<vmem>>, vector<18x80xbf16>
    %c0_76 = arith.constant 0 : index
    %c0_77 = arith.constant 0 : index
    %c0_78 = arith.constant 0 : index
    %99 = vector.load %arg3[%c0_76, %c0_77, %c0_78] : memref<3x80x64xbf16, #tpu.memory_space<vmem>>, vector<1x80x64xbf16>
    %100 = vector.shape_cast %99 : vector<1x80x64xbf16> to vector<80x64xbf16>
    %cst_79 = arith.constant dense<0.000000e+00> : vector<18x64xf32>
    %101 = tpu.matmul %98, %100, %cst_79 {dimension_numbers = #tpu.dot_dimension_numbers<[1], [0], [0], [1], [0, 0, 1, 1], [], []>} : vector<18x80xbf16>, vector<80x64xbf16>, vector<18x64xf32> -> vector<18x64xf32>
    %102 = arith.addf %97, %101 : vector<18x64xf32>
    %c1_80 = arith.constant 1 : index
    %c0_81 = arith.constant 0 : index
    %103 = vector.load %arg14[%c1_80, %c0_81] : memref<20x80xbf16, #tpu.memory_space<vmem>>, vector<18x80xbf16>
    %c1_82 = arith.constant 1 : index
    %c0_83 = arith.constant 0 : index
    %c0_84 = arith.constant 0 : index
    %104 = vector.load %arg3[%c1_82, %c0_83, %c0_84] : memref<3x80x64xbf16, #tpu.memory_space<vmem>>, vector<1x80x64xbf16>
    %105 = vector.shape_cast %104 : vector<1x80x64xbf16> to vector<80x64xbf16>
    %cst_85 = arith.constant dense<0.000000e+00> : vector<18x64xf32>
    %106 = tpu.matmul %103, %105, %cst_85 {dimension_numbers = #tpu.dot_dimension_numbers<[1], [0], [0], [1], [0, 0, 1, 1], [], []>} : vector<18x80xbf16>, vector<80x64xbf16>, vector<18x64xf32> -> vector<18x64xf32>
    %107 = arith.addf %102, %106 : vector<18x64xf32>
    %c2_86 = arith.constant 2 : index
    %c0_87 = arith.constant 0 : index
    %108 = vector.load %arg14[%c2_86, %c0_87] : memref<20x80xbf16, #tpu.memory_space<vmem>>, vector<18x80xbf16>
    %c2_88 = arith.constant 2 : index
    %c0_89 = arith.constant 0 : index
    %c0_90 = arith.constant 0 : index
    %109 = vector.load %arg3[%c2_88, %c0_89, %c0_90] : memref<3x80x64xbf16, #tpu.memory_space<vmem>>, vector<1x80x64xbf16>
    %110 = vector.shape_cast %109 : vector<1x80x64xbf16> to vector<80x64xbf16>
    %cst_91 = arith.constant dense<0.000000e+00> : vector<18x64xf32>
    %111 = tpu.matmul %108, %110, %cst_91 {dimension_numbers = #tpu.dot_dimension_numbers<[1], [0], [0], [1], [0, 0, 1, 1], [], []>} : vector<18x80xbf16>, vector<80x64xbf16>, vector<18x64xf32> -> vector<18x64xf32>
    %112 = arith.addf %107, %111 : vector<18x64xf32>
    %c0_92 = arith.constant 0 : index
    %c0_93 = arith.constant 0 : index
    %113 = vector.load %arg7[%c0_92, %c0_93] : memref<3x64xf32, #tpu.memory_space<vmem>>, vector<1x64xf32>
    %114 = vector.broadcast %113 : vector<1x64xf32> to vector<18x64xf32>
    %115 = arith.addf %112, %114 : vector<18x64xf32>
    %c0_94 = arith.constant 0 : index
    %c0_95 = arith.constant 0 : index
    %116 = vector.load %arg8[%c0_94, %c0_95] : memref<4x64xf32, #tpu.memory_space<vmem>>, vector<4x64xf32>
    %c0_96 = arith.constant 0 : index
    %c0_97 = arith.constant 0 : index
    %117 = vector.load %arg9[%c0_96, %c0_97] : memref<64x4xf32, #tpu.memory_space<vmem>>, vector<64x4xf32>
    %c0_98 = arith.constant 0 : index
    %c0_99 = arith.constant 0 : index
    %118 = vector.load %arg10[%c0_98, %c0_99] : memref<2x18xf32, #tpu.memory_space<vmem>>, vector<2x18xf32>
    %c0_100 = arith.constant 0 : index
    %c0_101 = arith.constant 0 : index
    %119 = vector.load %arg11[%c0_100, %c0_101] : memref<18x2xf32, #tpu.memory_space<vmem>>, vector<18x2xf32>
    %c1_102 = arith.constant 1 : index
    %c0_103 = arith.constant 0 : index
    %120 = vector.load %arg7[%c1_102, %c0_103] : memref<3x64xf32, #tpu.memory_space<vmem>>, vector<1x64xf32>
    %c2_104 = arith.constant 2 : index
    %c0_105 = arith.constant 0 : index
    %121 = vector.load %arg7[%c2_104, %c0_105] : memref<3x64xf32, #tpu.memory_space<vmem>>, vector<1x64xf32>
    %cst_106 = arith.constant dense<0.000000e+00> : vector<18x4xf32>
    %122 = tpu.matmul %115, %117, %cst_106 {dimension_numbers = #tpu.dot_dimension_numbers<[1], [0], [0], [1], [0, 0, 1, 1], [], []>} : vector<18x64xf32>, vector<64x4xf32>, vector<18x4xf32> -> vector<18x4xf32>
    %cst_107 = arith.constant dense<0.000000e+00> : vector<2x4xf32>
    %123 = tpu.matmul %118, %122, %cst_107 {dimension_numbers = #tpu.dot_dimension_numbers<[1], [0], [0], [1], [0, 0, 1, 1], [], []>} : vector<2x18xf32>, vector<18x4xf32>, vector<2x4xf32> -> vector<2x4xf32>
    %cst_108 = arith.constant 7.812500e-03 : f32
    %124 = vector.broadcast %cst_108 : f32 to vector<2x4xf32>
    %125 = arith.mulf %123, %124 : vector<2x4xf32>
    %cst_109 = arith.constant dense<0.000000e+00> : vector<18x4xf32>
    %126 = tpu.matmul %119, %125, %cst_109 {dimension_numbers = #tpu.dot_dimension_numbers<[1], [0], [0], [1], [0, 0, 1, 1], [], []>} : vector<18x2xf32>, vector<2x4xf32>, vector<18x4xf32> -> vector<18x4xf32>
    %cst_110 = arith.constant dense<0.000000e+00> : vector<18x64xf32>
    %127 = tpu.matmul %126, %116, %cst_110 {dimension_numbers = #tpu.dot_dimension_numbers<[1], [0], [0], [1], [0, 0, 1, 1], [], []>} : vector<18x4xf32>, vector<4x64xf32>, vector<18x64xf32> -> vector<18x64xf32>
    %128 = arith.subf %115, %127 : vector<18x64xf32>
    %129 = arith.mulf %128, %128 : vector<18x64xf32>
    %cst_111 = arith.constant dense<0.000000e+00> : vector<18x4xf32>
    %130 = tpu.matmul %129, %117, %cst_111 {dimension_numbers = #tpu.dot_dimension_numbers<[1], [0], [0], [1], [0, 0, 1, 1], [], []>} : vector<18x64xf32>, vector<64x4xf32>, vector<18x4xf32> -> vector<18x4xf32>
    %cst_112 = arith.constant dense<0.000000e+00> : vector<2x4xf32>
    %131 = tpu.matmul %118, %130, %cst_112 {dimension_numbers = #tpu.dot_dimension_numbers<[1], [0], [0], [1], [0, 0, 1, 1], [], []>} : vector<2x18xf32>, vector<18x4xf32>, vector<2x4xf32> -> vector<2x4xf32>
    %cst_113 = arith.constant 7.812500e-03 : f32
    %132 = vector.broadcast %cst_113 : f32 to vector<2x4xf32>
    %133 = arith.mulf %131, %132 : vector<2x4xf32>
    %cst_114 = arith.constant 9.99999974E-6 : f32
    %134 = vector.broadcast %cst_114 : f32 to vector<2x4xf32>
    %135 = arith.addf %133, %134 : vector<2x4xf32>
    %136 = math.rsqrt %135 : vector<2x4xf32>
    %cst_115 = arith.constant dense<0.000000e+00> : vector<18x4xf32>
    %137 = tpu.matmul %119, %136, %cst_115 {dimension_numbers = #tpu.dot_dimension_numbers<[1], [0], [0], [1], [0, 0, 1, 1], [], []>} : vector<18x2xf32>, vector<2x4xf32>, vector<18x4xf32> -> vector<18x4xf32>
    %cst_116 = arith.constant dense<0.000000e+00> : vector<18x64xf32>
    %138 = tpu.matmul %137, %116, %cst_116 {dimension_numbers = #tpu.dot_dimension_numbers<[1], [0], [0], [1], [0, 0, 1, 1], [], []>} : vector<18x4xf32>, vector<4x64xf32>, vector<18x64xf32> -> vector<18x64xf32>
    %139 = arith.mulf %128, %138 : vector<18x64xf32>
    %140 = vector.broadcast %120 : vector<1x64xf32> to vector<18x64xf32>
    %141 = arith.mulf %139, %140 : vector<18x64xf32>
    %142 = vector.broadcast %121 : vector<1x64xf32> to vector<18x64xf32>
    %143 = vector.broadcast %43 : vector<18x1xf32> to vector<18x64xf32>
    %144 = arith.mulf %142, %143 : vector<18x64xf32>
    %145 = arith.addf %141, %144 : vector<18x64xf32>
    %cst_117 = arith.constant 0.000000e+00 : f32
    %146 = vector.broadcast %cst_117 : f32 to vector<18x64xf32>
    %147 = arith.maximumf %145, %146 : vector<18x64xf32>
    %148 = vector.extract_strided_slice %147 {offsets = [0, 0], sizes = [8, 64], strides = [1, 1]} : vector<18x64xf32> to vector<8x64xf32>
    %149 = vector.extract_strided_slice %147 {offsets = [10, 0], sizes = [8, 64], strides = [1, 1]} : vector<18x64xf32> to vector<8x64xf32>
    %150 = tpu.concatenate %148, %149 in 1 : vector<8x64xf32>, vector<8x64xf32> -> vector<8x128xf32>
    %c0_118 = arith.constant 0 : index
    %c0_119 = arith.constant 0 : index
    %c0_120 = arith.constant 0 : index
    %151 = vector.load %arg12[%c0_118, %c0_119, %c0_120] : memref<1x8x128xf32, #tpu.memory_space<vmem>>, vector<1x8x128xf32>
    %152 = vector.shape_cast %151 : vector<1x8x128xf32> to vector<8x128xf32>
    %153 = vector.shape_cast %150 : vector<8x128xf32> to vector<1x8x128xf32>
    tpu.vector_store %arg12[%c0_118, %c0_119, %c0_120], %153 {strides = array<i32>} : memref<1x8x128xf32, #tpu.memory_space<vmem>>, vector<1x8x128xf32>,
    return
  }
  func.func @transform_0(%arg0: i32) -> (i32, i32, i32, i32) {
    %c0_i32 = arith.constant 0 : i32
    %c0_i32_0 = arith.constant 0 : i32
    %c0_i32_1 = arith.constant 0 : i32
    %c0_i32_2 = arith.constant 0 : i32
    return %arg0, %c0_i32, %c0_i32_0, %c0_i32_1 : i32, i32, i32, i32
  }
  func.func @transform_1(%arg0: i32) -> (i32, i32, i32) {
    %c0_i32 = arith.constant 0 : i32
    %c0_i32_0 = arith.constant 0 : i32
    %c0_i32_1 = arith.constant 0 : i32
    %c0_i32_2 = arith.constant 0 : i32
    return %c0_i32, %c0_i32_0, %c0_i32_1 : i32, i32, i32
  }
  func.func @transform_2(%arg0: i32) -> (i32, i32, i32) {
    %c0_i32 = arith.constant 0 : i32
    %c0_i32_0 = arith.constant 0 : i32
    %c0_i32_1 = arith.constant 0 : i32
    %c0_i32_2 = arith.constant 0 : i32
    return %c0_i32, %c0_i32_0, %c0_i32_1 : i32, i32, i32
  }
  func.func @transform_3(%arg0: i32) -> (i32, i32) {
    %c0_i32 = arith.constant 0 : i32
    %c0_i32_0 = arith.constant 0 : i32
    %c0_i32_1 = arith.constant 0 : i32
    return %c0_i32, %c0_i32_0 : i32, i32
  }
  func.func @transform_4(%arg0: i32) -> (i32, i32) {
    %c0_i32 = arith.constant 0 : i32
    %c0_i32_0 = arith.constant 0 : i32
    %c0_i32_1 = arith.constant 0 : i32
    return %c0_i32, %c0_i32_0 : i32, i32
  }
  func.func @transform_5(%arg0: i32) -> (i32, i32) {
    %c0_i32 = arith.constant 0 : i32
    %c0_i32_0 = arith.constant 0 : i32
    %c0_i32_1 = arith.constant 0 : i32
    return %c0_i32, %c0_i32_0 : i32, i32
  }
  func.func @transform_6(%arg0: i32) -> (i32, i32) {
    %c0_i32 = arith.constant 0 : i32
    %c0_i32_0 = arith.constant 0 : i32
    %c0_i32_1 = arith.constant 0 : i32
    return %c0_i32, %c0_i32_0 : i32, i32
  }
  func.func @transform_7(%arg0: i32) -> (i32, i32) {
    %c0_i32 = arith.constant 0 : i32
    %c0_i32_0 = arith.constant 0 : i32
    %c0_i32_1 = arith.constant 0 : i32
    return %c0_i32, %c0_i32_0 : i32, i32
  }
  func.func @transform_8(%arg0: i32) -> (i32, i32) {
    %c0_i32 = arith.constant 0 : i32
    %c0_i32_0 = arith.constant 0 : i32
    %c0_i32_1 = arith.constant 0 : i32
    return %c0_i32, %c0_i32_0 : i32, i32
  }
  func.func @transform_9(%arg0: i32) -> (i32, i32) {
    %c0_i32 = arith.constant 0 : i32
    %c0_i32_0 = arith.constant 0 : i32
    %c0_i32_1 = arith.constant 0 : i32
    return %c0_i32, %c0_i32_0 : i32, i32
  }
  func.func @transform_10(%arg0: i32) -> (i32, i32) {
    %c0_i32 = arith.constant 0 : i32
    %c0_i32_0 = arith.constant 0 : i32
    %c0_i32_1 = arith.constant 0 : i32
    return %c0_i32, %c0_i32_0 : i32, i32
  }
  func.func @transform_11(%arg0: i32) -> (i32, i32, i32) {
    %c0_i32 = arith.constant 0 : i32
    %c0_i32_0 = arith.constant 0 : i32
    %c0_i32_1 = arith.constant 0 : i32
    return %arg0, %c0_i32, %c0_i32_0 : i32, i32, i32
  }
}

</mosaic_0001>

<bundles_post_ra>
// kernel: tpu_custom_call.1
= control target key start
LH: loop header
LB: loop body
LE: loop exit
PB: predicated region body
PF: predicated region fallthrough
CT: control target
= control target key end

     0   :  { %s1822_s21 = smov 112   ;;  %s2285_s0 = inlined_call_operand.vmem [shape: f32[2,4,8,32], index: 0, kind: input, shape index: {}]   ;;  %s2286_s1 = inlined_call_operand.vmem [shape: bf16[3,64,80], index: 1, kind: input, shape index: {}]   ;;  %s2287_s2 = inlined_call_operand.vmem [shape: bf16[3,80,64], index: 2, kind: input, shape index: {}]   ;;  %s2288_s3 = inlined_call_operand.vmem [shape: f32[3,80], index: 3, kind: input, shape index: {}]   ;;  %s2289_s4 = inlined_call_operand.vmem [shape: f32[4,80], index: 4, kind: input, shape index: {}]   ;;  %s2290_s5 = inlined_call_operand.vmem [shape: f32[80,4], index: 5, kind: input, shape index: {}]   ;;  %s2291_s6 = inlined_call_operand.vmem [shape: f32[3,64], index: 6, kind: input, shape index: {}]   ;;  %s2292_s7 = inlined_call_operand.vmem [shape: f32[4,64], index: 7, kind: input, shape index: {}]   ;;  %s2293_s8 = inlined_call_operand.vmem [shape: f32[64,4], index: 8, kind: input, shape index: {}]   ;;  %s2294_s9 = inlined_call_operand.vmem [shape: f32[2,18], index: 9, kind: input, shape index: {}]   ;;  %s2295_s10 = inlined_call_operand.vmem [shape: f32[18,2], index: 10, kind: input, shape index: {}]   ;;  %s2296_s11 = inlined_call_operand.hbm [shape: f32[1,8,128], index: 11, kind: output, shape index: {}]  }
   0x1   :  { %v78_v0 = vld [vmem:[%s2285_s0 + $0x30] sm:$0xff]  ;;  %v77_v1 = vld [vmem:[%s2285_s0 + $0x28] sm:$0xff]  ;;  %v79_v2 = vld [vmem:[%s2285_s0 + $0x38] sm:$0xff] }
   0x2   :  { %100 = vrot.lane.b32.xlu1 %v78_v0, %s1822_s21  ;;  %98 = vrot.lane.b32.xlu0 %v77_v1, %s1822_s21 }
   0x3   :  { %102 = vrot.lane.b32.xlu2 %v79_v2, %s1822_s21 }
   0x4   :  { %16 = vsyncpa [#allocation5], 0  ;;  %v74_v3 = vld [vmem:[%s2285_s0 + $0x10] sm:$0xff]  ;;  %v73_v4 = vld [vmem:[%s2285_s0 + $0x8] sm:$0xff]  ;;  %s1823_s15 = smov 127   ;;  %vm51_vm0 = vcmask 517121  }
   0x5   :  { %v75_v5 = vld [vmem:[%s2285_s0 + $0x18] sm:$0xff]  ;;  %v72_v6 = vld [vmem:[%s2285_s0] sm:$0xff]  ;;  %vm52_vm1 = vsmask.f32 1280  ;;  %vm57_vm3 = vsmask.f32 7942 }
   0x6   :  { %v76_v7 = vld [vmem:[%s2285_s0 + $0x20] sm:$0xff]  ;;  %vm53_vm2 = vmand %vm51_vm0, %vm52_vm1  ;;  %vm152_vm4 = vcmask 121856   ;;  %v59_v26 = vld [vmem:[#allocation2 + $0x8] sm:$0x2]  ;;  %s1824_s0 = smov 16   ;;  %vm40_vm6 = vcmask 516096  }
   0x7   :  { %v54_v24 = vld [vmem:[#allocation2 + $0x4] sm:$0x2]  ;;  %vm58_vm5 = vmand %vm51_vm0, %vm57_vm3  ;;  %v43_v43 = vld [vmem:[#allocation2] sm:$0x1]  ;;  %vm41_vm7 = vsmask.f32 256 }
   0x8   :  { %v55_v25 = vsel %vm53_vm2, 0, %v54_v24  ;;  %v60_v27 = vsel %vm58_vm5, 0, %v59_v26  ;;  %vm46_vm8 = vsmask.f32 7938  ;;  %v48_v45 = vld [vmem:[#allocation2 + $0x4] sm:$0x1]  ;;  %vm42_vm9 = vmand %vm40_vm6, %vm41_vm7 }
   0x9   :  { %56 = vst [vmem:[#allocation2 + $0x4] sm:$0x2] %v55_v25  ;;  %v44_v47 = vsel %vm42_vm9, 0, %v43_v43  ;;  %vm47_vm10 = vmand %vm40_vm6, %vm46_vm8  ;;  %vm280_vm11 = vcmask 125953   ;;  %vm285_vm12 = vcmask 123904   ;;  %s1825_s16 = smov 32  }
   0xa   :  { %92 = vrot.lane.b32.xlu1 %v74_v3, %s1822_s21  ;;  %90 = vrot.lane.b32.xlu0 %v73_v4, %s1822_s21  ;;  %61 = vst [vmem:[#allocation2 + $0x8] sm:$0x2] %v60_v27  ;;  %v49_v50 = vsel %vm47_vm10, 0, %v48_v45  ;;  %vm281_vm13 = vmand %vm280_vm11, %vm57_vm3  ;;  %s1826_s17 = smov 48   ;;  %vm187_vm15 = vcmask 125952   ;;  %vm192_vm0 = vcmask 122880  }
   0xb   :  { %94 = vrot.lane.b32.xlu2 %v75_v5, %s1822_s21  ;;  %45 = vst [vmem:[#allocation2] sm:$0x1] %v44_v47  ;;  %vm286_vm14 = vmand %vm285_vm12, %vm52_vm1  ;;  %vm310_vm5 = vcmask 255104   ;;  %vm211_vm9 = vcmask 257152   ;;  %vm305_vm10 = vcmask 257153   ;;  %s1828_s19 = smov [#allocation4]  }
   0xc   :  { %50 = vst [vmem:[#allocation2 + $0x4] sm:$0x1] %v49_v50  ;;  %vm188_vm2 = vmand %vm187_vm15, %vm46_vm8  ;;  %vm330_vm15 = vcmask 388353   ;;  %s1519_s20 = sshll.u32 %s1828_s19, 4  ;;  %s1520_s20 = int_to_ptr.vmem [resolvable:$true] %s1519_s20 }
   0xd   :  { %vm311_vm6 = vmand %vm310_vm5, %vm52_vm1  ;;  %vm235_vm5 = vcmask 388352  }
   0xe   :  { %vm212_vm11 = vmand %vm211_vm9, %vm46_vm8 }
   0xf   :  { %vm306_vm12 = vmand %vm305_vm10, %vm57_vm3 }
  0x10   :  { %v282_v57 = vld [vmem:[#allocation2 + $0x4] sm:$0xe]  ;;  %vm236_vm9 = vmand %vm235_vm5, %vm46_vm8  ;;  %vm448_vm5 = vcmask 523264  }
  0x11   :  { %v287_v60 = vld [vmem:[#allocation2 + $0x8] sm:$0x3] }
  0x12   :  { %88 = vrot.lane.b32.xlu1 %v72_v6, %s1822_s21  ;;  %96 = vrot.lane.b32.xlu0 %v76_v7, %s1822_s21  ;;  %v189_v45 = vld [vmem:[#allocation2] sm:$0xf] }
  0x5d   :  { %v103_v8 = vpop.permute.xlu2 %102 }
  0x5e   :  { %v1922_v19 = vmax.f32 %v79_v2, %v103_v8 }
  0x65   :  { %v95_v13 = vpop.permute.xlu2 %94 }
  0x66   :  { %v1916_v14 = vmax.f32 %v75_v5, %v95_v13 }
  0x74   :  { %v101_v9 = vpop.permute.xlu1 %100  ;;  %v99_v10 = vpop.permute.xlu0 %98 }
  0x75   :  { %v1913_v11 = vmax.f32 %v78_v0, %v101_v9  ;;  %v117_v12 = vmax.f32 %v77_v1, %v99_v10 }
  0x77   :  { %138 = vrot.lane.b32.xlu2 %v117_v12, %s1823_s15  ;;  %140 = vrot.lane.b32.xlu1 %v1913_v11, %s1823_s15 }
  0x7c   :  { %v93_v15 = vpop.permute.xlu1 %92  ;;  %v91_v16 = vpop.permute.xlu0 %90 }
  0x7d   :  { %v114_v17 = vmax.f32 %v74_v3, %v93_v15  ;;  %v1918_v18 = vmax.f32 %v73_v4, %v91_v16 }
  0x7f   :  { %132 = vrot.lane.b32.xlu2 %v114_v17, %s1823_s15  ;;  %130 = vrot.lane.b32.xlu0 %v1918_v18, %s1823_s15 }
  0x80   :  { %134 = vrot.lane.b32.xlu1 %v1916_v14, %s1823_s15 }
  0x84   :  { %v97_v20 = vpop.permute.xlu0 %96  ;;  %v89_v22 = vpop.permute.xlu1 %88 }
  0x85   :  { %v116_v21 = vmax.f32 %v76_v7, %v97_v20  ;;  %v1925_v23 = vmax.f32 %v72_v6, %v89_v22 }
  0x87   :  { %142 = vrot.lane.b32.xlu0 %v1922_v19, %s1823_s15  ;;  %136 = vrot.lane.b32.xlu2 %v116_v21, %s1823_s15 }
  0x8f   :  { %128 = vrot.lane.b32.xlu0 %v1925_v23, %s1823_s15 }
  0xd1   :  { %v139_v28 = vpop.permute.xlu2 %138 }
  0xd2   :  { %v158_v29 = vsel %vm152_vm4, %v139_v28, %v117_v12 }
  0xd3   :  { %v166_v30 = vmax.f32 %v117_v12, %v158_v29 }
  0xd5   :  { %v174_v31 = vpack.c.bf16 %v166_v30, %v166_v30 }
  0xd7   :  { %v291_v32 = vshrl.u32 %v174_v31, 16  ;;  %v294_v33 = vshll.u32 %v174_v31, 16 }
  0xd9   :  { %v293_v34 = vrot.slane %v291_v32, 6  ;;  %v296_v35 = vrot.slane %v294_v33, 7  ;;  %v133_v36 = vpop.permute.xlu2 %132 }
  0xda   :  { %v155_v37 = vsel %vm152_vm4, %v133_v36, %v114_v17 }
  0xdb   :  { %v297_v38 = vor.u32 %v296_v35, %v293_v34  ;;  %v163_v39 = vmax.f32 %v114_v17, %v155_v37 }
  0xdd   :  { %v298_v40 = vrot.slane %v297_v38, 4  ;;  %v1933_v41 = vpack.c.bf16 %v163_v39, %v163_v39 }
  0xdf   :  { %301 = vrot.lane.b32.xlu1 %v298_v40, %s1824_s0  ;;  %v222_v48 = vshrl.u32 %v1933_v41, 16  ;;  %v225_v33 = vshll.u32 %v1933_v41, 16 }
  0xe1   :  { %v137_v42 = vpop.permute.xlu2 %136  ;;  %v224_v53 = vrot.slane %v222_v48, 7 }
  0xe2   :  { %v157_v44 = vsel %vm152_vm4, %v137_v42, %v116_v21 }
  0xe3   :  { %v165_v46 = vmax.f32 %v116_v21, %v157_v44  ;;  %v228_v63 = vrot.slane %v224_v53, 4  ;;  %v227_v35 = vor.u32 %v225_v33, %v224_v53 }
  0xe5   :  { %v173_v49 = vpack.c.bf16 %v165_v46, %v165_v46  ;;  %v194_v46 = vld [vmem:[#allocation2 + $0x4] sm:$0x1] }
  0xe7   :  { %299 = vrot.lane.b32.xlu1 %v297_v38, %s1824_s0  ;;  %v270_v51 = vshrl.u32 %v173_v49, 16  ;;  %v273_v52 = vshll.u32 %v173_v49, 16 }
  0xe9   :  { %v141_v54 = vpop.permute.xlu1 %140  ;;  %v272_v55 = vrot.slane %v270_v51, 6  ;;  %v275_v56 = vrot.slane %v273_v52, 7 }
  0xea   :  { %v159_v58 = vsel %vm152_vm4, %v141_v54, %v1913_v11 }
  0xeb   :  { %v276_v59 = vor.u32 %v275_v56, %v272_v55  ;;  %v167_v0 = vmax.f32 %v1913_v11, %v159_v58 }
  0xed   :  { %v277_v61 = vrot.slane %v276_v59, 4  ;;  %v283_v62 = vsel %vm281_vm13, %v276_v59, %v282_v57  ;;  %v175_v3 = vpack.c.bf16 %v167_v0, %v167_v0  ;;  %vm335_vm13 = vcmask 386304   ;;  %v1741_v0 = vld [vmem:[%s2286_s1 + $0x18] sm:$0xff] }
  0xee   :  { %284 = vst [vmem:[#allocation2 + $0x4] sm:$0xe] %v283_v62  ;;  %509 = vmatpush.bf16.msra.mxu1 %v1741_v0  ;;  %v600_v0 = vld [vmem:[%s2290_s5 + $0x18] sm:$0xff] }
  0xef   :  { %v288_v1 = vsel %vm286_vm14, %v277_v61, %v287_v60  ;;  %231 = vrot.lane.b32.xlu1 %v228_v63, %s1825_s16  ;;  %v316_v10 = vshrl.u32 %v175_v3, 16  ;;  %v319_v12 = vshll.u32 %v175_v3, 16  ;;  %vm336_vm14 = vmand %vm335_vm13, %vm52_vm1  ;;  %vm264_vm13 = vcmask 516480  }
  0xf0   :  { %289 = vst [vmem:[#allocation2 + $0x8] sm:$0x3] %v288_v1  ;;  %v1740_v1 = vld [vmem:[%s2286_s1 + $0x10] sm:$0xff] }
  0xf1   :  { %v131_v2 = vpop.permute.xlu0 %130  ;;  %v318_v21 = vrot.slane %v316_v10, 6  ;;  %v321_v25 = vrot.slane %v319_v12, 7  ;;  %v1738_v10 = vld [vmem:[%s2286_s1] sm:$0xff]  ;;  %v1743_v12 = vld [vmem:[%s2286_s1 + $0x28] sm:$0xff] }
  0xf2   :  { %v154_v4 = vsel %vm152_vm4, %v131_v2, %v1918_v18  ;;  %v135_v5 = vpop.permute.xlu1 %134  ;;  %v1749_v2 = vld [vmem:[%s2286_s1 + $0x58] sm:$0xff]  ;;  %510 = vmatpush.bf16.msra.mxu1 %v1740_v1  ;;  %v599_v1 = vld [vmem:[%s2290_s5 + $0x10] sm:$0xff] }
  0xf3   :  { %v162_v6 = vmax.f32 %v1918_v18, %v154_v4  ;;  %v156_v7 = vsel %vm152_vm4, %v135_v5, %v1916_v14  ;;  %v322_v32 = vor.u32 %v321_v25, %v318_v21  ;;  %574 = vmatpush.bf16.msra.mxu2 %v1749_v2  ;;  %v598_v2 = vld [vmem:[%s2290_s5 + $0x8] sm:$0xff] }
  0xf4   :  { %v164_v8 = vmax.f32 %v1916_v14, %v156_v7  ;;  %v1739_v7 = vld [vmem:[%s2286_s1 + $0x8] sm:$0xff] }
  0xf5   :  { %v170_v9 = vpack.c.bf16 %v162_v6, %v162_v6  ;;  %v323_v39 = vrot.slane %v322_v32, 4  ;;  %v307_v59 = vld [vmem:[#allocation2 + $0x4] sm:$0xe]  ;;  %v1745_v6 = vld [vmem:[%s2286_s1 + $0x38] sm:$0xff] }
  0xf6   :  { %v172_v11 = vpack.c.bf16 %v164_v8, %v164_v8  ;;  %v1748_v8 = vld [vmem:[%s2286_s1 + $0x50] sm:$0xff]  ;;  %459 = vmatpush.bf16.msra.mxu0 %v1745_v6  ;;  %511 = vmatpush.bf16.msra.mxu1 %v1739_v7 }
  0xf7   :  { %v198_v13 = vshrl.u32 %v170_v9, 16  ;;  %v201_v17 = vshll.u32 %v170_v9, 16  ;;  %v312_v53 = vld [vmem:[#allocation2 + $0x8] sm:$0x3]  ;;  %v1744_v9 = vld [vmem:[%s2286_s1 + $0x30] sm:$0xff]  ;;  %575 = vmatpush.bf16.msra.mxu2 %v1748_v8 }
  0xf8   :  { %v246_v15 = vshrl.u32 %v172_v11, 16  ;;  %v249_v24 = vshll.u32 %v172_v11, 16  ;;  %v1747_v11 = vld [vmem:[%s2286_s1 + $0x48] sm:$0xff]  ;;  %v1786_v8 = vld [vmem:[%s2288_s3] ss:$0 sm:$0xff] }
  0xf9   :  { %v200_v16 = vrot.slane %v198_v13, 7  ;;  %v143_v20 = vpop.permute.xlu0 %142 }
  0xfa   :  { %v248_v22 = vrot.slane %v246_v15, 7  ;;  %v160_v18 = vsel %vm152_vm4, %v143_v20, %v1922_v19  ;;  %460 = vmatpush.bf16.msra.mxu0 %v1744_v9  ;;  %512 = vmatpush.bf16.msra.mxu1 %v1738_v10  ;;  %v1742_v20 = vld [vmem:[%s2286_s1 + $0x20] sm:$0xff] }
  0xfb   :  { %v168_v26 = vmax.f32 %v1922_v19, %v160_v18  ;;  %v203_v27 = vor.u32 %v201_v17, %v200_v16  ;;  %v204_v14 = vrot.slane %v200_v16, 4  ;;  %576 = vmatpush.bf16.msra.mxu2 %v1747_v11  ;;  %v1746_v17 = vld [vmem:[%s2286_s1 + $0x40] sm:$0xff]  ;;  %s1521_s1 = sshll.u32 %s2296_s11, 4  ;;  %s1522_s1 = int_to_ptr.hbm [resolvable:$true] %s1521_s1 }
  0xfc   :  { %v251_v28 = vor.u32 %v249_v24, %v248_v22  ;;  %v252_v51 = vrot.slane %v248_v22, 4 }
  0xfd   :  { %v176_v29 = vpack.c.bf16 %v168_v26, %v168_v26  ;;  %205 = vrot.lane.b32.xlu2 %v203_v27, %s1824_s0  ;;  %207 = vrot.lane.b32.xlu0 %v204_v14, %s1824_s0 }
  0xfe   :  { %253 = vrot.lane.b32.xlu1 %v251_v28, %s1826_s17  ;;  %461 = vmatpush.bf16.msra.mxu0 %v1743_v12 }
  0xff   :  { %v341_v30 = vshrl.u32 %v176_v29, 16  ;;  %v344_v31 = vshll.u32 %v176_v29, 16  ;;  %577 = vmatpush.bf16.msra.mxu2 %v1746_v17 }
 0x101   :  { %v129_v34 = vpop.permute.xlu0 %128  ;;  %v343_v36 = vrot.slane %v341_v30, 6  ;;  %v346_v37 = vrot.slane %v344_v31, 7 }
 0x102   :  { %v153_v19 = vsel %vm152_vm4, %v129_v34, %v1925_v23  ;;  %vm193_vm4 = vmand %vm192_vm0, %vm41_vm7  ;;  %462 = vmatpush.bf16.msra.mxu0 %v1742_v20 }
 0x103   :  { %v161_v38 = vmax.f32 %v1925_v23, %v153_v19  ;;  %v347_v43 = vor.u32 %v346_v37, %v343_v36  ;;  %vm331_vm0 = vmand %vm330_vm15, %vm57_vm3 }
 0x105   :  { %v169_v40 = vpack.c.bf16 %v161_v38, %v161_v38  ;;  %229 = vrot.lane.b32.xlu0 %v227_v35, %s1825_s16  ;;  %326 = vrot.lane.b32.xlu2 %v323_v39, %s1825_s16  ;;  %v348_v48 = vrot.slane %v347_v43, 4  ;;  %v606_v38 = vld [vmem:[%s2290_s5 + $0x48] sm:$0xff] }
 0x106   :  { %626 = vmatpush.msra.mxu3 %v606_v38  ;;  %774 = vmatpush.msrb.mxu2 %v606_v38 }
 0x107   :  { %v178_v42 = vshrl.u32 %v169_v40, 16  ;;  %v181_v44 = vshll.u32 %v169_v40, 16  ;;  %v605_v40 = vld [vmem:[%s2290_s5 + $0x40] sm:$0xff] }
 0x108   :  { %627 = vmatpush.msra.mxu3 %v605_v40  ;;  %775 = vmatpush.msrb.mxu2 %v605_v40 }
 0x109   :  { %v180_v41 = vrot.slane %v178_v42, 7 }
 0x10b   :  { %v183_v47 = vor.u32 %v181_v44, %v180_v41  ;;  %v184_v23 = vrot.slane %v180_v41, 4 }
 0x10d   :  { %v190_v49 = vsel %vm188_vm2, %v183_v47, %v189_v45  ;;  %v195_v50 = vsel %vm193_vm4, %v184_v23, %v194_v46  ;;  %351 = vrot.lane.b32.xlu0 %v348_v48, %s1826_s17  ;;  %324 = vrot.lane.b32.xlu2 %v322_v32, %s1825_s16  ;;  %vm216_vm2 = vcmask 254080  }
 0x10e   :  { %191 = vst [vmem:[#allocation2] sm:$0xf] %v190_v49  ;;  %vm217_vm4 = vmand %vm216_vm2, %vm41_vm7  ;;  %vm355_vm2 = vcmask 519553  }
 0x10f   :  { %196 = vst [vmem:[#allocation2 + $0x4] sm:$0x1] %v195_v50 }
 0x115   :  { %349 = vrot.lane.b32.xlu0 %v347_v43, %s1826_s17  ;;  %255 = vrot.lane.b32.xlu2 %v252_v51, %s1826_s17  ;;  %v213_v56 = vld [vmem:[#allocation2] sm:$0xf] }
 0x116   :  { %v218_v15 = vld [vmem:[#allocation2 + $0x4] sm:$0x1] }
 0x151   :  { %v302_v52 = vpop.permute.xlu1 %301 }
 0x152   :  { %v313_v54 = vsel %vm311_vm6, %v302_v52, %v312_v53  ;;  %vm240_vm6 = vcmask 385280  }
 0x153   :  { %314 = vst [vmem:[#allocation2 + $0x8] sm:$0x3] %v313_v54  ;;  %vm241_vm10 = vmand %vm240_vm6, %vm41_vm7  ;;  %vm536_vm6 = vcmask 1046528  }
 0x157   :  { %v206_v55 = vpop.permute.xlu2 %205 }
 0x158   :  { %v214_v57 = vsel %vm212_vm11, %v206_v55, %v213_v56  ;;  %vm360_vm11 = vcmask 517504  }
 0x159   :  { %215 = vst [vmem:[#allocation2] sm:$0xf] %v214_v57  ;;  %v300_v58 = vpop.permute.xlu1 %299 }
 0x15a   :  { %v308_v60 = vsel %vm306_vm12, %v300_v58, %v307_v59  ;;  %v337_v62 = vld [vmem:[#allocation2 + $0x8] sm:$0x3]  ;;  %vm259_vm12 = vcmask 519552  }
 0x15b   :  { %309 = vst [vmem:[#allocation2 + $0x4] sm:$0xe] %v308_v60  ;;  %vm260_vm15 = vmand %vm259_vm12, %vm46_vm8  ;;  %v604_v60 = vld [vmem:[%s2290_s5 + $0x38] sm:$0xff]  ;;  %vm646_vm12 = vcmask 146432  }
 0x15c   :  { %628 = vmatpush.msra.mxu3 %v604_v60  ;;  %776 = vmatpush.msrb.mxu2 %v604_v60 }
 0x15f   :  { %v327_v61 = vpop.permute.xlu2 %326 }
 0x160   :  { %v338_v63 = vsel %vm336_vm14, %v327_v61, %v337_v62  ;;  %v237_v22 = vld [vmem:[#allocation2] sm:$0xf]  ;;  %vm361_vm14 = vmand %vm360_vm11, %vm52_vm1  ;;  %v603_v61 = vld [vmem:[%s2290_s5 + $0x30] sm:$0xff]  ;;  %vm650_vm11 = vcmask 1041408  }
 0x161   :  { %339 = vst [vmem:[#allocation2 + $0x8] sm:$0x3] %v338_v63  ;;  %v232_v24 = vpop.permute.xlu1 %231  ;;  %v602_v62 = vld [vmem:[%s2290_s5 + $0x28] sm:$0xff]  ;;  %629 = vmatpush.msra.mxu3 %v603_v61  ;;  %777 = vmatpush.msrb.mxu2 %v603_v61  ;;  %v601_v63 = vld [vmem:[%s2290_s5 + $0x20] sm:$0xff] }
 0x162   :  { %v332_v4 = vld [vmem:[#allocation2 + $0x4] sm:$0xe] }
 0x163   :  { %630 = vmatpush.msra.mxu3 %v602_v62  ;;  %778 = vmatpush.msrb.mxu2 %v602_v62 }
 0x165   :  { %631 = vmatpush.msra.mxu3 %v601_v63  ;;  %779 = vmatpush.msrb.mxu2 %v601_v63 }
 0x167   :  { %v325_v3 = vpop.permute.xlu2 %324  ;;  %632 = vmatpush.msra.mxu3 %v600_v0  ;;  %780 = vmatpush.msrb.mxu2 %v600_v0 }
 0x168   :  { %v333_v5 = vsel %vm331_vm0, %v325_v3, %v332_v4  ;;  %vm265_vm0 = vmand %vm264_vm13, %vm41_vm7  ;;  %v362_v14 = vld [vmem:[#allocation2 + $0x8] sm:$0x3]  ;;  %v597_v3 = vld [vmem:[%s2290_s5] sm:$0xff]  ;;  %vm368_vm13 = vcmask 15360  }
 0x169   :  { %334 = vst [vmem:[#allocation2 + $0x4] sm:$0xe] %v333_v5  ;;  %633 = vmatpush.msra.mxu3 %v599_v1  ;;  %781 = vmatpush.msrb.mxu2 %v599_v1 }
 0x16b   :  { %634 = vmatpush.msra.mxu3 %v598_v2  ;;  %782 = vmatpush.msrb.mxu2 %v598_v2 }
 0x16d   :  { %635 = vmatpush.msra.mxu3 %v597_v3  ;;  %783 = vmatpush.msrb.mxu2 %v597_v3  ;;  %v64_v3 = vld [vmem:[#allocation3] sm:$0x1] }
 0x16f   :  { %v208_v13 = vpop.permute.xlu0 %207  ;;  %v256_v31 = vpop.permute.xlu2 %255 }
 0x170   :  { %v219_v16 = vsel %vm217_vm4, %v208_v13, %v218_v15  ;;  %v254_v28 = vpop.permute.xlu1 %253  ;;  %vm356_vm4 = vmand %vm355_vm2, %vm57_vm3  ;;  %v357_v35 = vld [vmem:[#allocation2 + $0x4] sm:$0xe] }
 0x171   :  { %220 = vst [vmem:[#allocation2 + $0x4] sm:$0x1] %v219_v16 }
 0x177   :  { %v230_v21 = vpop.permute.xlu0 %229 }
 0x178   :  { %v242_v18 = vld [vmem:[#allocation2 + $0x4] sm:$0x1]  ;;  %v238_v25 = vsel %vm236_vm9, %v230_v21, %v237_v22  ;;  %vm408_vm9 = vsmask.f32 7424 }
 0x179   :  { %v243_v26 = vsel %vm241_vm10, %v232_v24, %v242_v18  ;;  %239 = vst [vmem:[#allocation2] sm:$0xf] %v238_v25  ;;  %vm610_vm10 = vcmask 654336  }
 0x17a   :  { %244 = vst [vmem:[#allocation2 + $0x4] sm:$0x1] %v243_v26 }
 0x17f   :  { %v352_v27 = vpop.permute.xlu0 %351 }
 0x180   :  { %v261_v29 = vld [vmem:[#allocation2] sm:$0xf]  ;;  %v363_v30 = vsel %vm361_vm14, %v352_v27, %v362_v14  ;;  %vm2297_vm14 = vcmask 1043456  }
 0x181   :  { %v266_v32 = vld [vmem:[#allocation2 + $0x4] sm:$0x1]  ;;  %v262_v33 = vsel %vm260_vm15, %v254_v28, %v261_v29  ;;  %364 = vst [vmem:[#allocation2 + $0x8] sm:$0x3] %v363_v30  ;;  %vm713_vm15 = vcmask 31744  }
 0x182   :  { %v267_v34 = vsel %vm265_vm0, %v256_v31, %v266_v32  ;;  %263 = vst [vmem:[#allocation2] sm:$0xf] %v262_v33  ;;  %v607_v31 = vld [vmem:[%s2294_s9] sm:$0x3] }
 0x183   :  { %268 = vst [vmem:[#allocation2 + $0x4] sm:$0x1] %v267_v34  ;;  %v2070_v34 = vld [vmem:[%s2295_s10] sm:$0xff] }
 0x184   :  { %v369_v61 = vsel %vm368_vm13, %v2070_v34, 0.0 }
 0x185   :  { %370 = vadd.xlane.f32.xlu0 %v369_v61 }
 0x187   :  { %v350_v19 = vpop.permute.xlu0 %349 }
 0x188   :  { %v358_v36 = vsel %vm356_vm4, %v350_v19, %v357_v35  ;;  %v390_v37 = vld [vmem:[#allocation2 + $0x8] sm:$0x3]  ;;  %v367_v35 = vld [vmem:[%s2295_s10 + $0x10] sm:$0x3] }
 0x189   :  { %359 = vst [vmem:[#allocation2 + $0x4] sm:$0xe] %v358_v36  ;;  %v405_v39 = vunpack.c.l.b16 %v390_v37  ;;  %v1774_v44 = vld [vmem:[#allocation2] sm:$0xe]  ;;  %v381_v55 = vld [vmem:[#allocation2 + $0x8] sm:$0x1] }
 0x18a   :  { %v474_v56 = vunpack.c.l.b16 %v381_v55  ;;  %v2078_v19 = vld [vmem:[%s2295_s10 + $0x8] sm:$0xff]  ;;  %v596_v36 = vld [vmem:[%s2289_s4] sm:$0xf] }
 0x18b   :  { %v407_v42 = vpack.c.b16 %v405_v39, %v405_v39  ;;  %1609 = vmatpush.msk.msrb.mxu1 %vm2297_vm14, %v596_v36  ;;  %v372_v62 = vsel %vm368_vm13, %v2078_v19, 0.0 }
 0x18c   :  { %v475_v57 = vpack.c.b16 %v474_v56, %v474_v56  ;;  %373 = vadd.xlane.f32.xlu1 %v372_v62 }
 0x18d   :  { %v417_v47 = vshll.u32 %v407_v42, 16  ;;  %v538_v50 = vrot.slane %v407_v42, 1  ;;  %v421_v58 = vshrl.u32 %v407_v42, 16 }
 0x18f   :  { %v419_v53 = vrot.slane %v417_v47, 1 }
 0x190   :  { %v1766_v43 = vld [vmem:[#allocation2] sm:$0xff]  }
 0x191   :  { %v1773_v41 = vld [vmem:[#allocation2] sm:$0xf0]  ;;  %v412_v45 = vshll.u32 %v1766_v43, 16  ;;  %1572 = vmatmul.msk.bf16.vlgmr.msra.gmra.mxu1 %vm448_vm5, %v1766_v43  ;;  %v410_v23 = vshrl.u32 %v1766_v43, 16  ;;  %v423_v59 = vor.u32 %v421_v58, %v419_v53 }
 0x192   :  { %v1775_v46 = vor.u32 %v1774_v44, %v1773_v41 }
 0x193   :  { %v414_v48 = vrot.slane %v412_v45, 1 }
 0x194   :  { %v537_v49 = vrot.slane %v1775_v46, 1 }
 0x195   :  { %v415_v51 = vor.u32 %v414_v48, %v410_v23 }
 0x196   :  { %v539_v52 = vsel %vm536_vm6, %v537_v49, %v538_v50 }
 0x197   :  { %1598 = vmatmul.msk.bf16.vlgmr.msra.gmra.mxu2 %vm448_vm5, %v539_v52  ;;  %v420_v54 = vsel %vm408_vm9, %v415_v51, %v419_v53 }
 0x198   :  { %1554 = vmatmul.msk.bf16.vlgmr.msra.gmra.mxu0 %vm448_vm5, %v420_v54 }
 0x1a1   :  { %1573 = vmatmul.msk.bf16.gmra.mxu1 %vm448_vm5, %v475_v57 }
 0x1a7   :  { %1599 = vmatmul.msk.bf16.gmra.mxu2 %vm448_vm5, %v538_v50 }
 0x1a8   :  { %1555 = vmatmul.msk.bf16.gmra.mxu0 %vm448_vm5, %v423_v59 }
 0x20e   :  { %v514_v4 = vpop.f32.mrf.mxu1 }
 0x215   :  { %v464_v5 = vpop.f32.mrf.mxu0 }
 0x216   :  { %v516_v6 = vpop.f32.mrf.mxu1  ;;  %v515_v7 = vadd.f32 %v514_v4, %v464_v5  ;;  %v1754_v5 = vld [vmem:[%s2287_s2 + $0x20] sm:$0xff] }
 0x217   :  { %1098 = vmatpush.bf16.msra.mxu2 %v1754_v5 }
 0x21a   :  { %v579_v9 = vpop.f32.mrf.mxu2 }
 0x21b   :  { %v588_v10 = vadd.f32 %v579_v9, %v515_v7  ;;  %v371_v7 = vpop.xlane.xlu0 %370  ;;  %v1753_v9 = vld [vmem:[%s2287_s2 + $0x18] sm:$0xff] }
 0x21c   :  { %1099 = vmatpush.bf16.msra.mxu2 %v1753_v9 }
 0x21d   :  { %v593_v11 = vadd.f32 %v1786_v8, %v588_v10  ;;  %v466_v12 = vpop.f32.mrf.mxu0  ;;  %v1752_v10 = vld [vmem:[%s2287_s2 + $0x10] sm:$0xff] }
 0x21e   :  { %v519_v13 = vpop.f32.mrf.mxu1  ;;  %v517_v15 = vadd.f32 %v516_v6, %v466_v12  ;;  %v2131_v6 = vld [vmem:[%s2291_s6 + $0x2] ss:$0 sm:$0xff] }
 0x21f   :  { %1600 = vmatmul.msk.f32.vlgmr.msra.gmra.mxu3 %vm610_vm10, %v593_v11 }
 0x220   :  { %1100 = vmatpush.bf16.msra.mxu2 %v1752_v10 }
 0x222   :  { %v581_v16 = vpop.f32.mrf.mxu2 }
 0x223   :  { %v589_v17 = vadd.f32 %v581_v16, %v517_v15  ;;  %v1788_v15 = vld [vmem:[%s2288_s3 + $0x2] ss:$0 sm:$0xff] }
 0x224   :  { %v1750_v16 = vld [vmem:[%s2287_s2] sm:$0xff] }
 0x225   :  { %v594_v20 = vadd.f32 %v1786_v8, %v589_v17  ;;  %v469_v21 = vpop.f32.mrf.mxu0  ;;  %v1764_v17 = vld [vmem:[%s2287_s2 + $0x70] sm:$0xff] }
 0x226   :  { %v521_v22 = vpop.f32.mrf.mxu1  ;;  %v520_v24 = vadd.f32 %v519_v13, %v469_v21  ;;  %v1751_v13 = vld [vmem:[%s2287_s2 + $0x8] sm:$0xff] }
 0x227   :  { %1601 = vmatmul.msk.f32.gmra.mxu3 %vm610_vm10, %v594_v20  ;;  %1101 = vmatpush.bf16.msra.mxu2 %v1751_v13  ;;  %v1759_v22 = vld [vmem:[%s2287_s2 + $0x48] sm:$0xff] }
 0x228   :  { %1042 = vmatpush.bf16.msra.mxu1 %v1759_v22 }
 0x22a   :  { %v584_v18 = vpop.f32.mrf.mxu2 }
 0x22b   :  { %v590_v25 = vadd.f32 %v584_v18, %v520_v24  ;;  %1102 = vmatpush.bf16.msra.mxu2 %v1750_v16  ;;  %v901_v18 = vmul.f32 %v1788_v15, %v371_v7 }
 0x22d   :  { %v595_v26 = vadd.f32 %v1786_v8, %v590_v25  ;;  %v471_v27 = vpop.f32.mrf.mxu0  ;;  %v2134_v8 = vmul.f32 %v2131_v6, %v371_v7  ;;  %v1763_v25 = vld [vmem:[%s2287_s2 + $0x68] sm:$0xff] }
 0x22e   :  { %v1758_v27 = vld [vmem:[%s2287_s2 + $0x40] sm:$0xff] }
 0x22f   :  { %1602 = vmatmul.msk.f32.gmra.mxu3 %vm610_vm10, %v595_v26  ;;  %1043 = vmatpush.bf16.msra.mxu1 %v1758_v27 }
 0x232   :  { %v586_v14 = vpop.f32.mrf.mxu2 }
 0x2a2   :  { %v637_v28 = vpop.f32.mrf.mxu3 }
 0x2aa   :  { %v640_v29 = vpop.f32.mrf.mxu3 }
 0x2b2   :  { %v643_v30 = vpop.f32.mrf.mxu3 }
 0x2b3   :  { %1603 = vmatpush.msk.msrb.mxu3 %vm650_vm11, %v643_v30  ;;  %v1757_v30 = vld [vmem:[%s2287_s2 + $0x38] sm:$0xff] }
 0x2b4   :  { %1044 = vmatpush.bf16.msra.mxu1 %v1757_v30 }
 0x2b5   :  { %668 = vmatpush.msrb.mxu3 %v640_v29  ;;  %v1762_v29 = vld [vmem:[%s2287_s2 + $0x60] sm:$0xff] }
 0x2b7   :  { %669 = vmatpush.msrb.mxu3 %v637_v28  ;;  %v2168_v28 = vpop.xlane.xlu1 %373 }
 0x2b8   :  { %1604 = vmatmul.msk.f32.vlgmr.msrb.gmra.mxu3 %vm646_vm12, %v607_v31 }
 0x33b   :  { %v671_v32 = vpop.f32.mrf.mxu3 }
 0x33c   :  { %v674_v33 = vmul.f32 0.0078125, %v671_v32 }
 0x33e   :  { %1605 = vmatpush.msk.msrb.mxu0 %vm650_vm11, %v674_v33  ;;  %v1761_v33 = vld [vmem:[%s2287_s2 + $0x58] sm:$0xff] }
 0x33f   :  { %1606 = vmatmul.msk.f32.vlgmr.msrb.gmra.mxu0 %vm368_vm13, %v2070_v34 }
 0x340   :  { %1622 = vmatpush.msk.msra.mxu0 %vm2297_vm14, %v596_v36  ;;  %vm375_vm14 = vcmask 9216  }
 0x341   :  { %v376_v63 = vsel %vm375_vm14, %v367_v35, 0.0  ;;  %vm67_vm14 = vcmask 648193  }
 0x342   :  { %377 = vadd.xlane.f32.xlu2 %v376_v63 }
 0x347   :  { %1607 = vmatmul.msk.f32.gmra.mxu0 %vm368_vm13, %v2078_v19 }
 0x34f   :  { %1608 = vmatmul.msk.f32.gmra.mxu0 %vm368_vm13, %v367_v35 }
 0x3bc   :  { %v704_v37 = vpop.f32.mrf.mxu0 }
 0x3bd   :  { %1610 = vmatmul.msk.f32.vlgmr.msrb.gmra.mxu1 %vm713_vm15, %v704_v37  ;;  %v902_v37 = vmul.f32 %v1788_v15, %v2168_v28 }
 0x3c4   :  { %v707_v38 = vpop.f32.mrf.mxu0 }
 0x3c5   :  { %1611 = vmatmul.msk.f32.gmra.mxu1 %vm713_vm15, %v707_v38  ;;  %v1756_v38 = vld [vmem:[%s2287_s2 + $0x30] sm:$0xff] }
 0x3c6   :  { %1045 = vmatpush.bf16.msra.mxu1 %v1756_v38  ;;  %v1199_v38 = vld [vmem:[%s2293_s8 + $0x28] sm:$0xff] }
 0x3cc   :  { %v710_v39 = vpop.f32.mrf.mxu0 }
 0x3cd   :  { %1612 = vmatmul.msk.f32.gmra.mxu1 %vm713_vm15, %v710_v39 }
 0x43a   :  { %v744_v40 = vpop.f32.mrf.mxu1 }
 0x43b   :  { %v2094_v42 = vsub.f32 %v593_v11, %v744_v40  ;;  %v69_v11 = vld [vmem:[#allocation3 + $0x8] sm:$0x2] }
 0x43d   :  { %v756_v43 = vmul.f32 %v2094_v42, %v2094_v42 }
 0x43f   :  { %1613 = vmatmul.msk.f32.vlgmr.msrb.gmra.mxu2 %vm610_vm10, %v756_v43 }
 0x442   :  { %v747_v41 = vpop.f32.mrf.mxu1 }
 0x443   :  { %v2099_v44 = vsub.f32 %v594_v20, %v747_v41  ;;  %v1787_v20 = vld [vmem:[%s2288_s3 + $0x1] ss:$0 sm:$0xff] }
 0x445   :  { %v757_v45 = vmul.f32 %v2099_v44, %v2099_v44 }
 0x447   :  { %1614 = vmatmul.msk.f32.gmra.mxu2 %vm610_vm10, %v757_v45 }
 0x44a   :  { %v750_v46 = vpop.f32.mrf.mxu1 }
 0x44b   :  { %v2104_v47 = vsub.f32 %v595_v26, %v750_v46  ;;  %v2189_v46 = vpop.xlane.xlu2 %377 }
 0x44d   :  { %v758_v23 = vmul.f32 %v2104_v47, %v2104_v47 }
 0x44f   :  { %1615 = vmatmul.msk.f32.gmra.mxu2 %vm610_vm10, %v758_v23  ;;  %v1755_v23 = vld [vmem:[%s2287_s2 + $0x28] sm:$0xff] }
 0x450   :  { %1046 = vmatpush.bf16.msra.mxu1 %v1755_v23 }
 0x4c2   :  { %v785_v48 = vpop.f32.mrf.mxu2 }
 0x4ca   :  { %v788_v49 = vpop.f32.mrf.mxu2 }
 0x4d2   :  { %v791_v50 = vpop.f32.mrf.mxu2 }
 0x4d3   :  { %1616 = vmatpush.msk.msra.mxu3 %vm650_vm11, %v791_v50 }
 0x4d5   :  { %811 = vmatpush.msra.mxu3 %v788_v49 }
 0x4d7   :  { %812 = vmatpush.msra.mxu3 %v785_v48 }
 0x4d8   :  { %1617 = vmatmul.msk.f32.vlgmr.msra.gmra.mxu3 %vm646_vm12, %v607_v31 }
 0x55b   :  { %v814_v51 = vpop.f32.mrf.mxu3 }
 0x55c   :  { %v817_v52 = vmul.f32 0.0078125, %v814_v51 }
 0x55e   :  { %v818_v53 = vadd.f32 1e-05, %v817_v52 }
 0x560   :  { %1792 = vrsqrt.f32 %v818_v53  ;;  %vm825_vm2 = vweird.f32 %v818_v53 }
 0x566   :  { %v1793_v54 = vpop.eup %1792 }
 0x567   :  { %v820_v55 = vmul.f32 %v1793_v54, %v818_v53  ;;  %vm826_vm0 = vweird.f32 %v1793_v54 }
 0x568   :  { %vm827_vm4 = vmor %vm825_vm2, %vm826_vm0  ;;  %vm62_vm0 = vcmask 647168  }
 0x569   :  { %v821_v56 = vmul.f32 %v1793_v54, %v820_v55  ;;  %vm63_vm2 = vmand %vm62_vm0, %vm41_vm7 }
 0x56a   :  { %v65_v4 = vsel %vm63_vm2, 0, %v64_v3 }
 0x56b   :  { %v822_v57 = vmul.f32 0.5, %v821_v56  ;;  %66 = vst [vmem:[#allocation3] sm:$0x1] %v65_v4 }
 0x56d   :  { %v823_v58 = vsub.f32 1.5, %v822_v57 }
 0x56f   :  { %v824_v59 = vmul.f32 %v1793_v54, %v823_v58 }
 0x571   :  { %v828_v60 = vsel %vm827_vm4, %v1793_v54, %v824_v59  ;;  %vm68_vm4 = vmand %vm67_vm14, %vm57_vm3  ;;  %vm943_vm3 = vcmask 650240   ;;  %v903_v54 = vmul.f32 %v1788_v15, %v2189_v46  ;;  %vm950_vm14 = vcmask 648192  }
 0x572   :  { %1618 = vmatpush.msk.msrb.mxu3 %vm650_vm11, %v828_v60  ;;  %v70_v12 = vsel %vm68_vm4, 0, %v69_v11  ;;  %vm944_vm0 = vmand %vm943_vm3, %vm46_vm8  ;;  %vm913_vm8 = vsmask.f32 4368 }
 0x573   :  { %1619 = vmatmul.msk.f32.vlgmr.msrb.gmra.mxu3 %vm368_vm13, %v2070_v34  ;;  %71 = vst [vmem:[#allocation3 + $0x8] sm:$0x2] %v70_v12  ;;  %vm914_vm2 = vmor %vm41_vm7, %vm913_vm8 }
 0x574   :  { %1170 = vmatpush.bf16.msra.mxu3 %v1764_v17  ;;  %vm951_vm4 = vmand %vm950_vm14, %vm52_vm1  ;;  %vm2298_vm1 = vcmask 1043456  }
 0x575   :  { %vm2299_vm7 = vmmov %vm2298_vm1 }
 0x578   :  { %1171 = vmatpush.bf16.msra.mxu3 %v1763_v25 }
 0x57a   :  { %v952_v5 = vld [vmem:[#allocation3 + $0x8] sm:$0x3] }
 0x57b   :  { %1620 = vmatmul.msk.f32.gmra.mxu3 %vm368_vm13, %v2078_v19 }
 0x57c   :  { %1172 = vmatpush.bf16.msra.mxu3 %v1762_v29 }
 0x580   :  { %1173 = vmatpush.bf16.msra.mxu3 %v1761_v33 }
 0x583   :  { %1621 = vmatmul.msk.f32.gmra.mxu3 %vm368_vm13, %v367_v35 }
 0x5f6   :  { %v849_v0 = vpop.f32.mrf.mxu3 }
 0x5f7   :  { %1623 = vmatmul.msk.f32.vlgmr.msra.gmra.mxu0 %vm713_vm15, %v849_v0 }
 0x5fe   :  { %v852_v1 = vpop.f32.mrf.mxu3 }
 0x5ff   :  { %1624 = vmatmul.msk.f32.gmra.mxu0 %vm713_vm15, %v852_v1 }
 0x606   :  { %v855_v2 = vpop.f32.mrf.mxu3 }
 0x607   :  { %1625 = vmatmul.msk.f32.gmra.mxu0 %vm713_vm15, %v855_v2 }
 0x674   :  { %v884_v21 = vpop.f32.mrf.mxu0 }
 0x675   :  { %v893_v24 = vmul.f32 %v884_v21, %v2094_v42  ;;  %v1760_v42 = vld [vmem:[%s2287_s2 + $0x50] sm:$0xff] }
 0x676   :  { %1174 = vmatpush.bf16.msra.mxu3 %v1760_v42  ;;  %v1196_v42 = vld [vmem:[%s2293_s8 + $0x10] sm:$0xff] }
 0x677   :  { %v897_v26 = vmul.f32 %v1787_v20, %v893_v24 }
 0x679   :  { %v904_v14 = vadd.f32 %v901_v18, %v897_v26 }
 0x67b   :  { %v907_v31 = vmax.f32 %v904_v14, 0.0 }
 0x67c   :  { %v887_v32 = vpop.f32.mrf.mxu0 }
 0x67d   :  { %v910_v35 = vpack.c.bf16 %v907_v31, %v907_v31  ;;  %v894_v36 = vmul.f32 %v887_v32, %v2099_v44  ;;  %v945_v44 = vld [vmem:[#allocation3] sm:$0xf] }
 0x67f   :  { %v916_v39 = vshrl.u32 %v910_v35, 16  ;;  %v898_v40 = vmul.f32 %v1787_v20, %v894_v36  ;;  %v919_v41 = vshll.u32 %v910_v35, 16  ;;  %v1201_v36 = vld [vmem:[%s2293_s8 + $0x38] sm:$0xff] }
 0x680   :  { %1225 = vmatpush.msrb.mxu0 %v1201_v36  ;;  %1369 = vmatpush.msrb.mxu3 %v1201_v36 }
 0x681   :  { %v918_v43 = vrot.slane %v916_v39, 7  ;;  %v905_v45 = vadd.f32 %v902_v37, %v898_v40  ;;  %v1200_v37 = vld [vmem:[%s2293_s8 + $0x30] sm:$0xff]  ;;  %v1198_v39 = vld [vmem:[%s2293_s8 + $0x20] sm:$0xff]  ;;  %v1197_v40 = vld [vmem:[%s2293_s8 + $0x18] sm:$0xff] }
 0x682   :  { %1226 = vmatpush.msrb.mxu0 %v1200_v37  ;;  %1370 = vmatpush.msrb.mxu3 %v1200_v37 }
 0x683   :  { %v921_v48 = vor.u32 %v919_v41, %v918_v43  ;;  %v908_v49 = vmax.f32 %v905_v45, 0.0  ;;  %v922_v60 = vrot.slane %v918_v43, 4  ;;  %v1195_v43 = vld [vmem:[%s2293_s8 + $0x8] sm:$0xff]  ;;  %v1194_v41 = vld [vmem:[%s2293_s8] sm:$0xff] }
 0x684   :  { %v890_v50 = vpop.f32.mrf.mxu0  ;;  %1227 = vmatpush.msrb.mxu0 %v1199_v38  ;;  %1371 = vmatpush.msrb.mxu3 %v1199_v38 }
 0x685   :  { %v946_v51 = vsel %vm944_vm0, %v921_v48, %v945_v44  ;;  %v911_v52 = vpack.c.bf16 %v908_v49, %v908_v49  ;;  %v895_v53 = vmul.f32 %v890_v50, %v2104_v47  ;;  %v1790_v49 = vld [vmem:[%s2291_s6] ss:$0 sm:$0xff] }
 0x686   :  { %947 = vst [vmem:[#allocation3] sm:$0xf] %v946_v51  ;;  %1228 = vmatpush.msrb.mxu0 %v1198_v39  ;;  %1372 = vmatpush.msrb.mxu3 %v1198_v39 }
 0x687   :  { %v924_v55 = vshrl.u32 %v911_v52, 16  ;;  %v899_v56 = vmul.f32 %v1787_v20, %v895_v53  ;;  %v927_v58 = vshll.u32 %v911_v52, 16 }
 0x688   :  { %1229 = vmatpush.msrb.mxu0 %v1197_v40  ;;  %1373 = vmatpush.msrb.mxu3 %v1197_v40 }
 0x689   :  { %v926_v57 = vrot.slane %v924_v55, 7  ;;  %v906_v59 = vadd.f32 %v903_v54, %v899_v56 }
 0x68a   :  { %1230 = vmatpush.msrb.mxu0 %v1196_v42  ;;  %1374 = vmatpush.msrb.mxu3 %v1196_v42 }
 0x68b   :  { %v929_v61 = vor.u32 %v927_v58, %v926_v57  ;;  %v909_v62 = vmax.f32 %v906_v59, 0.0  ;;  %v931_v3 = vrot.slane %v926_v57, 4 }
 0x68c   :  { %1231 = vmatpush.msrb.mxu0 %v1195_v43  ;;  %1375 = vmatpush.msrb.mxu3 %v1195_v43 }
 0x68d   :  { %v930_v63 = vsel %vm914_vm2, %v922_v60, %v929_v61  ;;  %v912_v0 = vpack.c.bf16 %v909_v62, %v909_v62  ;;  %v1777_v16 = vld [vmem:[#allocation3] sm:$0xe] }
 0x68e   :  { %949 = vst.msk [vmem:[#allocation3 + $0x4] sm:$0xf] %vm943_vm3, %v930_v63  ;;  %1232 = vmatpush.msrb.mxu0 %v1194_v41  ;;  %1376 = vmatpush.msrb.mxu3 %v1194_v41 }
 0x68f   :  { %v933_v47 = vshrl.u32 %v912_v0, 16  ;;  %v936_v2 = vshll.u32 %v912_v0, 16 }
 0x691   :  { %v935_v1 = vrot.slane %v933_v47, 7 }
 0x693   :  { %v938_v4 = vor.u32 %v936_v2, %v935_v1 }
 0x695   :  { %v939_v7 = vsel %vm914_vm2, %v931_v3, %v938_v4  ;;  %v1770_v9 = vld [vmem:[#allocation3] sm:$0xff]  }
 0x696   :  { %v953_v10 = vsel %vm951_vm4, %v939_v7, %v952_v5  ;;  %1678 = vmatmul.msk.bf16.vlgmr.msra.gmra.mxu2 %vm610_vm10, %v1770_v9  ;;  %v1776_v11 = vld [vmem:[#allocation3] sm:$0xf0]  ;;  %v991_v12 = vshll.u32 %v1770_v9, 16  ;;  %v989_v18 = vshrl.u32 %v1770_v9, 16  ;;  %v1202_v5 = vld [vmem:[%s2294_s9] sm:$0x3] }
 0x697   :  { %954 = vst [vmem:[#allocation3 + $0x8] sm:$0x3] %v953_v10  ;;  %v1778_v20 = vor.u32 %v1777_v16, %v1776_v11  ;;  %v1205_v10 = vld [vmem:[%s2295_s10 + $0x10] sm:$0x3]  ;;  %v1193_v11 = vld [vmem:[%s2292_s7] sm:$0xf] }
 0x698   :  { %v993_v22 = vrot.slane %v991_v12, 1 }
 0x699   :  { %v1128_v25 = vrot.slane %v1778_v20, 1 }
 0x69a   :  { %v994_v29 = vor.u32 %v993_v22, %v989_v18 }
 0x69e   :  { %v957_v13 = vld [vmem:[#allocation3 + $0x8] sm:$0x1] }
 0x69f   :  { %v968_v15 = vld [vmem:[#allocation3 + $0x8] sm:$0x3]  ;;  %v1058_v21 = vunpack.c.l.b16 %v957_v13 }
 0x6a0   :  { %v985_v17 = vunpack.c.l.b16 %v968_v15 }
 0x6a1   :  { %v1059_v14 = vpack.c.b16 %v1058_v21, %v1058_v21 }
 0x6a2   :  { %v987_v24 = vpack.c.b16 %v985_v17, %v985_v17 }
 0x6a4   :  { %v1129_v26 = vrot.slane %v987_v24, 1  ;;  %v996_v27 = vshll.u32 %v987_v24, 16  ;;  %v1000_v33 = vshrl.u32 %v987_v24, 16 }
 0x6a6   :  { %v1130_v30 = vsel %vm536_vm6, %v1128_v25, %v1129_v26  ;;  %v998_v31 = vrot.slane %v996_v27, 1  ;;  %1679 = vmatmul.msk.bf16.gmra.mxu2 %vm610_vm10, %v1059_v14 }
 0x6a7   :  { %1710 = vmatmul.msk.bf16.vlgmr.msra.gmra.mxu3 %vm610_vm10, %v1130_v30 }
 0x6a8   :  { %v999_v32 = vsel %vm408_vm9, %v994_v29, %v998_v31  ;;  %v1002_v35 = vor.u32 %v1000_v33, %v998_v31 }
 0x6a9   :  { %1656 = vmatmul.msk.bf16.vlgmr.msra.gmra.mxu1 %vm610_vm10, %v999_v32 }
 0x6b7   :  { %1711 = vmatmul.msk.bf16.gmra.mxu3 %vm610_vm10, %v1129_v26 }
 0x6b9   :  { %1657 = vmatmul.msk.bf16.gmra.mxu1 %vm610_vm10, %v1002_v35 }
 0x719   :  { %v1104_v45 = vpop.f32.mrf.mxu2 }
 0x721   :  { %v1106_v44 = vpop.f32.mrf.mxu2 }
 0x726   :  { %v1048_v23 = vpop.f32.mrf.mxu1 }
 0x727   :  { %v1105_v48 = vadd.f32 %v1104_v45, %v1048_v23  ;;  %v1791_v45 = vld [vmem:[%s2291_s6 + $0x1] ss:$0 sm:$0xff]  ;;  %s1827_s6 = smov 64  }
 0x729   :  { %v1109_v50 = vpop.f32.mrf.mxu2 }
 0x72a   :  { %v1176_v51 = vpop.f32.mrf.mxu3 }
 0x72b   :  { %v1185_v52 = vadd.f32 %v1176_v51, %v1105_v48  ;;  %v1495_v51 = vmul.f32 %v2131_v6, %v2168_v28 }
 0x72d   :  { %v1190_v53 = vadd.f32 %v1790_v49, %v1185_v52 }
 0x72e   :  { %v1050_v54 = vpop.f32.mrf.mxu1 }
 0x72f   :  { %1712 = vmatmul.msk.f32.vlgmr.msrb.gmra.mxu0 %vm448_vm5, %v1190_v53  ;;  %v1107_v55 = vadd.f32 %v1106_v44, %v1050_v54 }
 0x731   :  { %v1111_v56 = vpop.f32.mrf.mxu2 }
 0x732   :  { %v1178_v57 = vpop.f32.mrf.mxu3 }
 0x733   :  { %v1186_v58 = vadd.f32 %v1178_v57, %v1107_v55  ;;  %v1496_v55 = vmul.f32 %v2131_v6, %v2189_v46 }
 0x735   :  { %v1191_v59 = vadd.f32 %v1790_v49, %v1186_v58 }
 0x736   :  { %v1053_v60 = vpop.f32.mrf.mxu1 }
 0x737   :  { %1713 = vmatmul.msk.f32.gmra.mxu0 %vm448_vm5, %v1191_v59  ;;  %v1110_v61 = vadd.f32 %v1109_v50, %v1053_v60 }
 0x73a   :  { %v1181_v62 = vpop.f32.mrf.mxu3 }
 0x73b   :  { %v1187_v63 = vadd.f32 %v1181_v62, %v1110_v61 }
 0x73d   :  { %v1192_v0 = vadd.f32 %v1790_v49, %v1187_v63 }
 0x73e   :  { %v1055_v47 = vpop.f32.mrf.mxu1 }
 0x73f   :  { %1714 = vmatmul.msk.f32.gmra.mxu0 %vm448_vm5, %v1192_v0 }
 0x742   :  { %v1183_v1 = vpop.f32.mrf.mxu3 }
 0x7ac   :  { %v1234_v2 = vpop.f32.mrf.mxu0 }
 0x7b4   :  { %v1237_v3 = vpop.f32.mrf.mxu0 }
 0x7bc   :  { %v1240_v4 = vpop.f32.mrf.mxu0 }
 0x7bd   :  { %1715 = vmatpush.msk.msrb.mxu1 %vm650_vm11, %v1240_v4 }
 0x7bf   :  { %1263 = vmatpush.msrb.mxu1 %v1237_v3 }
 0x7c1   :  { %1264 = vmatpush.msrb.mxu1 %v1234_v2 }
 0x7c2   :  { %1716 = vmatmul.msk.f32.vlgmr.msrb.gmra.mxu1 %vm646_vm12, %v1202_v5 }
 0x7c3   :  { %1721 = vmatpush.msk.msra.mxu1 %vm2298_vm1, %v1193_v11 }
 0x83f   :  { %v1266_v7 = vpop.f32.mrf.mxu1 }
 0x840   :  { %v1269_v9 = vmul.f32 0.0078125, %v1266_v7 }
 0x842   :  { %1717 = vmatpush.msk.msrb.mxu2 %vm650_vm11, %v1269_v9 }
 0x843   :  { %1718 = vmatmul.msk.f32.vlgmr.msrb.gmra.mxu2 %vm368_vm13, %v2070_v34 }
 0x844   :  { %1734 = vmatpush.msk.msra.mxu2 %vm2299_vm7, %v1193_v11 }
 0x84b   :  { %1719 = vmatmul.msk.f32.gmra.mxu2 %vm368_vm13, %v2078_v19 }
 0x853   :  { %1720 = vmatmul.msk.f32.gmra.mxu2 %vm368_vm13, %v1205_v10 }
 0x8c6   :  { %v1299_v12 = vpop.f32.mrf.mxu2 }
 0x8c7   :  { %1722 = vmatmul.msk.f32.vlgmr.msra.gmra.mxu1 %vm713_vm15, %v1299_v12 }
 0x8ce   :  { %v1302_v13 = vpop.f32.mrf.mxu2 }
 0x8cf   :  { %1723 = vmatmul.msk.f32.gmra.mxu1 %vm713_vm15, %v1302_v13 }
 0x8d6   :  { %v1305_v15 = vpop.f32.mrf.mxu2 }
 0x8d7   :  { %1724 = vmatmul.msk.f32.gmra.mxu1 %vm713_vm15, %v1305_v15 }
 0x944   :  { %v1337_v16 = vpop.f32.mrf.mxu1 }
 0x945   :  { %v1346_v17 = vsub.f32 %v1190_v53, %v1337_v16 }
 0x947   :  { %v1349_v20 = vmul.f32 %v1346_v17, %v1346_v17 }
 0x949   :  { %1725 = vmatmul.msk.f32.vlgmr.msrb.gmra.mxu3 %vm448_vm5, %v1349_v20 }
 0x94c   :  { %v1340_v21 = vpop.f32.mrf.mxu1 }
 0x94d   :  { %v1347_v22 = vsub.f32 %v1191_v59, %v1340_v21 }
 0x94f   :  { %v1350_v24 = vmul.f32 %v1347_v22, %v1347_v22 }
 0x951   :  { %1726 = vmatmul.msk.f32.gmra.mxu3 %vm448_vm5, %v1350_v24 }
 0x954   :  { %v1343_v18 = vpop.f32.mrf.mxu1 }
 0x955   :  { %v1348_v25 = vsub.f32 %v1192_v0, %v1343_v18 }
 0x957   :  { %v1351_v26 = vmul.f32 %v1348_v25, %v1348_v25 }
 0x959   :  { %1727 = vmatmul.msk.f32.gmra.mxu3 %vm448_vm5, %v1351_v26 }
 0x9cc   :  { %v1378_v27 = vpop.f32.mrf.mxu3 }
 0x9d4   :  { %v1381_v14 = vpop.f32.mrf.mxu3 }
 0x9dc   :  { %v1384_v29 = vpop.f32.mrf.mxu3 }
 0x9dd   :  { %1728 = vmatpush.msk.msrb.mxu1 %vm650_vm11, %v1384_v29 }
 0x9df   :  { %1404 = vmatpush.msrb.mxu1 %v1381_v14 }
 0x9e1   :  { %1405 = vmatpush.msrb.mxu1 %v1378_v27 }
 0x9e2   :  { %1729 = vmatmul.msk.f32.vlgmr.msrb.gmra.mxu1 %vm646_vm12, %v1202_v5 }
 0xa5f   :  { %v1407_v30 = vpop.f32.mrf.mxu1 }
 0xa60   :  { %v1410_v31 = vmul.f32 0.0078125, %v1407_v30 }
 0xa62   :  { %v1411_v32 = vadd.f32 1e-05, %v1410_v31 }
 0xa64   :  { %1794 = vrsqrt.f32 %v1411_v32  ;;  %vm1418_vm9 = vweird.f32 %v1411_v32 }
 0xa6a   :  { %v1795_v33 = vpop.eup %1794 }
 0xa6b   :  { %v1413_v35 = vmul.f32 %v1795_v33, %v1411_v32  ;;  %vm1419_vm6 = vweird.f32 %v1795_v33 }
 0xa6c   :  { %vm1420_vm10 = vmor %vm1418_vm9, %vm1419_vm6 }
 0xa6d   :  { %v1414_v36 = vmul.f32 %v1795_v33, %v1413_v35 }
 0xa6f   :  { %v1415_v37 = vmul.f32 0.5, %v1414_v36 }
 0xa71   :  { %v1416_v38 = vsub.f32 1.5, %v1415_v37 }
 0xa73   :  { %v1417_v39 = vmul.f32 %v1795_v33, %v1416_v38 }
 0xa75   :  { %v1421_v40 = vsel %vm1420_vm10, %v1795_v33, %v1417_v39 }
 0xa76   :  { %1730 = vmatpush.msk.msra.mxu0 %vm650_vm11, %v1421_v40  ;;  %vm1505_vm11 = vcmask 1045504  }
 0xa77   :  { %1731 = vmatmul.msk.f32.vlgmr.msra.gmra.mxu0 %vm368_vm13, %v2070_v34 }
 0xa7f   :  { %1732 = vmatmul.msk.f32.gmra.mxu0 %vm368_vm13, %v2078_v19 }
 0xa87   :  { %1733 = vmatmul.msk.f32.gmra.mxu0 %vm368_vm13, %v1205_v10 }
 0xaf4   :  { %v1442_v42 = vpop.f32.mrf.mxu0 }
 0xaf5   :  { %1735 = vmatmul.msk.f32.vlgmr.msra.gmra.mxu2 %vm713_vm15, %v1442_v42 }
 0xafc   :  { %v1445_v43 = vpop.f32.mrf.mxu0 }
 0xafd   :  { %1736 = vmatmul.msk.f32.gmra.mxu2 %vm713_vm15, %v1445_v43 }
 0xb04   :  { %v1448_v41 = vpop.f32.mrf.mxu0 }
 0xb05   :  { %1737 = vmatmul.msk.f32.gmra.mxu2 %vm713_vm15, %v1448_v41 }
 0xb78   :  { %v1477_v44 = vpop.f32.mrf.mxu2 }
 0xb79   :  { %v1486_v34 = vmul.f32 %v1477_v44, %v1346_v17 }
 0xb7b   :  { %v1490_v23 = vmul.f32 %v1791_v45, %v1486_v34 }
 0xb7d   :  { %v1497_v19 = vadd.f32 %v2134_v8, %v1490_v23 }
 0xb7f   :  { %v1500_v28 = vmax.f32 %v1497_v19, 0.0 }
 0xb80   :  { %v1480_v48 = vpop.f32.mrf.mxu2 }
 0xb81   :  { %v1487_v49 = vmul.f32 %v1480_v48, %v1347_v22 }
 0xb83   :  { %v1491_v50 = vmul.f32 %v1791_v45, %v1487_v49 }
 0xb85   :  { %v1498_v53 = vadd.f32 %v1495_v51, %v1491_v50 }
 0xb87   :  { %v1501_v57 = vmax.f32 %v1498_v53, 0.0 }
 0xb88   :  { %v1483_v52 = vpop.f32.mrf.mxu2 }
 0xb89   :  { %v1488_v54 = vmul.f32 %v1483_v52, %v1348_v25  ;;  %v1506_v60 = vrot.slane %v1501_v57, 2 }
 0xb8b   :  { %v1492_v56 = vmul.f32 %v1791_v45, %v1488_v54 }
 0xb8d   :  { %v1499_v58 = vadd.f32 %v1496_v55, %v1492_v56 }
 0xb8f   :  { %v1502_v59 = vmax.f32 %v1499_v58, 0.0 }
 0xb91   :  { %v1507_v61 = vrot.slane %v1502_v59, 2 }
 0xb93   :  { %v1508_v8 = vsel %vm1505_vm11, %v1506_v60, %v1507_v61 }
 0xb94   :  { %1509 = vrot.lane.b32.xlu2 %v1508_v8, %s1827_s6 }
 0xbee   :  { %v1510_v62 = vpop.permute.xlu2 %1509 }
 0xbef   :  { %v1512_v6 = vsel %vm448_vm5, %v1500_v28, %v1510_v62 }
 0xbf0   :  { %1513 = vst [vmem:[#allocation4] sm:$0xff] %v1512_v6 }
 0xbf1   :  { %1524 = dma.vmem_to_hbm [thread:$0]  %s1520_s20, 128, %s1522_s1, [#allocation5]  }
 0xbf2   :  { %1820 = dma.done.wait [#allocation5], 128  }
 0xbf3   :  { %1821 = vsyncadd [#allocation5], 4294967168 }
 0xbf4   :  { %1529 = vsyncpa [#allocation5], 1 }

// kernel: tpu_custom_call.1
= control target key start
LH: loop header
LB: loop body
LE: loop exit
PB: predicated region body
PF: predicated region fallthrough
CT: control target
= control target key end

     0   :  { %s1822_s21 = smov 112   ;;  %s2285_s0 = inlined_call_operand.vmem [shape: f32[2,4,8,32], index: 0, kind: input, shape index: {}]   ;;  %s2286_s1 = inlined_call_operand.vmem [shape: bf16[3,64,80], index: 1, kind: input, shape index: {}]   ;;  %s2287_s2 = inlined_call_operand.vmem [shape: bf16[3,80,64], index: 2, kind: input, shape index: {}]   ;;  %s2288_s3 = inlined_call_operand.vmem [shape: f32[3,80], index: 3, kind: input, shape index: {}]   ;;  %s2289_s4 = inlined_call_operand.vmem [shape: f32[4,80], index: 4, kind: input, shape index: {}]   ;;  %s2290_s5 = inlined_call_operand.vmem [shape: f32[80,4], index: 5, kind: input, shape index: {}]   ;;  %s2291_s6 = inlined_call_operand.vmem [shape: f32[3,64], index: 6, kind: input, shape index: {}]   ;;  %s2292_s7 = inlined_call_operand.vmem [shape: f32[4,64], index: 7, kind: input, shape index: {}]   ;;  %s2293_s8 = inlined_call_operand.vmem [shape: f32[64,4], index: 8, kind: input, shape index: {}]   ;;  %s2294_s9 = inlined_call_operand.vmem [shape: f32[2,18], index: 9, kind: input, shape index: {}]   ;;  %s2295_s10 = inlined_call_operand.vmem [shape: f32[18,2], index: 10, kind: input, shape index: {}]   ;;  %s2296_s11 = inlined_call_operand.hbm [shape: f32[1,8,128], index: 11, kind: output, shape index: {}]  }
   0x1   :  { %v78_v0 = vld [vmem:[%s2285_s0 + $0x30] sm:$0xff]  ;;  %v77_v1 = vld [vmem:[%s2285_s0 + $0x28] sm:$0xff]  ;;  %v79_v2 = vld [vmem:[%s2285_s0 + $0x38] sm:$0xff] }
   0x2   :  { %100 = vrot.lane.b32.xlu1 %v78_v0, %s1822_s21  ;;  %98 = vrot.lane.b32.xlu0 %v77_v1, %s1822_s21 }
   0x3   :  { %102 = vrot.lane.b32.xlu2 %v79_v2, %s1822_s21 }
   0x4   :  { %16 = vsyncpa [#allocation5], 0  ;;  %v74_v3 = vld [vmem:[%s2285_s0 + $0x10] sm:$0xff]  ;;  %v73_v4 = vld [vmem:[%s2285_s0 + $0x8] sm:$0xff]  ;;  %s1823_s15 = smov 127   ;;  %vm51_vm0 = vcmask 517121  }
   0x5   :  { %v75_v5 = vld [vmem:[%s2285_s0 + $0x18] sm:$0xff]  ;;  %v72_v6 = vld [vmem:[%s2285_s0] sm:$0xff]  ;;  %vm52_vm1 = vsmask.f32 1280  ;;  %vm57_vm3 = vsmask.f32 7942 }
   0x6   :  { %v76_v7 = vld [vmem:[%s2285_s0 + $0x20] sm:$0xff]  ;;  %vm53_vm2 = vmand %vm51_vm0, %vm52_vm1  ;;  %vm152_vm4 = vcmask 121856   ;;  %v59_v26 = vld [vmem:[#allocation2 + $0x8] sm:$0x2]  ;;  %s1824_s0 = smov 16   ;;  %vm40_vm6 = vcmask 516096  }
   0x7   :  { %v54_v24 = vld [vmem:[#allocation2 + $0x4] sm:$0x2]  ;;  %vm58_vm5 = vmand %vm51_vm0, %vm57_vm3  ;;  %v43_v43 = vld [vmem:[#allocation2] sm:$0x1]  ;;  %vm41_vm7 = vsmask.f32 256 }
   0x8   :  { %v55_v25 = vsel %vm53_vm2, 0, %v54_v24  ;;  %v60_v27 = vsel %vm58_vm5, 0, %v59_v26  ;;  %vm46_vm8 = vsmask.f32 7938  ;;  %v48_v45 = vld [vmem:[#allocation2 + $0x4] sm:$0x1]  ;;  %vm42_vm9 = vmand %vm40_vm6, %vm41_vm7 }
   0x9   :  { %56 = vst [vmem:[#allocation2 + $0x4] sm:$0x2] %v55_v25  ;;  %v44_v47 = vsel %vm42_vm9, 0, %v43_v43  ;;  %vm47_vm10 = vmand %vm40_vm6, %vm46_vm8  ;;  %vm280_vm11 = vcmask 125953   ;;  %vm285_vm12 = vcmask 123904   ;;  %s1825_s16 = smov 32  }
   0xa   :  { %92 = vrot.lane.b32.xlu1 %v74_v3, %s1822_s21  ;;  %90 = vrot.lane.b32.xlu0 %v73_v4, %s1822_s21  ;;  %61 = vst [vmem:[#allocation2 + $0x8] sm:$0x2] %v60_v27  ;;  %v49_v50 = vsel %vm47_vm10, 0, %v48_v45  ;;  %vm281_vm13 = vmand %vm280_vm11, %vm57_vm3  ;;  %s1826_s17 = smov 48   ;;  %vm187_vm15 = vcmask 125952   ;;  %vm192_vm0 = vcmask 122880  }
   0xb   :  { %94 = vrot.lane.b32.xlu2 %v75_v5, %s1822_s21  ;;  %45 = vst [vmem:[#allocation2] sm:$0x1] %v44_v47  ;;  %vm286_vm14 = vmand %vm285_vm12, %vm52_vm1  ;;  %vm310_vm5 = vcmask 255104   ;;  %vm211_vm9 = vcmask 257152   ;;  %vm305_vm10 = vcmask 257153   ;;  %s1828_s19 = smov [#allocation4]  }
   0xc   :  { %50 = vst [vmem:[#allocation2 + $0x4] sm:$0x1] %v49_v50  ;;  %vm188_vm2 = vmand %vm187_vm15, %vm46_vm8  ;;  %vm330_vm15 = vcmask 388353   ;;  %s1519_s20 = sshll.u32 %s1828_s19, 4  ;;  %s1520_s20 = int_to_ptr.vmem [resolvable:$true] %s1519_s20 }
   0xd   :  { %vm311_vm6 = vmand %vm310_vm5, %vm52_vm1  ;;  %vm235_vm5 = vcmask 388352  }
   0xe   :  { %vm212_vm11 = vmand %vm211_vm9, %vm46_vm8 }
   0xf   :  { %vm306_vm12 = vmand %vm305_vm10, %vm57_vm3 }
  0x10   :  { %v282_v57 = vld [vmem:[#allocation2 + $0x4] sm:$0xe]  ;;  %vm236_vm9 = vmand %vm235_vm5, %vm46_vm8  ;;  %vm448_vm5 = vcmask 523264  }
  0x11   :  { %v287_v60 = vld [vmem:[#allocation2 + $0x8] sm:$0x3] }
  0x12   :  { %88 = vrot.lane.b32.xlu1 %v72_v6, %s1822_s21  ;;  %96 = vrot.lane.b32.xlu0 %v76_v7, %s1822_s21  ;;  %v189_v45 = vld [vmem:[#allocation2] sm:$0xf] }
  0x5d   :  { %v103_v8 = vpop.permute.xlu2 %102 }
  0x5e   :  { %v1922_v19 = vmax.f32 %v79_v2, %v103_v8 }
  0x65   :  { %v95_v13 = vpop.permute.xlu2 %94 }
  0x66   :  { %v1916_v14 = vmax.f32 %v75_v5, %v95_v13 }
  0x74   :  { %v101_v9 = vpop.permute.xlu1 %100  ;;  %v99_v10 = vpop.permute.xlu0 %98 }
  0x75   :  { %v1913_v11 = vmax.f32 %v78_v0, %v101_v9  ;;  %v117_v12 = vmax.f32 %v77_v1, %v99_v10 }
  0x77   :  { %138 = vrot.lane.b32.xlu2 %v117_v12, %s1823_s15  ;;  %140 = vrot.lane.b32.xlu1 %v1913_v11, %s1823_s15 }
  0x7c   :  { %v93_v15 = vpop.permute.xlu1 %92  ;;  %v91_v16 = vpop.permute.xlu0 %90 }
  0x7d   :  { %v114_v17 = vmax.f32 %v74_v3, %v93_v15  ;;  %v1918_v18 = vmax.f32 %v73_v4, %v91_v16 }
  0x7f   :  { %132 = vrot.lane.b32.xlu2 %v114_v17, %s1823_s15  ;;  %130 = vrot.lane.b32.xlu0 %v1918_v18, %s1823_s15 }
  0x80   :  { %134 = vrot.lane.b32.xlu1 %v1916_v14, %s1823_s15 }
  0x84   :  { %v97_v20 = vpop.permute.xlu0 %96  ;;  %v89_v22 = vpop.permute.xlu1 %88 }
  0x85   :  { %v116_v21 = vmax.f32 %v76_v7, %v97_v20  ;;  %v1925_v23 = vmax.f32 %v72_v6, %v89_v22 }
  0x87   :  { %142 = vrot.lane.b32.xlu0 %v1922_v19, %s1823_s15  ;;  %136 = vrot.lane.b32.xlu2 %v116_v21, %s1823_s15 }
  0x8f   :  { %128 = vrot.lane.b32.xlu0 %v1925_v23, %s1823_s15 }
  0xd1   :  { %v139_v28 = vpop.permute.xlu2 %138 }
  0xd2   :  { %v158_v29 = vsel %vm152_vm4, %v139_v28, %v117_v12 }
  0xd3   :  { %v166_v30 = vmax.f32 %v117_v12, %v158_v29 }
  0xd5   :  { %v174_v31 = vpack.c.bf16 %v166_v30, %v166_v30 }
  0xd7   :  { %v291_v32 = vshrl.u32 %v174_v31, 16  ;;  %v294_v33 = vshll.u32 %v174_v31, 16 }
  0xd9   :  { %v293_v34 = vrot.slane %v291_v32, 6  ;;  %v296_v35 = vrot.slane %v294_v33, 7  ;;  %v133_v36 = vpop.permute.xlu2 %132 }
  0xda   :  { %v155_v37 = vsel %vm152_vm4, %v133_v36, %v114_v17 }
  0xdb   :  { %v297_v38 = vor.u32 %v296_v35, %v293_v34  ;;  %v163_v39 = vmax.f32 %v114_v17, %v155_v37 }
  0xdd   :  { %v298_v40 = vrot.slane %v297_v38, 4  ;;  %v1933_v41 = vpack.c.bf16 %v163_v39, %v163_v39 }
  0xdf   :  { %301 = vrot.lane.b32.xlu1 %v298_v40, %s1824_s0  ;;  %v222_v48 = vshrl.u32 %v1933_v41, 16  ;;  %v225_v33 = vshll.u32 %v1933_v41, 16 }
  0xe1   :  { %v137_v42 = vpop.permute.xlu2 %136  ;;  %v224_v53 = vrot.slane %v222_v48, 7 }
  0xe2   :  { %v157_v44 = vsel %vm152_vm4, %v137_v42, %v116_v21 }
  0xe3   :  { %v165_v46 = vmax.f32 %v116_v21, %v157_v44  ;;  %v228_v63 = vrot.slane %v224_v53, 4  ;;  %v227_v35 = vor.u32 %v225_v33, %v224_v53 }
  0xe5   :  { %v173_v49 = vpack.c.bf16 %v165_v46, %v165_v46  ;;  %v194_v46 = vld [vmem:[#allocation2 + $0x4] sm:$0x1] }
  0xe7   :  { %299 = vrot.lane.b32.xlu1 %v297_v38, %s1824_s0  ;;  %v270_v51 = vshrl.u32 %v173_v49, 16  ;;  %v273_v52 = vshll.u32 %v173_v49, 16 }
  0xe9   :  { %v141_v54 = vpop.permute.xlu1 %140  ;;  %v272_v55 = vrot.slane %v270_v51, 6  ;;  %v275_v56 = vrot.slane %v273_v52, 7 }
  0xea   :  { %v159_v58 = vsel %vm152_vm4, %v141_v54, %v1913_v11 }
  0xeb   :  { %v276_v59 = vor.u32 %v275_v56, %v272_v55  ;;  %v167_v0 = vmax.f32 %v1913_v11, %v159_v58 }
  0xed   :  { %v277_v61 = vrot.slane %v276_v59, 4  ;;  %v283_v62 = vsel %vm281_vm13, %v276_v59, %v282_v57  ;;  %v175_v3 = vpack.c.bf16 %v167_v0, %v167_v0  ;;  %vm335_vm13 = vcmask 386304   ;;  %v1741_v0 = vld [vmem:[%s2286_s1 + $0x18] sm:$0xff] }
  0xee   :  { %284 = vst [vmem:[#allocation2 + $0x4] sm:$0xe] %v283_v62  ;;  %509 = vmatpush.bf16.msra.mxu1 %v1741_v0  ;;  %v600_v0 = vld [vmem:[%s2290_s5 + $0x18] sm:$0xff] }
  0xef   :  { %v288_v1 = vsel %vm286_vm14, %v277_v61, %v287_v60  ;;  %231 = vrot.lane.b32.xlu1 %v228_v63, %s1825_s16  ;;  %v316_v10 = vshrl.u32 %v175_v3, 16  ;;  %v319_v12 = vshll.u32 %v175_v3, 16  ;;  %vm336_vm14 = vmand %vm335_vm13, %vm52_vm1  ;;  %vm264_vm13 = vcmask 516480  }
  0xf0   :  { %289 = vst [vmem:[#allocation2 + $0x8] sm:$0x3] %v288_v1  ;;  %v1740_v1 = vld [vmem:[%s2286_s1 + $0x10] sm:$0xff] }
  0xf1   :  { %v131_v2 = vpop.permute.xlu0 %130  ;;  %v318_v21 = vrot.slane %v316_v10, 6  ;;  %v321_v25 = vrot.slane %v319_v12, 7  ;;  %v1738_v10 = vld [vmem:[%s2286_s1] sm:$0xff]  ;;  %v1743_v12 = vld [vmem:[%s2286_s1 + $0x28] sm:$0xff] }
  0xf2   :  { %v154_v4 = vsel %vm152_vm4, %v131_v2, %v1918_v18  ;;  %v135_v5 = vpop.permute.xlu1 %134  ;;  %v1749_v2 = vld [vmem:[%s2286_s1 + $0x58] sm:$0xff]  ;;  %510 = vmatpush.bf16.msra.mxu1 %v1740_v1  ;;  %v599_v1 = vld [vmem:[%s2290_s5 + $0x10] sm:$0xff] }
  0xf3   :  { %v162_v6 = vmax.f32 %v1918_v18, %v154_v4  ;;  %v156_v7 = vsel %vm152_vm4, %v135_v5, %v1916_v14  ;;  %v322_v32 = vor.u32 %v321_v25, %v318_v21  ;;  %574 = vmatpush.bf16.msra.mxu2 %v1749_v2  ;;  %v598_v2 = vld [vmem:[%s2290_s5 + $0x8] sm:$0xff] }
  0xf4   :  { %v164_v8 = vmax.f32 %v1916_v14, %v156_v7  ;;  %v1739_v7 = vld [vmem:[%s2286_s1 + $0x8] sm:$0xff] }
  0xf5   :  { %v170_v9 = vpack.c.bf16 %v162_v6, %v162_v6  ;;  %v323_v39 = vrot.slane %v322_v32, 4  ;;  %v307_v59 = vld [vmem:[#allocation2 + $0x4] sm:$0xe]  ;;  %v1745_v6 = vld [vmem:[%s2286_s1 + $0x38] sm:$0xff] }
  0xf6   :  { %v172_v11 = vpack.c.bf16 %v164_v8, %v164_v8  ;;  %v1748_v8 = vld [vmem:[%s2286_s1 + $0x50] sm:$0xff]  ;;  %459 = vmatpush.bf16.msra.mxu0 %v1745_v6  ;;  %511 = vmatpush.bf16.msra.mxu1 %v1739_v7 }
  0xf7   :  { %v198_v13 = vshrl.u32 %v170_v9, 16  ;;  %v201_v17 = vshll.u32 %v170_v9, 16  ;;  %v312_v53 = vld [vmem:[#allocation2 + $0x8] sm:$0x3]  ;;  %v1744_v9 = vld [vmem:[%s2286_s1 + $0x30] sm:$0xff]  ;;  %575 = vmatpush.bf16.msra.mxu2 %v1748_v8 }
  0xf8   :  { %v246_v15 = vshrl.u32 %v172_v11, 16  ;;  %v249_v24 = vshll.u32 %v172_v11, 16  ;;  %v1747_v11 = vld [vmem:[%s2286_s1 + $0x48] sm:$0xff]  ;;  %v1786_v8 = vld [vmem:[%s2288_s3] ss:$0 sm:$0xff] }
  0xf9   :  { %v200_v16 = vrot.slane %v198_v13, 7  ;;  %v143_v20 = vpop.permute.xlu0 %142 }
  0xfa   :  { %v248_v22 = vrot.slane %v246_v15, 7  ;;  %v160_v18 = vsel %vm152_vm4, %v143_v20, %v1922_v19  ;;  %460 = vmatpush.bf16.msra.mxu0 %v1744_v9  ;;  %512 = vmatpush.bf16.msra.mxu1 %v1738_v10  ;;  %v1742_v20 = vld [vmem:[%s2286_s1 + $0x20] sm:$0xff] }
  0xfb   :  { %v168_v26 = vmax.f32 %v1922_v19, %v160_v18  ;;  %v203_v27 = vor.u32 %v201_v17, %v200_v16  ;;  %v204_v14 = vrot.slane %v200_v16, 4  ;;  %576 = vmatpush.bf16.msra.mxu2 %v1747_v11  ;;  %v1746_v17 = vld [vmem:[%s2286_s1 + $0x40] sm:$0xff]  ;;  %s1521_s1 = sshll.u32 %s2296_s11, 4  ;;  %s1522_s1 = int_to_ptr.hbm [resolvable:$true] %s1521_s1 }
  0xfc   :  { %v251_v28 = vor.u32 %v249_v24, %v248_v22  ;;  %v252_v51 = vrot.slane %v248_v22, 4 }
  0xfd   :  { %v176_v29 = vpack.c.bf16 %v168_v26, %v168_v26  ;;  %205 = vrot.lane.b32.xlu2 %v203_v27, %s1824_s0  ;;  %207 = vrot.lane.b32.xlu0 %v204_v14, %s1824_s0 }
  0xfe   :  { %253 = vrot.lane.b32.xlu1 %v251_v28, %s1826_s17  ;;  %461 = vmatpush.bf16.msra.mxu0 %v1743_v12 }
  0xff   :  { %v341_v30 = vshrl.u32 %v176_v29, 16  ;;  %v344_v31 = vshll.u32 %v176_v29, 16  ;;  %577 = vmatpush.bf16.msra.mxu2 %v1746_v17 }
 0x101   :  { %v129_v34 = vpop.permute.xlu0 %128  ;;  %v343_v36 = vrot.slane %v341_v30, 6  ;;  %v346_v37 = vrot.slane %v344_v31, 7 }
 0x102   :  { %v153_v19 = vsel %vm152_vm4, %v129_v34, %v1925_v23  ;;  %vm193_vm4 = vmand %vm192_vm0, %vm41_vm7  ;;  %462 = vmatpush.bf16.msra.mxu0 %v1742_v20 }
 0x103   :  { %v161_v38 = vmax.f32 %v1925_v23, %v153_v19  ;;  %v347_v43 = vor.u32 %v346_v37, %v343_v36  ;;  %vm331_vm0 = vmand %vm330_vm15, %vm57_vm3 }
 0x105   :  { %v169_v40 = vpack.c.bf16 %v161_v38, %v161_v38  ;;  %229 = vrot.lane.b32.xlu0 %v227_v35, %s1825_s16  ;;  %326 = vrot.lane.b32.xlu2 %v323_v39, %s1825_s16  ;;  %v348_v48 = vrot.slane %v347_v43, 4  ;;  %v606_v38 = vld [vmem:[%s2290_s5 + $0x48] sm:$0xff] }
 0x106   :  { %626 = vmatpush.msra.mxu3 %v606_v38  ;;  %774 = vmatpush.msrb.mxu2 %v606_v38 }
 0x107   :  { %v178_v42 = vshrl.u32 %v169_v40, 16  ;;  %v181_v44 = vshll.u32 %v169_v40, 16  ;;  %v605_v40 = vld [vmem:[%s2290_s5 + $0x40] sm:$0xff] }
 0x108   :  { %627 = vmatpush.msra.mxu3 %v605_v40  ;;  %775 = vmatpush.msrb.mxu2 %v605_v40 }
 0x109   :  { %v180_v41 = vrot.slane %v178_v42, 7 }
 0x10b   :  { %v183_v47 = vor.u32 %v181_v44, %v180_v41  ;;  %v184_v23 = vrot.slane %v180_v41, 4 }
 0x10d   :  { %v190_v49 = vsel %vm188_vm2, %v183_v47, %v189_v45  ;;  %v195_v50 = vsel %vm193_vm4, %v184_v23, %v194_v46  ;;  %351 = vrot.lane.b32.xlu0 %v348_v48, %s1826_s17  ;;  %324 = vrot.lane.b32.xlu2 %v322_v32, %s1825_s16  ;;  %vm216_vm2 = vcmask 254080  }
 0x10e   :  { %191 = vst [vmem:[#allocation2] sm:$0xf] %v190_v49  ;;  %vm217_vm4 = vmand %vm216_vm2, %vm41_vm7  ;;  %vm355_vm2 = vcmask 519553  }
 0x10f   :  { %196 = vst [vmem:[#allocation2 + $0x4] sm:$0x1] %v195_v50 }
 0x115   :  { %349 = vrot.lane.b32.xlu0 %v347_v43, %s1826_s17  ;;  %255 = vrot.lane.b32.xlu2 %v252_v51, %s1826_s17  ;;  %v213_v56 = vld [vmem:[#allocation2] sm:$0xf] }
 0x116   :  { %v218_v15 = vld [vmem:[#allocation2 + $0x4] sm:$0x1] }
 0x151   :  { %v302_v52 = vpop.permute.xlu1 %301 }
 0x152   :  { %v313_v54 = vsel %vm311_vm6, %v302_v52, %v312_v53  ;;  %vm240_vm6 = vcmask 385280  }
 0x153   :  { %314 = vst [vmem:[#allocation2 + $0x8] sm:$0x3] %v313_v54  ;;  %vm241_vm10 = vmand %vm240_vm6, %vm41_vm7  ;;  %vm536_vm6 = vcmask 1046528  }
 0x157   :  { %v206_v55 = vpop.permute.xlu2 %205 }
 0x158   :  { %v214_v57 = vsel %vm212_vm11, %v206_v55, %v213_v56  ;;  %vm360_vm11 = vcmask 517504  }
 0x159   :  { %215 = vst [vmem:[#allocation2] sm:$0xf] %v214_v57  ;;  %v300_v58 = vpop.permute.xlu1 %299 }
 0x15a   :  { %v308_v60 = vsel %vm306_vm12, %v300_v58, %v307_v59  ;;  %v337_v62 = vld [vmem:[#allocation2 + $0x8] sm:$0x3]  ;;  %vm259_vm12 = vcmask 519552  }
 0x15b   :  { %309 = vst [vmem:[#allocation2 + $0x4] sm:$0xe] %v308_v60  ;;  %vm260_vm15 = vmand %vm259_vm12, %vm46_vm8  ;;  %v604_v60 = vld [vmem:[%s2290_s5 + $0x38] sm:$0xff]  ;;  %vm646_vm12 = vcmask 146432  }
 0x15c   :  { %628 = vmatpush.msra.mxu3 %v604_v60  ;;  %776 = vmatpush.msrb.mxu2 %v604_v60 }
 0x15f   :  { %v327_v61 = vpop.permute.xlu2 %326 }
 0x160   :  { %v338_v63 = vsel %vm336_vm14, %v327_v61, %v337_v62  ;;  %v237_v22 = vld [vmem:[#allocation2] sm:$0xf]  ;;  %vm361_vm14 = vmand %vm360_vm11, %vm52_vm1  ;;  %v603_v61 = vld [vmem:[%s2290_s5 + $0x30] sm:$0xff]  ;;  %vm650_vm11 = vcmask 1041408  }
 0x161   :  { %339 = vst [vmem:[#allocation2 + $0x8] sm:$0x3] %v338_v63  ;;  %v232_v24 = vpop.permute.xlu1 %231  ;;  %v602_v62 = vld [vmem:[%s2290_s5 + $0x28] sm:$0xff]  ;;  %629 = vmatpush.msra.mxu3 %v603_v61  ;;  %777 = vmatpush.msrb.mxu2 %v603_v61  ;;  %v601_v63 = vld [vmem:[%s2290_s5 + $0x20] sm:$0xff] }
 0x162   :  { %v332_v4 = vld [vmem:[#allocation2 + $0x4] sm:$0xe] }
 0x163   :  { %630 = vmatpush.msra.mxu3 %v602_v62  ;;  %778 = vmatpush.msrb.mxu2 %v602_v62 }
 0x165   :  { %631 = vmatpush.msra.mxu3 %v601_v63  ;;  %779 = vmatpush.msrb.mxu2 %v601_v63 }
 0x167   :  { %v325_v3 = vpop.permute.xlu2 %324  ;;  %632 = vmatpush.msra.mxu3 %v600_v0  ;;  %780 = vmatpush.msrb.mxu2 %v600_v0 }
 0x168   :  { %v333_v5 = vsel %vm331_vm0, %v325_v3, %v332_v4  ;;  %vm265_vm0 = vmand %vm264_vm13, %vm41_vm7  ;;  %v362_v14 = vld [vmem:[#allocation2 + $0x8] sm:$0x3]  ;;  %v597_v3 = vld [vmem:[%s2290_s5] sm:$0xff]  ;;  %vm368_vm13 = vcmask 15360  }
 0x169   :  { %334 = vst [vmem:[#allocation2 + $0x4] sm:$0xe] %v333_v5  ;;  %633 = vmatpush.msra.mxu3 %v599_v1  ;;  %781 = vmatpush.msrb.mxu2 %v599_v1 }
 0x16b   :  { %634 = vmatpush.msra.mxu3 %v598_v2  ;;  %782 = vmatpush.msrb.mxu2 %v598_v2 }
 0x16d   :  { %635 = vmatpush.msra.mxu3 %v597_v3  ;;  %783 = vmatpush.msrb.mxu2 %v597_v3  ;;  %v64_v3 = vld [vmem:[#allocation3] sm:$0x1] }
 0x16f   :  { %v208_v13 = vpop.permute.xlu0 %207  ;;  %v256_v31 = vpop.permute.xlu2 %255 }
 0x170   :  { %v219_v16 = vsel %vm217_vm4, %v208_v13, %v218_v15  ;;  %v254_v28 = vpop.permute.xlu1 %253  ;;  %vm356_vm4 = vmand %vm355_vm2, %vm57_vm3  ;;  %v357_v35 = vld [vmem:[#allocation2 + $0x4] sm:$0xe] }
 0x171   :  { %220 = vst [vmem:[#allocation2 + $0x4] sm:$0x1] %v219_v16 }
 0x177   :  { %v230_v21 = vpop.permute.xlu0 %229 }
 0x178   :  { %v242_v18 = vld [vmem:[#allocation2 + $0x4] sm:$0x1]  ;;  %v238_v25 = vsel %vm236_vm9, %v230_v21, %v237_v22  ;;  %vm408_vm9 = vsmask.f32 7424 }
 0x179   :  { %v243_v26 = vsel %vm241_vm10, %v232_v24, %v242_v18  ;;  %239 = vst [vmem:[#allocation2] sm:$0xf] %v238_v25  ;;  %vm610_vm10 = vcmask 654336  }
 0x17a   :  { %244 = vst [vmem:[#allocation2 + $0x4] sm:$0x1] %v243_v26 }
 0x17f   :  { %v352_v27 = vpop.permute.xlu0 %351 }
 0x180   :  { %v261_v29 = vld [vmem:[#allocation2] sm:$0xf]  ;;  %v363_v30 = vsel %vm361_vm14, %v352_v27, %v362_v14  ;;  %vm2297_vm14 = vcmask 1043456  }
 0x181   :  { %v266_v32 = vld [vmem:[#allocation2 + $0x4] sm:$0x1]  ;;  %v262_v33 = vsel %vm260_vm15, %v254_v28, %v261_v29  ;;  %364 = vst [vmem:[#allocation2 + $0x8] sm:$0x3] %v363_v30  ;;  %vm713_vm15 = vcmask 31744  }
 0x182   :  { %v267_v34 = vsel %vm265_vm0, %v256_v31, %v266_v32  ;;  %263 = vst [vmem:[#allocation2] sm:$0xf] %v262_v33  ;;  %v607_v31 = vld [vmem:[%s2294_s9] sm:$0x3] }
 0x183   :  { %268 = vst [vmem:[#allocation2 + $0x4] sm:$0x1] %v267_v34  ;;  %v2070_v34 = vld [vmem:[%s2295_s10] sm:$0xff] }
 0x184   :  { %v369_v61 = vsel %vm368_vm13, %v2070_v34, 0.0 }
 0x185   :  { %370 = vadd.xlane.f32.xlu0 %v369_v61 }
 0x187   :  { %v350_v19 = vpop.permute.xlu0 %349 }
 0x188   :  { %v358_v36 = vsel %vm356_vm4, %v350_v19, %v357_v35  ;;  %v390_v37 = vld [vmem:[#allocation2 + $0x8] sm:$0x3]  ;;  %v367_v35 = vld [vmem:[%s2295_s10 + $0x10] sm:$0x3] }
 0x189   :  { %359 = vst [vmem:[#allocation2 + $0x4] sm:$0xe] %v358_v36  ;;  %v405_v39 = vunpack.c.l.b16 %v390_v37  ;;  %v1774_v44 = vld [vmem:[#allocation2] sm:$0xe]  ;;  %v381_v55 = vld [vmem:[#allocation2 + $0x8] sm:$0x1] }
 0x18a   :  { %v474_v56 = vunpack.c.l.b16 %v381_v55  ;;  %v2078_v19 = vld [vmem:[%s2295_s10 + $0x8] sm:$0xff]  ;;  %v596_v36 = vld [vmem:[%s2289_s4] sm:$0xf] }
 0x18b   :  { %v407_v42 = vpack.c.b16 %v405_v39, %v405_v39  ;;  %1609 = vmatpush.msk.msrb.mxu1 %vm2297_vm14, %v596_v36  ;;  %v372_v62 = vsel %vm368_vm13, %v2078_v19, 0.0 }
 0x18c   :  { %v475_v57 = vpack.c.b16 %v474_v56, %v474_v56  ;;  %373 = vadd.xlane.f32.xlu1 %v372_v62 }
 0x18d   :  { %v417_v47 = vshll.u32 %v407_v42, 16  ;;  %v538_v50 = vrot.slane %v407_v42, 1  ;;  %v421_v58 = vshrl.u32 %v407_v42, 16 }
 0x18f   :  { %v419_v53 = vrot.slane %v417_v47, 1 }
 0x190   :  { %v1766_v43 = vld [vmem:[#allocation2] sm:$0xff]  }
 0x191   :  { %v1773_v41 = vld [vmem:[#allocation2] sm:$0xf0]  ;;  %v412_v45 = vshll.u32 %v1766_v43, 16  ;;  %1572 = vmatmul.msk.bf16.vlgmr.msra.gmra.mxu1 %vm448_vm5, %v1766_v43  ;;  %v410_v23 = vshrl.u32 %v1766_v43, 16  ;;  %v423_v59 = vor.u32 %v421_v58, %v419_v53 }
 0x192   :  { %v1775_v46 = vor.u32 %v1774_v44, %v1773_v41 }
 0x193   :  { %v414_v48 = vrot.slane %v412_v45, 1 }
 0x194   :  { %v537_v49 = vrot.slane %v1775_v46, 1 }
 0x195   :  { %v415_v51 = vor.u32 %v414_v48, %v410_v23 }
 0x196   :  { %v539_v52 = vsel %vm536_vm6, %v537_v49, %v538_v50 }
 0x197   :  { %1598 = vmatmul.msk.bf16.vlgmr.msra.gmra.mxu2 %vm448_vm5, %v539_v52  ;;  %v420_v54 = vsel %vm408_vm9, %v415_v51, %v419_v53 }
 0x198   :  { %1554 = vmatmul.msk.bf16.vlgmr.msra.gmra.mxu0 %vm448_vm5, %v420_v54 }
 0x1a1   :  { %1573 = vmatmul.msk.bf16.gmra.mxu1 %vm448_vm5, %v475_v57 }
 0x1a7   :  { %1599 = vmatmul.msk.bf16.gmra.mxu2 %vm448_vm5, %v538_v50 }
 0x1a8   :  { %1555 = vmatmul.msk.bf16.gmra.mxu0 %vm448_vm5, %v423_v59 }
 0x20e   :  { %v514_v4 = vpop.f32.mrf.mxu1 }
 0x215   :  { %v464_v5 = vpop.f32.mrf.mxu0 }
 0x216   :  { %v516_v6 = vpop.f32.mrf.mxu1  ;;  %v515_v7 = vadd.f32 %v514_v4, %v464_v5  ;;  %v1754_v5 = vld [vmem:[%s2287_s2 + $0x20] sm:$0xff] }
 0x217   :  { %1098 = vmatpush.bf16.msra.mxu2 %v1754_v5 }
 0x21a   :  { %v579_v9 = vpop.f32.mrf.mxu2 }
 0x21b   :  { %v588_v10 = vadd.f32 %v579_v9, %v515_v7  ;;  %v371_v7 = vpop.xlane.xlu0 %370  ;;  %v1753_v9 = vld [vmem:[%s2287_s2 + $0x18] sm:$0xff] }
 0x21c   :  { %1099 = vmatpush.bf16.msra.mxu2 %v1753_v9 }
 0x21d   :  { %v593_v11 = vadd.f32 %v1786_v8, %v588_v10  ;;  %v466_v12 = vpop.f32.mrf.mxu0  ;;  %v1752_v10 = vld [vmem:[%s2287_s2 + $0x10] sm:$0xff] }
 0x21e   :  { %v519_v13 = vpop.f32.mrf.mxu1  ;;  %v517_v15 = vadd.f32 %v516_v6, %v466_v12  ;;  %v2131_v6 = vld [vmem:[%s2291_s6 + $0x2] ss:$0 sm:$0xff] }
 0x21f   :  { %1600 = vmatmul.msk.f32.vlgmr.msra.gmra.mxu3 %vm610_vm10, %v593_v11 }
 0x220   :  { %1100 = vmatpush.bf16.msra.mxu2 %v1752_v10 }
 0x222   :  { %v581_v16 = vpop.f32.mrf.mxu2 }
 0x223   :  { %v589_v17 = vadd.f32 %v581_v16, %v517_v15  ;;  %v1788_v15 = vld [vmem:[%s2288_s3 + $0x2] ss:$0 sm:$0xff] }
 0x224   :  { %v1750_v16 = vld [vmem:[%s2287_s2] sm:$0xff] }
 0x225   :  { %v594_v20 = vadd.f32 %v1786_v8, %v589_v17  ;;  %v469_v21 = vpop.f32.mrf.mxu0  ;;  %v1764_v17 = vld [vmem:[%s2287_s2 + $0x70] sm:$0xff] }
 0x226   :  { %v521_v22 = vpop.f32.mrf.mxu1  ;;  %v520_v24 = vadd.f32 %v519_v13, %v469_v21  ;;  %v1751_v13 = vld [vmem:[%s2287_s2 + $0x8] sm:$0xff] }
 0x227   :  { %1601 = vmatmul.msk.f32.gmra.mxu3 %vm610_vm10, %v594_v20  ;;  %1101 = vmatpush.bf16.msra.mxu2 %v1751_v13  ;;  %v1759_v22 = vld [vmem:[%s2287_s2 + $0x48] sm:$0xff] }
 0x228   :  { %1042 = vmatpush.bf16.msra.mxu1 %v1759_v22 }
 0x22a   :  { %v584_v18 = vpop.f32.mrf.mxu2 }
 0x22b   :  { %v590_v25 = vadd.f32 %v584_v18, %v520_v24  ;;  %1102 = vmatpush.bf16.msra.mxu2 %v1750_v16  ;;  %v901_v18 = vmul.f32 %v1788_v15, %v371_v7 }
 0x22d   :  { %v595_v26 = vadd.f32 %v1786_v8, %v590_v25  ;;  %v471_v27 = vpop.f32.mrf.mxu0  ;;  %v2134_v8 = vmul.f32 %v2131_v6, %v371_v7  ;;  %v1763_v25 = vld [vmem:[%s2287_s2 + $0x68] sm:$0xff] }
 0x22e   :  { %v1758_v27 = vld [vmem:[%s2287_s2 + $0x40] sm:$0xff] }
 0x22f   :  { %1602 = vmatmul.msk.f32.gmra.mxu3 %vm610_vm10, %v595_v26  ;;  %1043 = vmatpush.bf16.msra.mxu1 %v1758_v27 }
 0x232   :  { %v586_v14 = vpop.f32.mrf.mxu2 }
 0x2a2   :  { %v637_v28 = vpop.f32.mrf.mxu3 }
 0x2aa   :  { %v640_v29 = vpop.f32.mrf.mxu3 }
 0x2b2   :  { %v643_v30 = vpop.f32.mrf.mxu3 }
 0x2b3   :  { %1603 = vmatpush.msk.msrb.mxu3 %vm650_vm11, %v643_v30  ;;  %v1757_v30 = vld [vmem:[%s2287_s2 + $0x38] sm:$0xff] }
 0x2b4   :  { %1044 = vmatpush.bf16.msra.mxu1 %v1757_v30 }
 0x2b5   :  { %668 = vmatpush.msrb.mxu3 %v640_v29  ;;  %v1762_v29 = vld [vmem:[%s2287_s2 + $0x60] sm:$0xff] }
 0x2b7   :  { %669 = vmatpush.msrb.mxu3 %v637_v28  ;;  %v2168_v28 = vpop.xlane.xlu1 %373 }
 0x2b8   :  { %1604 = vmatmul.msk.f32.vlgmr.msrb.gmra.mxu3 %vm646_vm12, %v607_v31 }
 0x33b   :  { %v671_v32 = vpop.f32.mrf.mxu3 }
 0x33c   :  { %v674_v33 = vmul.f32 0.0078125, %v671_v32 }
 0x33e   :  { %1605 = vmatpush.msk.msrb.mxu0 %vm650_vm11, %v674_v33  ;;  %v1761_v33 = vld [vmem:[%s2287_s2 + $0x58] sm:$0xff] }
 0x33f   :  { %1606 = vmatmul.msk.f32.vlgmr.msrb.gmra.mxu0 %vm368_vm13, %v2070_v34 }
 0x340   :  { %1622 = vmatpush.msk.msra.mxu0 %vm2297_vm14, %v596_v36  ;;  %vm375_vm14 = vcmask 9216  }
 0x341   :  { %v376_v63 = vsel %vm375_vm14, %v367_v35, 0.0  ;;  %vm67_vm14 = vcmask 648193  }
 0x342   :  { %377 = vadd.xlane.f32.xlu2 %v376_v63 }
 0x347   :  { %1607 = vmatmul.msk.f32.gmra.mxu0 %vm368_vm13, %v2078_v19 }
 0x34f   :  { %1608 = vmatmul.msk.f32.gmra.mxu0 %vm368_vm13, %v367_v35 }
 0x3bc   :  { %v704_v37 = vpop.f32.mrf.mxu0 }
 0x3bd   :  { %1610 = vmatmul.msk.f32.vlgmr.msrb.gmra.mxu1 %vm713_vm15, %v704_v37  ;;  %v902_v37 = vmul.f32 %v1788_v15, %v2168_v28 }
 0x3c4   :  { %v707_v38 = vpop.f32.mrf.mxu0 }
 0x3c5   :  { %1611 = vmatmul.msk.f32.gmra.mxu1 %vm713_vm15, %v707_v38  ;;  %v1756_v38 = vld [vmem:[%s2287_s2 + $0x30] sm:$0xff] }
 0x3c6   :  { %1045 = vmatpush.bf16.msra.mxu1 %v1756_v38  ;;  %v1199_v38 = vld [vmem:[%s2293_s8 + $0x28] sm:$0xff] }
 0x3cc   :  { %v710_v39 = vpop.f32.mrf.mxu0 }
 0x3cd   :  { %1612 = vmatmul.msk.f32.gmra.mxu1 %vm713_vm15, %v710_v39 }
 0x43a   :  { %v744_v40 = vpop.f32.mrf.mxu1 }
 0x43b   :  { %v2094_v42 = vsub.f32 %v593_v11, %v744_v40  ;;  %v69_v11 = vld [vmem:[#allocation3 + $0x8] sm:$0x2] }
 0x43d   :  { %v756_v43 = vmul.f32 %v2094_v42, %v2094_v42 }
 0x43f   :  { %1613 = vmatmul.msk.f32.vlgmr.msrb.gmra.mxu2 %vm610_vm10, %v756_v43 }
 0x442   :  { %v747_v41 = vpop.f32.mrf.mxu1 }
 0x443   :  { %v2099_v44 = vsub.f32 %v594_v20, %v747_v41  ;;  %v1787_v20 = vld [vmem:[%s2288_s3 + $0x1] ss:$0 sm:$0xff] }
 0x445   :  { %v757_v45 = vmul.f32 %v2099_v44, %v2099_v44 }
 0x447   :  { %1614 = vmatmul.msk.f32.gmra.mxu2 %vm610_vm10, %v757_v45 }
 0x44a   :  { %v750_v46 = vpop.f32.mrf.mxu1 }
 0x44b   :  { %v2104_v47 = vsub.f32 %v595_v26, %v750_v46  ;;  %v2189_v46 = vpop.xlane.xlu2 %377 }
 0x44d   :  { %v758_v23 = vmul.f32 %v2104_v47, %v2104_v47 }
 0x44f   :  { %1615 = vmatmul.msk.f32.gmra.mxu2 %vm610_vm10, %v758_v23  ;;  %v1755_v23 = vld [vmem:[%s2287_s2 + $0x28] sm:$0xff] }
 0x450   :  { %1046 = vmatpush.bf16.msra.mxu1 %v1755_v23 }
 0x4c2   :  { %v785_v48 = vpop.f32.mrf.mxu2 }
 0x4ca   :  { %v788_v49 = vpop.f32.mrf.mxu2 }
 0x4d2   :  { %v791_v50 = vpop.f32.mrf.mxu2 }
 0x4d3   :  { %1616 = vmatpush.msk.msra.mxu3 %vm650_vm11, %v791_v50 }
 0x4d5   :  { %811 = vmatpush.msra.mxu3 %v788_v49 }
 0x4d7   :  { %812 = vmatpush.msra.mxu3 %v785_v48 }
 0x4d8   :  { %1617 = vmatmul.msk.f32.vlgmr.msra.gmra.mxu3 %vm646_vm12, %v607_v31 }
 0x55b   :  { %v814_v51 = vpop.f32.mrf.mxu3 }
 0x55c   :  { %v817_v52 = vmul.f32 0.0078125, %v814_v51 }
 0x55e   :  { %v818_v53 = vadd.f32 1e-05, %v817_v52 }
 0x560   :  { %1792 = vrsqrt.f32 %v818_v53  ;;  %vm825_vm2 = vweird.f32 %v818_v53 }
 0x566   :  { %v1793_v54 = vpop.eup %1792 }
 0x567   :  { %v820_v55 = vmul.f32 %v1793_v54, %v818_v53  ;;  %vm826_vm0 = vweird.f32 %v1793_v54 }
 0x568   :  { %vm827_vm4 = vmor %vm825_vm2, %vm826_vm0  ;;  %vm62_vm0 = vcmask 647168  }
 0x569   :  { %v821_v56 = vmul.f32 %v1793_v54, %v820_v55  ;;  %vm63_vm2 = vmand %vm62_vm0, %vm41_vm7 }
 0x56a   :  { %v65_v4 = vsel %vm63_vm2, 0, %v64_v3 }
 0x56b   :  { %v822_v57 = vmul.f32 0.5, %v821_v56  ;;  %66 = vst [vmem:[#allocation3] sm:$0x1] %v65_v4 }
 0x56d   :  { %v823_v58 = vsub.f32 1.5, %v822_v57 }
 0x56f   :  { %v824_v59 = vmul.f32 %v1793_v54, %v823_v58 }
 0x571   :  { %v828_v60 = vsel %vm827_vm4, %v1793_v54, %v824_v59  ;;  %vm68_vm4 = vmand %vm67_vm14, %vm57_vm3  ;;  %vm943_vm3 = vcmask 650240   ;;  %v903_v54 = vmul.f32 %v1788_v15, %v2189_v46  ;;  %vm950_vm14 = vcmask 648192  }
 0x572   :  { %1618 = vmatpush.msk.msrb.mxu3 %vm650_vm11, %v828_v60  ;;  %v70_v12 = vsel %vm68_vm4, 0, %v69_v11  ;;  %vm944_vm0 = vmand %vm943_vm3, %vm46_vm8  ;;  %vm913_vm8 = vsmask.f32 4368 }
 0x573   :  { %1619 = vmatmul.msk.f32.vlgmr.msrb.gmra.mxu3 %vm368_vm13, %v2070_v34  ;;  %71 = vst [vmem:[#allocation3 + $0x8] sm:$0x2] %v70_v12  ;;  %vm914_vm2 = vmor %vm41_vm7, %vm913_vm8 }
 0x574   :  { %1170 = vmatpush.bf16.msra.mxu3 %v1764_v17  ;;  %vm951_vm4 = vmand %vm950_vm14, %vm52_vm1  ;;  %vm2298_vm1 = vcmask 1043456  }
 0x575   :  { %vm2299_vm7 = vmmov %vm2298_vm1 }
 0x578   :  { %1171 = vmatpush.bf16.msra.mxu3 %v1763_v25 }
 0x57a   :  { %v952_v5 = vld [vmem:[#allocation3 + $0x8] sm:$0x3] }
 0x57b   :  { %1620 = vmatmul.msk.f32.gmra.mxu3 %vm368_vm13, %v2078_v19 }
 0x57c   :  { %1172 = vmatpush.bf16.msra.mxu3 %v1762_v29 }
 0x580   :  { %1173 = vmatpush.bf16.msra.mxu3 %v1761_v33 }
 0x583   :  { %1621 = vmatmul.msk.f32.gmra.mxu3 %vm368_vm13, %v367_v35 }
 0x5f6   :  { %v849_v0 = vpop.f32.mrf.mxu3 }
 0x5f7   :  { %1623 = vmatmul.msk.f32.vlgmr.msra.gmra.mxu0 %vm713_vm15, %v849_v0 }
 0x5fe   :  { %v852_v1 = vpop.f32.mrf.mxu3 }
 0x5ff   :  { %1624 = vmatmul.msk.f32.gmra.mxu0 %vm713_vm15, %v852_v1 }
 0x606   :  { %v855_v2 = vpop.f32.mrf.mxu3 }
 0x607   :  { %1625 = vmatmul.msk.f32.gmra.mxu0 %vm713_vm15, %v855_v2 }
 0x674   :  { %v884_v21 = vpop.f32.mrf.mxu0 }
 0x675   :  { %v893_v24 = vmul.f32 %v884_v21, %v2094_v42  ;;  %v1760_v42 = vld [vmem:[%s2287_s2 + $0x50] sm:$0xff] }
 0x676   :  { %1174 = vmatpush.bf16.msra.mxu3 %v1760_v42  ;;  %v1196_v42 = vld [vmem:[%s2293_s8 + $0x10] sm:$0xff] }
 0x677   :  { %v897_v26 = vmul.f32 %v1787_v20, %v893_v24 }
 0x679   :  { %v904_v14 = vadd.f32 %v901_v18, %v897_v26 }
 0x67b   :  { %v907_v31 = vmax.f32 %v904_v14, 0.0 }
 0x67c   :  { %v887_v32 = vpop.f32.mrf.mxu0 }
 0x67d   :  { %v910_v35 = vpack.c.bf16 %v907_v31, %v907_v31  ;;  %v894_v36 = vmul.f32 %v887_v32, %v2099_v44  ;;  %v945_v44 = vld [vmem:[#allocation3] sm:$0xf] }
 0x67f   :  { %v916_v39 = vshrl.u32 %v910_v35, 16  ;;  %v898_v40 = vmul.f32 %v1787_v20, %v894_v36  ;;  %v919_v41 = vshll.u32 %v910_v35, 16  ;;  %v1201_v36 = vld [vmem:[%s2293_s8 + $0x38] sm:$0xff] }
 0x680   :  { %1225 = vmatpush.msrb.mxu0 %v1201_v36  ;;  %1369 = vmatpush.msrb.mxu3 %v1201_v36 }
 0x681   :  { %v918_v43 = vrot.slane %v916_v39, 7  ;;  %v905_v45 = vadd.f32 %v902_v37, %v898_v40  ;;  %v1200_v37 = vld [vmem:[%s2293_s8 + $0x30] sm:$0xff]  ;;  %v1198_v39 = vld [vmem:[%s2293_s8 + $0x20] sm:$0xff]  ;;  %v1197_v40 = vld [vmem:[%s2293_s8 + $0x18] sm:$0xff] }
 0x682   :  { %1226 = vmatpush.msrb.mxu0 %v1200_v37  ;;  %1370 = vmatpush.msrb.mxu3 %v1200_v37 }
 0x683   :  { %v921_v48 = vor.u32 %v919_v41, %v918_v43  ;;  %v908_v49 = vmax.f32 %v905_v45, 0.0  ;;  %v922_v60 = vrot.slane %v918_v43, 4  ;;  %v1195_v43 = vld [vmem:[%s2293_s8 + $0x8] sm:$0xff]  ;;  %v1194_v41 = vld [vmem:[%s2293_s8] sm:$0xff] }
 0x684   :  { %v890_v50 = vpop.f32.mrf.mxu0  ;;  %1227 = vmatpush.msrb.mxu0 %v1199_v38  ;;  %1371 = vmatpush.msrb.mxu3 %v1199_v38 }
 0x685   :  { %v946_v51 = vsel %vm944_vm0, %v921_v48, %v945_v44  ;;  %v911_v52 = vpack.c.bf16 %v908_v49, %v908_v49  ;;  %v895_v53 = vmul.f32 %v890_v50, %v2104_v47  ;;  %v1790_v49 = vld [vmem:[%s2291_s6] ss:$0 sm:$0xff] }
 0x686   :  { %947 = vst [vmem:[#allocation3] sm:$0xf] %v946_v51  ;;  %1228 = vmatpush.msrb.mxu0 %v1198_v39  ;;  %1372 = vmatpush.msrb.mxu3 %v1198_v39 }
 0x687   :  { %v924_v55 = vshrl.u32 %v911_v52, 16  ;;  %v899_v56 = vmul.f32 %v1787_v20, %v895_v53  ;;  %v927_v58 = vshll.u32 %v911_v52, 16 }
 0x688   :  { %1229 = vmatpush.msrb.mxu0 %v1197_v40  ;;  %1373 = vmatpush.msrb.mxu3 %v1197_v40 }
 0x689   :  { %v926_v57 = vrot.slane %v924_v55, 7  ;;  %v906_v59 = vadd.f32 %v903_v54, %v899_v56 }
 0x68a   :  { %1230 = vmatpush.msrb.mxu0 %v1196_v42  ;;  %1374 = vmatpush.msrb.mxu3 %v1196_v42 }
 0x68b   :  { %v929_v61 = vor.u32 %v927_v58, %v926_v57  ;;  %v909_v62 = vmax.f32 %v906_v59, 0.0  ;;  %v931_v3 = vrot.slane %v926_v57, 4 }
 0x68c   :  { %1231 = vmatpush.msrb.mxu0 %v1195_v43  ;;  %1375 = vmatpush.msrb.mxu3 %v1195_v43 }
 0x68d   :  { %v930_v63 = vsel %vm914_vm2, %v922_v60, %v929_v61  ;;  %v912_v0 = vpack.c.bf16 %v909_v62, %v909_v62  ;;  %v1777_v16 = vld [vmem:[#allocation3] sm:$0xe] }
 0x68e   :  { %949 = vst.msk [vmem:[#allocation3 + $0x4] sm:$0xf] %vm943_vm3, %v930_v63  ;;  %1232 = vmatpush.msrb.mxu0 %v1194_v41  ;;  %1376 = vmatpush.msrb.mxu3 %v1194_v41 }
 0x68f   :  { %v933_v47 = vshrl.u32 %v912_v0, 16  ;;  %v936_v2 = vshll.u32 %v912_v0, 16 }
 0x691   :  { %v935_v1 = vrot.slane %v933_v47, 7 }
 0x693   :  { %v938_v4 = vor.u32 %v936_v2, %v935_v1 }
 0x695   :  { %v939_v7 = vsel %vm914_vm2, %v931_v3, %v938_v4  ;;  %v1770_v9 = vld [vmem:[#allocation3] sm:$0xff]  }
 0x696   :  { %v953_v10 = vsel %vm951_vm4, %v939_v7, %v952_v5  ;;  %1678 = vmatmul.msk.bf16.vlgmr.msra.gmra.mxu2 %vm610_vm10, %v1770_v9  ;;  %v1776_v11 = vld [vmem:[#allocation3] sm:$0xf0]  ;;  %v991_v12 = vshll.u32 %v1770_v9, 16  ;;  %v989_v18 = vshrl.u32 %v1770_v9, 16  ;;  %v1202_v5 = vld [vmem:[%s2294_s9] sm:$0x3] }
 0x697   :  { %954 = vst [vmem:[#allocation3 + $0x8] sm:$0x3] %v953_v10  ;;  %v1778_v20 = vor.u32 %v1777_v16, %v1776_v11  ;;  %v1205_v10 = vld [vmem:[%s2295_s10 + $0x10] sm:$0x3]  ;;  %v1193_v11 = vld [vmem:[%s2292_s7] sm:$0xf] }
 0x698   :  { %v993_v22 = vrot.slane %v991_v12, 1 }
 0x699   :  { %v1128_v25 = vrot.slane %v1778_v20, 1 }
 0x69a   :  { %v994_v29 = vor.u32 %v993_v22, %v989_v18 }
 0x69e   :  { %v957_v13 = vld [vmem:[#allocation3 + $0x8] sm:$0x1] }
 0x69f   :  { %v968_v15 = vld [vmem:[#allocation3 + $0x8] sm:$0x3]  ;;  %v1058_v21 = vunpack.c.l.b16 %v957_v13 }
 0x6a0   :  { %v985_v17 = vunpack.c.l.b16 %v968_v15 }
 0x6a1   :  { %v1059_v14 = vpack.c.b16 %v1058_v21, %v1058_v21 }
 0x6a2   :  { %v987_v24 = vpack.c.b16 %v985_v17, %v985_v17 }
 0x6a4   :  { %v1129_v26 = vrot.slane %v987_v24, 1  ;;  %v996_v27 = vshll.u32 %v987_v24, 16  ;;  %v1000_v33 = vshrl.u32 %v987_v24, 16 }
 0x6a6   :  { %v1130_v30 = vsel %vm536_vm6, %v1128_v25, %v1129_v26  ;;  %v998_v31 = vrot.slane %v996_v27, 1  ;;  %1679 = vmatmul.msk.bf16.gmra.mxu2 %vm610_vm10, %v1059_v14 }
 0x6a7   :  { %1710 = vmatmul.msk.bf16.vlgmr.msra.gmra.mxu3 %vm610_vm10, %v1130_v30 }
 0x6a8   :  { %v999_v32 = vsel %vm408_vm9, %v994_v29, %v998_v31  ;;  %v1002_v35 = vor.u32 %v1000_v33, %v998_v31 }
 0x6a9   :  { %1656 = vmatmul.msk.bf16.vlgmr.msra.gmra.mxu1 %vm610_vm10, %v999_v32 }
 0x6b7   :  { %1711 = vmatmul.msk.bf16.gmra.mxu3 %vm610_vm10, %v1129_v26 }
 0x6b9   :  { %1657 = vmatmul.msk.bf16.gmra.mxu1 %vm610_vm10, %v1002_v35 }
 0x719   :  { %v1104_v45 = vpop.f32.mrf.mxu2 }
 0x721   :  { %v1106_v44 = vpop.f32.mrf.mxu2 }
 0x726   :  { %v1048_v23 = vpop.f32.mrf.mxu1 }
 0x727   :  { %v1105_v48 = vadd.f32 %v1104_v45, %v1048_v23  ;;  %v1791_v45 = vld [vmem:[%s2291_s6 + $0x1] ss:$0 sm:$0xff]  ;;  %s1827_s6 = smov 64  }
 0x729   :  { %v1109_v50 = vpop.f32.mrf.mxu2 }
 0x72a   :  { %v1176_v51 = vpop.f32.mrf.mxu3 }
 0x72b   :  { %v1185_v52 = vadd.f32 %v1176_v51, %v1105_v48  ;;  %v1495_v51 = vmul.f32 %v2131_v6, %v2168_v28 }
 0x72d   :  { %v1190_v53 = vadd.f32 %v1790_v49, %v1185_v52 }
 0x72e   :  { %v1050_v54 = vpop.f32.mrf.mxu1 }
 0x72f   :  { %1712 = vmatmul.msk.f32.vlgmr.msrb.gmra.mxu0 %vm448_vm5, %v1190_v53  ;;  %v1107_v55 = vadd.f32 %v1106_v44, %v1050_v54 }
 0x731   :  { %v1111_v56 = vpop.f32.mrf.mxu2 }
 0x732   :  { %v1178_v57 = vpop.f32.mrf.mxu3 }
 0x733   :  { %v1186_v58 = vadd.f32 %v1178_v57, %v1107_v55  ;;  %v1496_v55 = vmul.f32 %v2131_v6, %v2189_v46 }
 0x735   :  { %v1191_v59 = vadd.f32 %v1790_v49, %v1186_v58 }
 0x736   :  { %v1053_v60 = vpop.f32.mrf.mxu1 }
 0x737   :  { %1713 = vmatmul.msk.f32.gmra.mxu0 %vm448_vm5, %v1191_v59  ;;  %v1110_v61 = vadd.f32 %v1109_v50, %v1053_v60 }
 0x73a   :  { %v1181_v62 = vpop.f32.mrf.mxu3 }
 0x73b   :  { %v1187_v63 = vadd.f32 %v1181_v62, %v1110_v61 }
 0x73d   :  { %v1192_v0 = vadd.f32 %v1790_v49, %v1187_v63 }
 0x73e   :  { %v1055_v47 = vpop.f32.mrf.mxu1 }
 0x73f   :  { %1714 = vmatmul.msk.f32.gmra.mxu0 %vm448_vm5, %v1192_v0 }
 0x742   :  { %v1183_v1 = vpop.f32.mrf.mxu3 }
 0x7ac   :  { %v1234_v2 = vpop.f32.mrf.mxu0 }
 0x7b4   :  { %v1237_v3 = vpop.f32.mrf.mxu0 }
 0x7bc   :  { %v1240_v4 = vpop.f32.mrf.mxu0 }
 0x7bd   :  { %1715 = vmatpush.msk.msrb.mxu1 %vm650_vm11, %v1240_v4 }
 0x7bf   :  { %1263 = vmatpush.msrb.mxu1 %v1237_v3 }
 0x7c1   :  { %1264 = vmatpush.msrb.mxu1 %v1234_v2 }
 0x7c2   :  { %1716 = vmatmul.msk.f32.vlgmr.msrb.gmra.mxu1 %vm646_vm12, %v1202_v5 }
 0x7c3   :  { %1721 = vmatpush.msk.msra.mxu1 %vm2298_vm1, %v1193_v11 }
 0x83f   :  { %v1266_v7 = vpop.f32.mrf.mxu1 }
 0x840   :  { %v1269_v9 = vmul.f32 0.0078125, %v1266_v7 }
 0x842   :  { %1717 = vmatpush.msk.msrb.mxu2 %vm650_vm11, %v1269_v9 }
 0x843   :  { %1718 = vmatmul.msk.f32.vlgmr.msrb.gmra.mxu2 %vm368_vm13, %v2070_v34 }
 0x844   :  { %1734 = vmatpush.msk.msra.mxu2 %vm2299_vm7, %v1193_v11 }
 0x84b   :  { %1719 = vmatmul.msk.f32.gmra.mxu2 %vm368_vm13, %v2078_v19 }
 0x853   :  { %1720 = vmatmul.msk.f32.gmra.mxu2 %vm368_vm13, %v1205_v10 }
 0x8c6   :  { %v1299_v12 = vpop.f32.mrf.mxu2 }
 0x8c7   :  { %1722 = vmatmul.msk.f32.vlgmr.msra.gmra.mxu1 %vm713_vm15, %v1299_v12 }
 0x8ce   :  { %v1302_v13 = vpop.f32.mrf.mxu2 }
 0x8cf   :  { %1723 = vmatmul.msk.f32.gmra.mxu1 %vm713_vm15, %v1302_v13 }
 0x8d6   :  { %v1305_v15 = vpop.f32.mrf.mxu2 }
 0x8d7   :  { %1724 = vmatmul.msk.f32.gmra.mxu1 %vm713_vm15, %v1305_v15 }
 0x944   :  { %v1337_v16 = vpop.f32.mrf.mxu1 }
 0x945   :  { %v1346_v17 = vsub.f32 %v1190_v53, %v1337_v16 }
 0x947   :  { %v1349_v20 = vmul.f32 %v1346_v17, %v1346_v17 }
 0x949   :  { %1725 = vmatmul.msk.f32.vlgmr.msrb.gmra.mxu3 %vm448_vm5, %v1349_v20 }
 0x94c   :  { %v1340_v21 = vpop.f32.mrf.mxu1 }
 0x94d   :  { %v1347_v22 = vsub.f32 %v1191_v59, %v1340_v21 }
 0x94f   :  { %v1350_v24 = vmul.f32 %v1347_v22, %v1347_v22 }
 0x951   :  { %1726 = vmatmul.msk.f32.gmra.mxu3 %vm448_vm5, %v1350_v24 }
 0x954   :  { %v1343_v18 = vpop.f32.mrf.mxu1 }
 0x955   :  { %v1348_v25 = vsub.f32 %v1192_v0, %v1343_v18 }
 0x957   :  { %v1351_v26 = vmul.f32 %v1348_v25, %v1348_v25 }
 0x959   :  { %1727 = vmatmul.msk.f32.gmra.mxu3 %vm448_vm5, %v1351_v26 }
 0x9cc   :  { %v1378_v27 = vpop.f32.mrf.mxu3 }
 0x9d4   :  { %v1381_v14 = vpop.f32.mrf.mxu3 }
 0x9dc   :  { %v1384_v29 = vpop.f32.mrf.mxu3 }
 0x9dd   :  { %1728 = vmatpush.msk.msrb.mxu1 %vm650_vm11, %v1384_v29 }
 0x9df   :  { %1404 = vmatpush.msrb.mxu1 %v1381_v14 }
 0x9e1   :  { %1405 = vmatpush.msrb.mxu1 %v1378_v27 }
 0x9e2   :  { %1729 = vmatmul.msk.f32.vlgmr.msrb.gmra.mxu1 %vm646_vm12, %v1202_v5 }
 0xa5f   :  { %v1407_v30 = vpop.f32.mrf.mxu1 }
 0xa60   :  { %v1410_v31 = vmul.f32 0.0078125, %v1407_v30 }
 0xa62   :  { %v1411_v32 = vadd.f32 1e-05, %v1410_v31 }
 0xa64   :  { %1794 = vrsqrt.f32 %v1411_v32  ;;  %vm1418_vm9 = vweird.f32 %v1411_v32 }
 0xa6a   :  { %v1795_v33 = vpop.eup %1794 }
 0xa6b   :  { %v1413_v35 = vmul.f32 %v1795_v33, %v1411_v32  ;;  %vm1419_vm6 = vweird.f32 %v1795_v33 }
 0xa6c   :  { %vm1420_vm10 = vmor %vm1418_vm9, %vm1419_vm6 }
 0xa6d   :  { %v1414_v36 = vmul.f32 %v1795_v33, %v1413_v35 }
 0xa6f   :  { %v1415_v37 = vmul.f32 0.5, %v1414_v36 }
 0xa71   :  { %v1416_v38 = vsub.f32 1.5, %v1415_v37 }
 0xa73   :  { %v1417_v39 = vmul.f32 %v1795_v33, %v1416_v38 }
 0xa75   :  { %v1421_v40 = vsel %vm1420_vm10, %v1795_v33, %v1417_v39 }
 0xa76   :  { %1730 = vmatpush.msk.msra.mxu0 %vm650_vm11, %v1421_v40  ;;  %vm1505_vm11 = vcmask 1045504  }
 0xa77   :  { %1731 = vmatmul.msk.f32.vlgmr.msra.gmra.mxu0 %vm368_vm13, %v2070_v34 }
 0xa7f   :  { %1732 = vmatmul.msk.f32.gmra.mxu0 %vm368_vm13, %v2078_v19 }
 0xa87   :  { %1733 = vmatmul.msk.f32.gmra.mxu0 %vm368_vm13, %v1205_v10 }
 0xaf4   :  { %v1442_v42 = vpop.f32.mrf.mxu0 }
 0xaf5   :  { %1735 = vmatmul.msk.f32.vlgmr.msra.gmra.mxu2 %vm713_vm15, %v1442_v42 }
 0xafc   :  { %v1445_v43 = vpop.f32.mrf.mxu0 }
 0xafd   :  { %1736 = vmatmul.msk.f32.gmra.mxu2 %vm713_vm15, %v1445_v43 }
 0xb04   :  { %v1448_v41 = vpop.f32.mrf.mxu0 }
 0xb05   :  { %1737 = vmatmul.msk.f32.gmra.mxu2 %vm713_vm15, %v1448_v41 }
 0xb78   :  { %v1477_v44 = vpop.f32.mrf.mxu2 }
 0xb79   :  { %v1486_v34 = vmul.f32 %v1477_v44, %v1346_v17 }
 0xb7b   :  { %v1490_v23 = vmul.f32 %v1791_v45, %v1486_v34 }
 0xb7d   :  { %v1497_v19 = vadd.f32 %v2134_v8, %v1490_v23 }
 0xb7f   :  { %v1500_v28 = vmax.f32 %v1497_v19, 0.0 }
 0xb80   :  { %v1480_v48 = vpop.f32.mrf.mxu2 }
 0xb81   :  { %v1487_v49 = vmul.f32 %v1480_v48, %v1347_v22 }
 0xb83   :  { %v1491_v50 = vmul.f32 %v1791_v45, %v1487_v49 }
 0xb85   :  { %v1498_v53 = vadd.f32 %v1495_v51, %v1491_v50 }
 0xb87   :  { %v1501_v57 = vmax.f32 %v1498_v53, 0.0 }
 0xb88   :  { %v1483_v52 = vpop.f32.mrf.mxu2 }
 0xb89   :  { %v1488_v54 = vmul.f32 %v1483_v52, %v1348_v25  ;;  %v1506_v60 = vrot.slane %v1501_v57, 2 }
 0xb8b   :  { %v1492_v56 = vmul.f32 %v1791_v45, %v1488_v54 }
 0xb8d   :  { %v1499_v58 = vadd.f32 %v1496_v55, %v1492_v56 }
 0xb8f   :  { %v1502_v59 = vmax.f32 %v1499_v58, 0.0 }
 0xb91   :  { %v1507_v61 = vrot.slane %v1502_v59, 2 }
 0xb93   :  { %v1508_v8 = vsel %vm1505_vm11, %v1506_v60, %v1507_v61 }
 0xb94   :  { %1509 = vrot.lane.b32.xlu2 %v1508_v8, %s1827_s6 }
 0xbee   :  { %v1510_v62 = vpop.permute.xlu2 %1509 }
 0xbef   :  { %v1512_v6 = vsel %vm448_vm5, %v1500_v28, %v1510_v62 }
 0xbf0   :  { %1513 = vst [vmem:[#allocation4] sm:$0xff] %v1512_v6 }
 0xbf1   :  { %1524 = dma.vmem_to_hbm [thread:$0]  %s1520_s20, 128, %s1522_s1, [#allocation5]  }
 0xbf2   :  { %1820 = dma.done.wait [#allocation5], 128  }
 0xbf3   :  { %1821 = vsyncadd [#allocation5], 4294967168 }
 0xbf4   :  { %1529 = vsyncpa [#allocation5], 1 }

</bundles_post_ra>
